<compile_context>
chip_gen: v7x
topology: tpu7x:2x2x1
jax: 0.10.0
libtpu: 0.0.40
codegen_flags: <defaults>
</compile_context>

<pallas_src>
import jax
import jax.numpy as jnp
from jax.experimental import pallas as pl
from jax.experimental.pallas import tpu as pltpu

N_POINTS = 64                       # total points (2 graphs x 32 points)
K = 3                               # self.k in TransformNet
BATCH_SIZE = 2                      # number of graphs
SEG = N_POINTS // BATCH_SIZE        # points per graph (contiguous, equal-sized)
NEG_SLOPE = 0.2
BN_EPS = 1e-5
MXU_DTYPE = jnp.bfloat16
X_PAD = 16                          # point features padded 3 -> 16 (MXU contraction pad)
W1_ROWS = 16                        # rows reserved for [W1delta | W1b] in the packed slab
AUX_ROWS = 11                       # 5 x (gamma,beta) + transform bias
AUX_COLS = 1024


# ----------------------------- in-kernel helpers -----------------------------
def _leaky(x):
    # LeakyReLU(0.2) == max(x, 0.2*x) since 0 < slope < 1 (mul+max, no select).
    return jnp.maximum(x, NEG_SLOPE * x)


def _bn_train(x, gamma, beta):
    # Training-mode BatchNorm (biased variance) in scale/shift form:
    #   y = x*scale + shift,  scale = gamma*rsqrt(var+eps), shift = beta - mean*scale
    # One-pass stats (mean and mean of squares), all in f32.
    mean = jnp.mean(x, axis=0, keepdims=True)
    var = jnp.mean(x * x, axis=0, keepdims=True) - mean * mean
    scale = jax.lax.rsqrt(var + BN_EPS) * gamma
    shift = beta - mean * scale
    return x * scale + shift


def _dot(a, b):
    # bf16 operands on the MXU, f32 accumulation.
    return jnp.dot(a.astype(MXU_DTYPE), b.astype(MXU_DTYPE),
                   preferred_element_type=jnp.float32)


# --------------------------------- fused kernel --------------------------------
def transform_net_kernel(x_ref, sel_ref, wsmall_ref, wc_ref, aux_ref, wt_ref,
                         wl1_hbm, wl2_hbm, o_ref,
                         wl1_vmem, wl2_vmem, sems):
    n = N_POINTS

    # Kick off the head-weight DMAs immediately; they complete under the
    # edgeconv / conv2 compute and are only waited on right before use.
    cp1 = pltpu.make_async_copy(wl1_hbm, wl1_vmem, sems.at[0])
    cp2 = pltpu.make_async_copy(wl2_hbm, wl2_vmem, sems.at[1])
    cp1.start()
    cp2.start()

    # ---- EdgeConv MLP([6,64,128]): e=[x_i, x_j-x_i]; e@W1 = x_i@(Wa-Wb)+x_j@Wb.
    # One fused matmul against the packed [W1delta | W1b] block (rows 0:16).
    h_full = _dot(x_ref[...], wsmall_ref[0:W1_ROWS, :])          # (N, 128) f32
    base = h_full[:, 0:64]                                       # x_i @ (Wa - Wb)
    h_b = h_full[:, 64:128]                                      # x_i @ Wb
    # neighbour gather x_j@Wb via one-hot matmul (k-major edge rows)
    h_b_j = _dot(sel_ref[...], h_b)                              # (K*N, 64)
    h1 = jnp.concatenate([base] * K, axis=0) + h_b_j             # (K*N, 64) == e @ W1
    h1 = _leaky(_bn_train(h1, aux_ref[0:1, 0:64], aux_ref[1:2, 0:64]))
    h2 = _dot(h1, wsmall_ref[W1_ROWS:W1_ROWS + 64, :])           # (K*N, 128)
    h2 = _leaky(_bn_train(h2, aux_ref[2:3, 0:128], aux_ref[3:4, 0:128]))
    # max aggregation over the K neighbour slabs
    f1 = h2[0:n, :]
    for kk in range(1, K):
        f1 = jnp.maximum(f1, h2[kk * n:(kk + 1) * n, :])         # (N, 128)

    # ---- conv2 = MLP([128, 1024]) + per-graph max pool (contiguous segments) --
    h3 = _dot(f1, wc_ref[...])                                   # (N, 1024)
    h3 = _leaky(_bn_train(h3, aux_ref[4:5, :], aux_ref[5:6, :]))
    # TODO(synk): per-graph max assumes contiguous, equal-sized graphs (as built
    # by the wrapper); ragged batches would need scalar-prefetched offsets.
    f2 = jnp.concatenate(
        [jnp.max(h3[g * SEG:(g + 1) * SEG, :], axis=0, keepdims=True)
         for g in range(BATCH_SIZE)], axis=0)                    # (B, 1024)

    # ---- head: linear1/bn3/lrelu -> linear2/bn4/lrelu -> transform -----------
    cp1.wait()                                                   # wl1 now in VMEM
    h4 = _leaky(_bn_train(_dot(f2, wl1_vmem[...]),
                          aux_ref[6:7, 0:512], aux_ref[7:8, 0:512]))      # (B, 512)
    cp2.wait()                                                   # wl2 now in VMEM
    h5 = _leaky(_bn_train(_dot(h4, wl2_vmem[...]),
                          aux_ref[8:9, 0:256], aux_ref[9:10, 0:256]))     # (B, 256)
    # lane-dense (B,128) output; transform bias sits in aux row 10 (lanes 0:9)
    o_ref[...] = _dot(h5, wt_ref[...]) + aux_ref[10:11, 0:128]


# ------------------------------ wrapper glue -------------------------------
def _full_spec(shape):
    nd = len(shape)
    return pl.BlockSpec(shape, lambda i, _nd=nd: (0,) * _nd)


def _knn_kmajor(x, batch):
    """Per-graph kNN (self point included, matching DynamicEdgeConv's
    knn(x, x, k, b, b)); returns neighbour indices in k-major edge order."""
    # TODO(synk): data-dependent top_k neighbour selection stays in XLA glue.
    n = x.shape[0]
    d2 = jnp.sum((x[:, None, :] - x[None, :, :]) ** 2, axis=-1)
    d2 = jnp.where(batch[:, None] == batch[None, :], d2, jnp.inf)
    _, idx = jax.lax.top_k(-d2, K)                               # (N, K)
    return idx.T.reshape(K * n)                                  # row kk*N + i -> j


@jax.jit
def transform_net_forward(kparams, x, batch):
    n = x.shape[0]
    idx_kmajor = _knn_kmajor(x, batch)
    # one-hot neighbour-selection matrix for the in-kernel MXU gather
    sel = (idx_kmajor[:, None] == jnp.arange(n)[None, :]).astype(MXU_DTYPE)  # (K*N, N)
    x_pad = jnp.zeros((n, X_PAD), jnp.float32).at[:, 0:3].set(x)

    inputs = (x_pad, sel, kparams['wsmall'], kparams['wc'], kparams['aux'],
              kparams['wt'], kparams['wl1'], kparams['wl2'])
    in_specs = [
        _full_spec(x_pad.shape), _full_spec(sel.shape),
        _full_spec(kparams['wsmall'].shape), _full_spec(kparams['wc'].shape),
        _full_spec(kparams['aux'].shape), _full_spec(kparams['wt'].shape),
        pl.BlockSpec(memory_space=pl.ANY),      # wl1: manual async copy in-kernel
        pl.BlockSpec(memory_space=pl.ANY),      # wl2: manual async copy in-kernel
    ]

    # NOTE(v7x): one point cloud -> grid=(1,) pins a single TensorCore; multiple
    # independent clouds should be batched behind a leading 'parallel' grid axis.
    out = pl.pallas_call(
        transform_net_kernel,
        grid=(1,),
        in_specs=in_specs,
        out_specs=_full_spec((BATCH_SIZE, 128)),
        out_shape=jax.ShapeDtypeStruct((BATCH_SIZE, 128), jnp.float32),
        scratch_shapes=[pltpu.VMEM((1024, 512), MXU_DTYPE),
                        pltpu.VMEM((512, 256), MXU_DTYPE),
                        pltpu.SemaphoreType.DMA((2,))],
        compiler_params=pltpu.CompilerParams(dimension_semantics=("arbitrary",)),
    )(*inputs)
    return out[:, 0:9].reshape(BATCH_SIZE, 3, 3)


# ------------------------------ parameters -------------------------------
def init_params(key, *, zero_transform=True, randomize_bn=False):
    """Natural (unpacked, f32) parameters with PyTorch-style init."""
    ks = jax.random.split(key, 17)

    def lin(k, fi, fo):
        bound = 1.0 / jnp.sqrt(jnp.float32(fi))
        return jax.random.uniform(k, (fi, fo), jnp.float32, -bound, bound)

    def bn(c, kg, kb):
        if randomize_bn:
            return (jax.random.uniform(kg, (1, c), jnp.float32, 0.5, 1.5),
                    jax.random.uniform(kb, (1, c), jnp.float32, -0.5, 0.5))
        return jnp.ones((1, c), jnp.float32), jnp.zeros((1, c), jnp.float32)

    p = {'w1': lin(ks[0], 6, 64), 'w2': lin(ks[1], 64, 128),
         'wc': lin(ks[2], 128, 1024), 'wl1': lin(ks[3], 1024, 512),
         'wl2': lin(ks[4], 512, 256)}
    if zero_transform:   # module __init__: transform.weight = 0, bias = eye(3)
        p['wt'] = jnp.zeros((256, 9), jnp.float32)
        p['bt'] = jnp.eye(3, dtype=jnp.float32).reshape(1, 9)
    else:
        p['wt'] = lin(ks[5], 256, 9)
        p['bt'] = jax.random.uniform(ks[6], (1, 9), jnp.float32, -0.0625, 0.0625)
    p['g1'], p['b1'] = bn(64, ks[7], ks[8])
    p['g2'], p['b2'] = bn(128, ks[9], ks[10])
    p['gc'], p['bc'] = bn(1024, ks[11], ks[12])
    p['g3'], p['b3'] = bn(512, ks[13], ks[14])
    p['g4'], p['b4'] = bn(256, ks[15], ks[16])
    return p


def pack_params(p):
    """Pack natural params into the kernel's input slabs (bf16 weights, f32 aux)."""
    # W1 reformulation done in f32, single bf16 cast (per review):
    #   [x_i, x_j-x_i] @ W1 == x_i @ (Wa - Wb) + x_j @ Wb,  Wa=W1[:3], Wb=W1[3:]
    wa, wb = p['w1'][0:3], p['w1'][3:6]
    w1cat = jnp.concatenate([wa - wb, wb], axis=1)                        # (3, 128) f32
    w1cat = jnp.zeros((W1_ROWS, 128), jnp.float32).at[0:3, :].set(w1cat)
    wsmall = jnp.concatenate([w1cat, p['w2']], axis=0).astype(MXU_DTYPE)  # (80, 128)

    aux = jnp.zeros((AUX_ROWS, AUX_COLS), jnp.float32)
    rows = [p['g1'], p['b1'], p['g2'], p['b2'], p['gc'], p['bc'],
            p['g3'], p['b3'], p['g4'], p['b4'], p['bt']]
    for r, v in enumerate(rows):
        aux = aux.at[r, 0:v.shape[1]].set(v[0])

    wt = jnp.zeros((256, 128), jnp.float32).at[:, 0:9].set(p['wt']).astype(MXU_DTYPE)
    return dict(wsmall=wsmall, wc=p['wc'].astype(MXU_DTYPE), aux=aux, wt=wt,
                wl1=p['wl1'].astype(MXU_DTYPE), wl2=p['wl2'].astype(MXU_DTYPE))


# ------------------------------ pure-JAX reference -------------------------------
def reference_forward(kp, x, batch):
    """Pure-JAX mirror of the kernel math (same packed bf16 weights, same W1
    reformulation and BN form), used to validate the Pallas implementation.
    A straight-f32 reference of the original formulation is not a usable oracle
    at these shapes: training-mode BatchNorm over a batch of only 2 graphs
    amplifies bf16 rounding differences by up to 1/sqrt(eps) ~ 316x."""
    n = x.shape[0]
    bf = lambda a: a.astype(MXU_DTYPE)
    dot = lambda a, b: jnp.dot(bf(a), bf(b), preferred_element_type=jnp.float32)

    def bn(h, g, b):
        m = jnp.mean(h, axis=0, keepdims=True)
        v = jnp.mean(h * h, axis=0, keepdims=True) - m * m
        s = jax.lax.rsqrt(v + BN_EPS) * g
        return h * s + (b - m * s)

    lrelu = lambda h: jnp.maximum(h, NEG_SLOPE * h)
    aux = kp['aux']

    idx_kmajor = _knn_kmajor(x, batch)
    x_pad = jnp.zeros((n, X_PAD), jnp.float32).at[:, 0:3].set(x)
    h_full = dot(x_pad, kp['wsmall'][0:W1_ROWS])
    base, h_b = h_full[:, 0:64], h_full[:, 64:128]
    h_b_j = bf(h_b).astype(jnp.float32)[idx_kmajor]     # == in-kernel one-hot bf16 matmul
    h1 = jnp.concatenate([base] * K, axis=0) + h_b_j
    h1 = lrelu(bn(h1, aux[0:1, 0:64], aux[1:2, 0:64]))
    h2 = lrelu(bn(dot(h1, kp['wsmall'][W1_ROWS:W1_ROWS + 64]),
                  aux[2:3, 0:128], aux[3:4, 0:128]))
    f1 = jnp.max(h2.reshape(K, n, 128), axis=0)
    h3 = lrelu(bn(dot(f1, kp['wc']), aux[4:5, :], aux[5:6, :]))
    f2 = jnp.concatenate(
        [jnp.max(h3[g * SEG:(g + 1) * SEG], axis=0, keepdims=True)
         for g in range(BATCH_SIZE)], axis=0)
    h4 = lrelu(bn(dot(f2, kp['wl1']), aux[6:7, 0:512], aux[7:8, 0:512]))
    h5 = lrelu(bn(dot(h4, kp['wl2']), aux[8:9, 0:256], aux[9:10, 0:256]))
    out = dot(h5, kp['wt']) + aux[10:11, 0:128]
    return out[:, 0:9].reshape(BATCH_SIZE, 3, 3)


if __name__ == "__main__":
    key = jax.random.PRNGKey(0)
    kx, kp_rand, kp_init = jax.random.split(key, 3)
    x = jax.random.normal(kx, (N_POINTS, 3), jnp.float32)                 # (N, 3) cloud
    batch = jnp.concatenate([jnp.full((SEG,), g, jnp.int32)
                             for g in range(BATCH_SIZE)])                 # two graphs

    # (1) Nonzero random weights + randomized BN affine params: validate the
    #     fused Pallas path against the pure-JAX mirror (bf16-matmul tolerance).
    p_rand = pack_params(init_params(kp_rand, zero_transform=False, randomize_bn=True))
    out_k = jax.block_until_ready(transform_net_forward(p_rand, x, batch))
    out_r = reference_forward(p_rand, x, batch)
    assert out_k.shape == (BATCH_SIZE, 3, 3)
    assert jnp.allclose(out_k, out_r, rtol=2e-2, atol=2e-2)

    # (2) Module's prescribed init (transform.weight = 0, bias = eye(3)):
    #     the forward pass must produce identity matrices.
    p_id = pack_params(init_params(kp_init, zero_transform=True))
    out_id = jax.block_until_ready(transform_net_forward(p_id, x, batch))
    expected = jnp.broadcast_to(jnp.eye(3, dtype=jnp.float32), (BATCH_SIZE, 3, 3))
    assert jnp.allclose(out_id, expected, atol=1e-5)

    print("KERNEL_OK")
</pallas_src>

<mosaic_0001>
module attributes {stable_mosaic.version = 11 : i64} {
  func.func @transform_net_kernel(%arg0: i32, %arg1: memref<64x16xf32, #tpu.memory_space<vmem>>, %arg2: memref<192x64xbf16, #tpu.memory_space<vmem>>, %arg3: memref<80x128xbf16, #tpu.memory_space<vmem>>, %arg4: memref<128x1024xbf16, #tpu.memory_space<vmem>>, %arg5: memref<11x1024xf32, #tpu.memory_space<vmem>>, %arg6: memref<256x128xbf16, #tpu.memory_space<vmem>>, %arg7: memref<1024x512xbf16, #tpu.memory_space<any>>, %arg8: memref<512x256xbf16, #tpu.memory_space<any>>, %arg9: memref<2x128xf32, #tpu.memory_space<vmem>>, %arg10: memref<1024x512xbf16, #tpu.memory_space<vmem>>, %arg11: memref<512x256xbf16, #tpu.memory_space<vmem>>, %arg12: memref<2x!tpu.dma_semaphore, #tpu.memory_space<semaphore_mem>>) attributes {dimension_semantics = [#tpu.dimension_semantics<arbitrary>], iteration_bounds = array<i64: 1>, scalar_prefetch = 0 : i64, scratch_operands = 3 : i64, tpu.core_type = #tpu.core_type<tc>, window_params = [{pipeline_mode = #tpu.pipeline_mode<synchronous>, transform_indices = @transform_0, window_bounds = array<i64: 64, 16>}, {pipeline_mode = #tpu.pipeline_mode<synchronous>, transform_indices = @transform_1, window_bounds = array<i64: 192, 64>}, {pipeline_mode = #tpu.pipeline_mode<synchronous>, transform_indices = @transform_2, window_bounds = array<i64: 80, 128>}, {pipeline_mode = #tpu.pipeline_mode<synchronous>, transform_indices = @transform_3, window_bounds = array<i64: 128, 1024>}, {pipeline_mode = #tpu.pipeline_mode<synchronous>, transform_indices = @transform_4, window_bounds = array<i64: 11, 1024>}, {pipeline_mode = #tpu.pipeline_mode<synchronous>, transform_indices = @transform_5, window_bounds = array<i64: 256, 128>}, {}, {}, {pipeline_mode = #tpu.pipeline_mode<synchronous>, transform_indices = @transform_8, window_bounds = array<i64: 2, 128>}]} {
    %c0_i32 = arith.constant 0 : i32
    %0 = tpu.memref_slice %arg12[%c0_i32] : memref<2x!tpu.dma_semaphore, #tpu.memory_space<semaphore_mem>> -> memref<1x!tpu.dma_semaphore, #tpu.memory_space<semaphore_mem>>
    %1 = tpu.memref_squeeze %0 : memref<1x!tpu.dma_semaphore, #tpu.memory_space<semaphore_mem>> -> memref<!tpu.dma_semaphore, #tpu.memory_space<semaphore_mem>>
    tpu.enqueue_dma source(%arg7 : memref<1024x512xbf16, #tpu.memory_space<any>>) target(%arg10 : memref<1024x512xbf16, #tpu.memory_space<vmem>>) target_semaphore(%1 : memref<!tpu.dma_semaphore, #tpu.memory_space<semaphore_mem>>)
    %c1_i32 = arith.constant 1 : i32
    %2 = tpu.memref_slice %arg12[%c1_i32] : memref<2x!tpu.dma_semaphore, #tpu.memory_space<semaphore_mem>> -> memref<1x!tpu.dma_semaphore, #tpu.memory_space<semaphore_mem>>
    %3 = tpu.memref_squeeze %2 : memref<1x!tpu.dma_semaphore, #tpu.memory_space<semaphore_mem>> -> memref<!tpu.dma_semaphore, #tpu.memory_space<semaphore_mem>>
    tpu.enqueue_dma source(%arg8 : memref<512x256xbf16, #tpu.memory_space<any>>) target(%arg11 : memref<512x256xbf16, #tpu.memory_space<vmem>>) target_semaphore(%3 : memref<!tpu.dma_semaphore, #tpu.memory_space<semaphore_mem>>)
    %c0 = arith.constant 0 : index
    %c0_0 = arith.constant 0 : index
    %4 = vector.load %arg1[%c0, %c0_0] : memref<64x16xf32, #tpu.memory_space<vmem>>, vector<64x16xf32>
    %c0_1 = arith.constant 0 : index
    %c0_2 = arith.constant 0 : index
    %5 = vector.load %arg3[%c0_1, %c0_2] : memref<80x128xbf16, #tpu.memory_space<vmem>>, vector<16x128xbf16>
    %6 = arith.truncf %4 : vector<64x16xf32> to vector<64x16xbf16>
    %cst = arith.constant dense<0.000000e+00> : vector<64x128xf32>
    %7 = tpu.matmul %6, %5, %cst {dimension_numbers = #tpu.dot_dimension_numbers<[1], [0], [0], [1], [0, 0, 1, 1], [], []>} : vector<64x16xbf16>, vector<16x128xbf16>, vector<64x128xf32> -> vector<64x128xf32>
    %8 = vector.extract_strided_slice %7 {offsets = [0, 0], sizes = [64, 64], strides = [1, 1]} : vector<64x128xf32> to vector<64x64xf32>
    %9 = vector.extract_strided_slice %7 {offsets = [0, 64], sizes = [64, 64], strides = [1, 1]} : vector<64x128xf32> to vector<64x64xf32>
    %c0_3 = arith.constant 0 : index
    %c0_4 = arith.constant 0 : index
    %10 = vector.load %arg2[%c0_3, %c0_4] : memref<192x64xbf16, #tpu.memory_space<vmem>>, vector<192x64xbf16>
    %11 = arith.truncf %9 : vector<64x64xf32> to vector<64x64xbf16>
    %cst_5 = arith.constant dense<0.000000e+00> : vector<192x64xf32>
    %12 = tpu.matmul %10, %11, %cst_5 {dimension_numbers = #tpu.dot_dimension_numbers<[1], [0], [0], [1], [0, 0, 1, 1], [], []>} : vector<192x64xbf16>, vector<64x64xbf16>, vector<192x64xf32> -> vector<192x64xf32>
    %13 = tpu.concatenate %8, %8, %8 in 0 : vector<64x64xf32>, vector<64x64xf32>, vector<64x64xf32> -> vector<192x64xf32>
    %14 = arith.addf %13, %12 : vector<192x64xf32>
    %c0_6 = arith.constant 0 : index
    %c0_7 = arith.constant 0 : index
    %15 = vector.load %arg5[%c0_6, %c0_7] : memref<11x1024xf32, #tpu.memory_space<vmem>>, vector<1x64xf32>
    %c1 = arith.constant 1 : index
    %c0_8 = arith.constant 0 : index
    %16 = vector.load %arg5[%c1, %c0_8] : memref<11x1024xf32, #tpu.memory_space<vmem>>, vector<1x64xf32>
    %cst_9 = arith.constant dense<0.000000e+00> : vector<64xf32>
    %17 = vector.multi_reduction <add>, %14, %cst_9 [0] : vector<192x64xf32> to vector<64xf32>
    %18 = vector.shape_cast %17 : vector<64xf32> to vector<1x64xf32>
    %cst_10 = arith.constant 1.920000e+02 : f32
    %19 = vector.broadcast %cst_10 : f32 to vector<1x64xf32>
    %20 = arith.divf %18, %19 : vector<1x64xf32>
    %21 = arith.mulf %14, %14 : vector<192x64xf32>
    %cst_11 = arith.constant dense<0.000000e+00> : vector<64xf32>
    %22 = vector.multi_reduction <add>, %21, %cst_11 [0] : vector<192x64xf32> to vector<64xf32>
    %23 = vector.shape_cast %22 : vector<64xf32> to vector<1x64xf32>
    %cst_12 = arith.constant 1.920000e+02 : f32
    %24 = vector.broadcast %cst_12 : f32 to vector<1x64xf32>
    %25 = arith.divf %23, %24 : vector<1x64xf32>
    %26 = arith.mulf %20, %20 : vector<1x64xf32>
    %27 = arith.subf %25, %26 : vector<1x64xf32>
    %cst_13 = arith.constant 9.99999974E-6 : f32
    %28 = vector.broadcast %cst_13 : f32 to vector<1x64xf32>
    %29 = arith.addf %27, %28 : vector<1x64xf32>
    %30 = math.rsqrt %29 : vector<1x64xf32>
    %31 = arith.mulf %30, %15 : vector<1x64xf32>
    %32 = arith.mulf %20, %31 : vector<1x64xf32>
    %33 = arith.subf %16, %32 : vector<1x64xf32>
    %34 = vector.broadcast %31 : vector<1x64xf32> to vector<192x64xf32>
    %35 = arith.mulf %14, %34 : vector<192x64xf32>
    %36 = vector.broadcast %33 : vector<1x64xf32> to vector<192x64xf32>
    %37 = arith.addf %35, %36 : vector<192x64xf32>
    %cst_14 = arith.constant 2.000000e-01 : f32
    %38 = vector.broadcast %cst_14 : f32 to vector<192x64xf32>
    %39 = arith.mulf %38, %37 : vector<192x64xf32>
    %40 = arith.maximumf %37, %39 : vector<192x64xf32>
    %c16 = arith.constant 16 : index
    %c0_15 = arith.constant 0 : index
    %41 = vector.load %arg3[%c16, %c0_15] : memref<80x128xbf16, #tpu.memory_space<vmem>>, vector<64x128xbf16>
    %42 = arith.truncf %40 : vector<192x64xf32> to vector<192x64xbf16>
    %cst_16 = arith.constant dense<0.000000e+00> : vector<192x128xf32>
    %43 = tpu.matmul %42, %41, %cst_16 {dimension_numbers = #tpu.dot_dimension_numbers<[1], [0], [0], [1], [0, 0, 1, 1], [], []>} : vector<192x64xbf16>, vector<64x128xbf16>, vector<192x128xf32> -> vector<192x128xf32>
    %c2 = arith.constant 2 : index
    %c0_17 = arith.constant 0 : index
    %44 = vector.load %arg5[%c2, %c0_17] : memref<11x1024xf32, #tpu.memory_space<vmem>>, vector<1x128xf32>
    %c3 = arith.constant 3 : index
    %c0_18 = arith.constant 0 : index
    %45 = vector.load %arg5[%c3, %c0_18] : memref<11x1024xf32, #tpu.memory_space<vmem>>, vector<1x128xf32>
    %cst_19 = arith.constant dense<0.000000e+00> : vector<128xf32>
    %46 = vector.multi_reduction <add>, %43, %cst_19 [0] : vector<192x128xf32> to vector<128xf32>
    %47 = vector.shape_cast %46 : vector<128xf32> to vector<1x128xf32>
    %cst_20 = arith.constant 1.920000e+02 : f32
    %48 = vector.broadcast %cst_20 : f32 to vector<1x128xf32>
    %49 = arith.divf %47, %48 : vector<1x128xf32>
    %50 = arith.mulf %43, %43 : vector<192x128xf32>
    %cst_21 = arith.constant dense<0.000000e+00> : vector<128xf32>
    %51 = vector.multi_reduction <add>, %50, %cst_21 [0] : vector<192x128xf32> to vector<128xf32>
    %52 = vector.shape_cast %51 : vector<128xf32> to vector<1x128xf32>
    %cst_22 = arith.constant 1.920000e+02 : f32
    %53 = vector.broadcast %cst_22 : f32 to vector<1x128xf32>
    %54 = arith.divf %52, %53 : vector<1x128xf32>
    %55 = arith.mulf %49, %49 : vector<1x128xf32>
    %56 = arith.subf %54, %55 : vector<1x128xf32>
    %cst_23 = arith.constant 9.99999974E-6 : f32
    %57 = vector.broadcast %cst_23 : f32 to vector<1x128xf32>
    %58 = arith.addf %56, %57 : vector<1x128xf32>
    %59 = math.rsqrt %58 : vector<1x128xf32>
    %60 = arith.mulf %59, %44 : vector<1x128xf32>
    %61 = arith.mulf %49, %60 : vector<1x128xf32>
    %62 = arith.subf %45, %61 : vector<1x128xf32>
    %63 = vector.broadcast %60 : vector<1x128xf32> to vector<192x128xf32>
    %64 = arith.mulf %43, %63 : vector<192x128xf32>
    %65 = vector.broadcast %62 : vector<1x128xf32> to vector<192x128xf32>
    %66 = arith.addf %64, %65 : vector<192x128xf32>
    %cst_24 = arith.constant 2.000000e-01 : f32
    %67 = vector.broadcast %cst_24 : f32 to vector<192x128xf32>
    %68 = arith.mulf %67, %66 : vector<192x128xf32>
    %69 = arith.maximumf %66, %68 : vector<192x128xf32>
    %70 = vector.extract_strided_slice %69 {offsets = [0, 0], sizes = [64, 128], strides = [1, 1]} : vector<192x128xf32> to vector<64x128xf32>
    %71 = vector.extract_strided_slice %69 {offsets = [64, 0], sizes = [64, 128], strides = [1, 1]} : vector<192x128xf32> to vector<64x128xf32>
    %72 = arith.maximumf %70, %71 : vector<64x128xf32>
    %73 = vector.extract_strided_slice %69 {offsets = [128, 0], sizes = [64, 128], strides = [1, 1]} : vector<192x128xf32> to vector<64x128xf32>
    %74 = arith.maximumf %72, %73 : vector<64x128xf32>
    %c0_25 = arith.constant 0 : index
    %c0_26 = arith.constant 0 : index
    %75 = vector.load %arg4[%c0_25, %c0_26] : memref<128x1024xbf16, #tpu.memory_space<vmem>>, vector<128x1024xbf16>
    %76 = arith.truncf %74 : vector<64x128xf32> to vector<64x128xbf16>
    %cst_27 = arith.constant dense<0.000000e+00> : vector<64x1024xf32>
    %77 = tpu.matmul %76, %75, %cst_27 {dimension_numbers = #tpu.dot_dimension_numbers<[1], [0], [0], [1], [0, 0, 1, 1], [], []>} : vector<64x128xbf16>, vector<128x1024xbf16>, vector<64x1024xf32> -> vector<64x1024xf32>
    %c4 = arith.constant 4 : index
    %c0_28 = arith.constant 0 : index
    %78 = vector.load %arg5[%c4, %c0_28] : memref<11x1024xf32, #tpu.memory_space<vmem>>, vector<1x1024xf32>
    %c5 = arith.constant 5 : index
    %c0_29 = arith.constant 0 : index
    %79 = vector.load %arg5[%c5, %c0_29] : memref<11x1024xf32, #tpu.memory_space<vmem>>, vector<1x1024xf32>
    %cst_30 = arith.constant dense<0.000000e+00> : vector<1024xf32>
    %80 = vector.multi_reduction <add>, %77, %cst_30 [0] : vector<64x1024xf32> to vector<1024xf32>
    %81 = vector.shape_cast %80 : vector<1024xf32> to vector<1x1024xf32>
    %cst_31 = arith.constant 6.400000e+01 : f32
    %82 = vector.broadcast %cst_31 : f32 to vector<1x1024xf32>
    %83 = arith.divf %81, %82 : vector<1x1024xf32>
    %84 = arith.mulf %77, %77 : vector<64x1024xf32>
    %cst_32 = arith.constant dense<0.000000e+00> : vector<1024xf32>
    %85 = vector.multi_reduction <add>, %84, %cst_32 [0] : vector<64x1024xf32> to vector<1024xf32>
    %86 = vector.shape_cast %85 : vector<1024xf32> to vector<1x1024xf32>
    %cst_33 = arith.constant 6.400000e+01 : f32
    %87 = vector.broadcast %cst_33 : f32 to vector<1x1024xf32>
    %88 = arith.divf %86, %87 : vector<1x1024xf32>
    %89 = arith.mulf %83, %83 : vector<1x1024xf32>
    %90 = arith.subf %88, %89 : vector<1x1024xf32>
    %cst_34 = arith.constant 9.99999974E-6 : f32
    %91 = vector.broadcast %cst_34 : f32 to vector<1x1024xf32>
    %92 = arith.addf %90, %91 : vector<1x1024xf32>
    %93 = math.rsqrt %92 : vector<1x1024xf32>
    %94 = arith.mulf %93, %78 : vector<1x1024xf32>
    %95 = arith.mulf %83, %94 : vector<1x1024xf32>
    %96 = arith.subf %79, %95 : vector<1x1024xf32>
    %97 = vector.broadcast %94 : vector<1x1024xf32> to vector<64x1024xf32>
    %98 = arith.mulf %77, %97 : vector<64x1024xf32>
    %99 = vector.broadcast %96 : vector<1x1024xf32> to vector<64x1024xf32>
    %100 = arith.addf %98, %99 : vector<64x1024xf32>
    %cst_35 = arith.constant 2.000000e-01 : f32
    %101 = vector.broadcast %cst_35 : f32 to vector<64x1024xf32>
    %102 = arith.mulf %101, %100 : vector<64x1024xf32>
    %103 = arith.maximumf %100, %102 : vector<64x1024xf32>
    %104 = vector.extract_strided_slice %103 {offsets = [0, 0], sizes = [32, 1024], strides = [1, 1]} : vector<64x1024xf32> to vector<32x1024xf32>
    %cst_36 = arith.constant dense<0xFF800000> : vector<1024xf32>
    %105 = vector.multi_reduction <maximumf>, %104, %cst_36 [0] : vector<32x1024xf32> to vector<1024xf32>
    %106 = vector.shape_cast %105 : vector<1024xf32> to vector<1x1024xf32>
    %107 = vector.extract_strided_slice %103 {offsets = [32, 0], sizes = [32, 1024], strides = [1, 1]} : vector<64x1024xf32> to vector<32x1024xf32>
    %cst_37 = arith.constant dense<0xFF800000> : vector<1024xf32>
    %108 = vector.multi_reduction <maximumf>, %107, %cst_37 [0] : vector<32x1024xf32> to vector<1024xf32>
    %109 = vector.shape_cast %108 : vector<1024xf32> to vector<1x1024xf32>
    %110 = tpu.concatenate %106, %109 in 0 : vector<1x1024xf32>, vector<1x1024xf32> -> vector<2x1024xf32>
    %c0_i32_38 = arith.constant 0 : i32
    %111 = tpu.memref_slice %arg12[%c0_i32_38] : memref<2x!tpu.dma_semaphore, #tpu.memory_space<semaphore_mem>> -> memref<1x!tpu.dma_semaphore, #tpu.memory_space<semaphore_mem>>
    %112 = tpu.memref_squeeze %111 : memref<1x!tpu.dma_semaphore, #tpu.memory_space<semaphore_mem>> -> memref<!tpu.dma_semaphore, #tpu.memory_space<semaphore_mem>>
    tpu.wait_dma2 semaphore(%112 : memref<!tpu.dma_semaphore, #tpu.memory_space<semaphore_mem>>) src(%arg7 : memref<1024x512xbf16, #tpu.memory_space<any>>) dst(%arg10 : memref<1024x512xbf16, #tpu.memory_space<vmem>>)
    %c0_39 = arith.constant 0 : index
    %c0_40 = arith.constant 0 : index
    %113 = vector.load %arg10[%c0_39, %c0_40] : memref<1024x512xbf16, #tpu.memory_space<vmem>>, vector<1024x512xbf16>
    %114 = arith.truncf %110 : vector<2x1024xf32> to vector<2x1024xbf16>
    %cst_41 = arith.constant dense<0.000000e+00> : vector<2x512xf32>
    %115 = tpu.matmul %114, %113, %cst_41 {dimension_numbers = #tpu.dot_dimension_numbers<[1], [0], [0], [1], [0, 0, 1, 1], [], []>} : vector<2x1024xbf16>, vector<1024x512xbf16>, vector<2x512xf32> -> vector<2x512xf32>
    %c6 = arith.constant 6 : index
    %c0_42 = arith.constant 0 : index
    %116 = vector.load %arg5[%c6, %c0_42] : memref<11x1024xf32, #tpu.memory_space<vmem>>, vector<1x512xf32>
    %c7 = arith.constant 7 : index
    %c0_43 = arith.constant 0 : index
    %117 = vector.load %arg5[%c7, %c0_43] : memref<11x1024xf32, #tpu.memory_space<vmem>>, vector<1x512xf32>
    %cst_44 = arith.constant dense<0.000000e+00> : vector<512xf32>
    %118 = vector.multi_reduction <add>, %115, %cst_44 [0] : vector<2x512xf32> to vector<512xf32>
    %119 = vector.shape_cast %118 : vector<512xf32> to vector<1x512xf32>
    %cst_45 = arith.constant 2.000000e+00 : f32
    %120 = vector.broadcast %cst_45 : f32 to vector<1x512xf32>
    %121 = arith.divf %119, %120 : vector<1x512xf32>
    %122 = arith.mulf %115, %115 : vector<2x512xf32>
    %cst_46 = arith.constant dense<0.000000e+00> : vector<512xf32>
    %123 = vector.multi_reduction <add>, %122, %cst_46 [0] : vector<2x512xf32> to vector<512xf32>
    %124 = vector.shape_cast %123 : vector<512xf32> to vector<1x512xf32>
    %cst_47 = arith.constant 2.000000e+00 : f32
    %125 = vector.broadcast %cst_47 : f32 to vector<1x512xf32>
    %126 = arith.divf %124, %125 : vector<1x512xf32>
    %127 = arith.mulf %121, %121 : vector<1x512xf32>
    %128 = arith.subf %126, %127 : vector<1x512xf32>
    %cst_48 = arith.constant 9.99999974E-6 : f32
    %129 = vector.broadcast %cst_48 : f32 to vector<1x512xf32>
    %130 = arith.addf %128, %129 : vector<1x512xf32>
    %131 = math.rsqrt %130 : vector<1x512xf32>
    %132 = arith.mulf %131, %116 : vector<1x512xf32>
    %133 = arith.mulf %121, %132 : vector<1x512xf32>
    %134 = arith.subf %117, %133 : vector<1x512xf32>
    %135 = vector.broadcast %132 : vector<1x512xf32> to vector<2x512xf32>
    %136 = arith.mulf %115, %135 : vector<2x512xf32>
    %137 = vector.broadcast %134 : vector<1x512xf32> to vector<2x512xf32>
    %138 = arith.addf %136, %137 : vector<2x512xf32>
    %cst_49 = arith.constant 2.000000e-01 : f32
    %139 = vector.broadcast %cst_49 : f32 to vector<2x512xf32>
    %140 = arith.mulf %139, %138 : vector<2x512xf32>
    %141 = arith.maximumf %138, %140 : vector<2x512xf32>
    %c1_i32_50 = arith.constant 1 : i32
    %142 = tpu.memref_slice %arg12[%c1_i32_50] : memref<2x!tpu.dma_semaphore, #tpu.memory_space<semaphore_mem>> -> memref<1x!tpu.dma_semaphore, #tpu.memory_space<semaphore_mem>>
    %143 = tpu.memref_squeeze %142 : memref<1x!tpu.dma_semaphore, #tpu.memory_space<semaphore_mem>> -> memref<!tpu.dma_semaphore, #tpu.memory_space<semaphore_mem>>
    tpu.wait_dma2 semaphore(%143 : memref<!tpu.dma_semaphore, #tpu.memory_space<semaphore_mem>>) src(%arg8 : memref<512x256xbf16, #tpu.memory_space<any>>) dst(%arg11 : memref<512x256xbf16, #tpu.memory_space<vmem>>)
    %c0_51 = arith.constant 0 : index
    %c0_52 = arith.constant 0 : index
    %144 = vector.load %arg11[%c0_51, %c0_52] : memref<512x256xbf16, #tpu.memory_space<vmem>>, vector<512x256xbf16>
    %145 = arith.truncf %141 : vector<2x512xf32> to vector<2x512xbf16>
    %cst_53 = arith.constant dense<0.000000e+00> : vector<2x256xf32>
    %146 = tpu.matmul %145, %144, %cst_53 {dimension_numbers = #tpu.dot_dimension_numbers<[1], [0], [0], [1], [0, 0, 1, 1], [], []>} : vector<2x512xbf16>, vector<512x256xbf16>, vector<2x256xf32> -> vector<2x256xf32>
    %c8 = arith.constant 8 : index
    %c0_54 = arith.constant 0 : index
    %147 = vector.load %arg5[%c8, %c0_54] : memref<11x1024xf32, #tpu.memory_space<vmem>>, vector<1x256xf32>
    %c9 = arith.constant 9 : index
    %c0_55 = arith.constant 0 : index
    %148 = vector.load %arg5[%c9, %c0_55] : memref<11x1024xf32, #tpu.memory_space<vmem>>, vector<1x256xf32>
    %cst_56 = arith.constant dense<0.000000e+00> : vector<256xf32>
    %149 = vector.multi_reduction <add>, %146, %cst_56 [0] : vector<2x256xf32> to vector<256xf32>
    %150 = vector.shape_cast %149 : vector<256xf32> to vector<1x256xf32>
    %cst_57 = arith.constant 2.000000e+00 : f32
    %151 = vector.broadcast %cst_57 : f32 to vector<1x256xf32>
    %152 = arith.divf %150, %151 : vector<1x256xf32>
    %153 = arith.mulf %146, %146 : vector<2x256xf32>
    %cst_58 = arith.constant dense<0.000000e+00> : vector<256xf32>
    %154 = vector.multi_reduction <add>, %153, %cst_58 [0] : vector<2x256xf32> to vector<256xf32>
    %155 = vector.shape_cast %154 : vector<256xf32> to vector<1x256xf32>
    %cst_59 = arith.constant 2.000000e+00 : f32
    %156 = vector.broadcast %cst_59 : f32 to vector<1x256xf32>
    %157 = arith.divf %155, %156 : vector<1x256xf32>
    %158 = arith.mulf %152, %152 : vector<1x256xf32>
    %159 = arith.subf %157, %158 : vector<1x256xf32>
    %cst_60 = arith.constant 9.99999974E-6 : f32
    %160 = vector.broadcast %cst_60 : f32 to vector<1x256xf32>
    %161 = arith.addf %159, %160 : vector<1x256xf32>
    %162 = math.rsqrt %161 : vector<1x256xf32>
    %163 = arith.mulf %162, %147 : vector<1x256xf32>
    %164 = arith.mulf %152, %163 : vector<1x256xf32>
    %165 = arith.subf %148, %164 : vector<1x256xf32>
    %166 = vector.broadcast %163 : vector<1x256xf32> to vector<2x256xf32>
    %167 = arith.mulf %146, %166 : vector<2x256xf32>
    %168 = vector.broadcast %165 : vector<1x256xf32> to vector<2x256xf32>
    %169 = arith.addf %167, %168 : vector<2x256xf32>
    %cst_61 = arith.constant 2.000000e-01 : f32
    %170 = vector.broadcast %cst_61 : f32 to vector<2x256xf32>
    %171 = arith.mulf %170, %169 : vector<2x256xf32>
    %172 = arith.maximumf %169, %171 : vector<2x256xf32>
    %c0_62 = arith.constant 0 : index
    %c0_63 = arith.constant 0 : index
    %173 = vector.load %arg6[%c0_62, %c0_63] : memref<256x128xbf16, #tpu.memory_space<vmem>>, vector<256x128xbf16>
    %174 = arith.truncf %172 : vector<2x256xf32> to vector<2x256xbf16>
    %cst_64 = arith.constant dense<0.000000e+00> : vector<2x128xf32>
    %175 = tpu.matmul %174, %173, %cst_64 {dimension_numbers = #tpu.dot_dimension_numbers<[1], [0], [0], [1], [0, 0, 1, 1], [], []>} : vector<2x256xbf16>, vector<256x128xbf16>, vector<2x128xf32> -> vector<2x128xf32>
    %c10 = arith.constant 10 : index
    %c0_65 = arith.constant 0 : index
    %176 = vector.load %arg5[%c10, %c0_65] : memref<11x1024xf32, #tpu.memory_space<vmem>>, vector<1x128xf32>
    %177 = vector.broadcast %176 : vector<1x128xf32> to vector<2x128xf32>
    %178 = arith.addf %175, %177 : vector<2x128xf32>
    %c0_66 = arith.constant 0 : index
    %c0_67 = arith.constant 0 : index
    %179 = vector.load %arg9[%c0_66, %c0_67] : memref<2x128xf32, #tpu.memory_space<vmem>>, vector<2x128xf32>
    tpu.vector_store %arg9[%c0_66, %c0_67], %178 {strides = array<i32>} : memref<2x128xf32, #tpu.memory_space<vmem>>, vector<2x128xf32>,
    return
  }
  func.func @transform_0(%arg0: i32) -> (i32, i32) {
    %c0_i32 = arith.constant 0 : i32
    %c0_i32_0 = arith.constant 0 : i32
    %c0_i32_1 = arith.constant 0 : i32
    return %c0_i32, %c0_i32_0 : i32, i32
  }
  func.func @transform_1(%arg0: i32) -> (i32, i32) {
    %c0_i32 = arith.constant 0 : i32
    %c0_i32_0 = arith.constant 0 : i32
    %c0_i32_1 = arith.constant 0 : i32
    return %c0_i32, %c0_i32_0 : i32, i32
  }
  func.func @transform_2(%arg0: i32) -> (i32, i32) {
    %c0_i32 = arith.constant 0 : i32
    %c0_i32_0 = arith.constant 0 : i32
    %c0_i32_1 = arith.constant 0 : i32
    return %c0_i32, %c0_i32_0 : i32, i32
  }
  func.func @transform_3(%arg0: i32) -> (i32, i32) {
    %c0_i32 = arith.constant 0 : i32
    %c0_i32_0 = arith.constant 0 : i32
    %c0_i32_1 = arith.constant 0 : i32
    return %c0_i32, %c0_i32_0 : i32, i32
  }
  func.func @transform_4(%arg0: i32) -> (i32, i32) {
    %c0_i32 = arith.constant 0 : i32
    %c0_i32_0 = arith.constant 0 : i32
    %c0_i32_1 = arith.constant 0 : i32
    return %c0_i32, %c0_i32_0 : i32, i32
  }
  func.func @transform_5(%arg0: i32) -> (i32, i32) {
    %c0_i32 = arith.constant 0 : i32
    %c0_i32_0 = arith.constant 0 : i32
    %c0_i32_1 = arith.constant 0 : i32
    return %c0_i32, %c0_i32_0 : i32, i32
  }
  func.func @transform_8(%arg0: i32) -> (i32, i32) {
    %c0_i32 = arith.constant 0 : i32
    %c0_i32_0 = arith.constant 0 : i32
    %c0_i32_1 = arith.constant 0 : i32
    return %c0_i32, %c0_i32_0 : i32, i32
  }
}

</mosaic_0001>

<bundles_post_ra>
// kernel: eq.22
= control target key start
LH: loop header
LB: loop body
LE: loop exit
PB: predicated region body
PF: predicated region fallthrough
CT: control target
= control target key end

     0   :  { %vm8_vm0 = vcmask 523264   ;;  %s23_s8 = smov 64   ;;  %vm14_vm1 = vcmask 1048064   ;;  %s40_s0 = inlined_call_operand.vmem [shape: s32[3,64], index: 0, kind: input, shape index: {}]   ;;  %s41_s1 = inlined_call_operand.vmem [shape: s32[192], index: 1, kind: output, shape index: {}]  }
   0x1   :  { %v4_v0 = vld [vmem:[%s40_s0] sm:$0xf]  ;;  %s6_s0 = smov 3 }
   0x2   :  { %5 = vst [vmem:[#allocation1] sm:$0xf] %v4_v0 }
   0x9   :  { %v11_v1 = vld [vmem:[#allocation1 + $0x1] sm:$0x1]   ;;  %v7_v2 = vld [vmem:[#allocation1] ss:$2 sm:%s6_s0]  }
   0xa   :  { %12 = vrot.lane.b32.xlu0 %v11_v1, %s23_s8  ;;  %9 = vst.msk [vmem:[#allocation0] sm:$0x3] %vm8_vm0, %v7_v2  }
  0x7c   :  { %v13_v3 = vpop.permute.xlu0 %12  }
  0x7d   :  { %15 = vst.msk [vmem:[#allocation0] sm:$0x1] %vm14_vm1, %v13_v3  }
  0x84   :  { %v19_v4 = vld [vmem:[#allocation0] sm:$0x3] }
  0x85   :  { %21 = vst [vmem:[%s41_s1] sm:$0x3] %v19_v4 }

// kernel: transform_net_forward.1
= control target key start
LH: loop header
LB: loop body
LE: loop exit
PB: predicated region body
PF: predicated region fallthrough
CT: control target
= control target key end

     0   :  { %s30_s27 = sld [smem:[#allocation0]]   ;;  %s4378_s28 = smov [#allocation2]   ;;  %vm116_vm0 = vcmask 130048   ;;  %vm298_vm1 = vcmask 523264   ;;  %vm2738_vm2 = vcmask 1040384   ;;  %s6941_s0 = inlined_call_operand.vmem [shape: f32[64,16], index: 0, kind: input, shape index: {}]   ;;  %s6942_s1 = inlined_call_operand.vmem [shape: bf16[192,64], index: 1, kind: input, shape index: {}]   ;;  %s6943_s2 = inlined_call_operand.vmem [shape: bf16[80,128], index: 2, kind: input, shape index: {}]   ;;  %s6944_s3 = inlined_call_operand.vmem [shape: bf16[128,1024], index: 3, kind: input, shape index: {}]   ;;  %s6945_s4 = inlined_call_operand.vmem [shape: f32[11,1024], index: 4, kind: input, shape index: {}]   ;;  %s6946_s5 = inlined_call_operand.vmem [shape: bf16[256,128], index: 5, kind: input, shape index: {}]   ;;  %s6947_s6 = inlined_call_operand.hbm [shape: bf16[1024,512], index: 6, kind: input, shape index: {}]   ;;  %s6948_s7 = inlined_call_operand.hbm [shape: bf16[512,256], index: 7, kind: input, shape index: {}]   ;;  %s6949_s8 = inlined_call_operand.vmem [shape: f32[2,128], index: 8, kind: output, shape index: {}]  }
   0x1   :  { %s38_s29 = sshll.u32 %s4378_s28, 4  ;;  %s4379_s30 = smov 512   ;;  %s39_s29 = int_to_ptr.vmem [resolvable:$true] %s38_s29 }
   0x2   :  { %42 = sst [smem:[#allocation6]] %s4379_s30  ;;  %s4380_s9 = smov 4  }
   0x3   :  { %44 = sst [smem:[#allocation6 + $0x1]] %s4379_s30  ;;  %s4381_s10 = smov 64  }
   0x4   :  { %46 = sst [smem:[#allocation6 + $0x2]] %s4380_s9  ;;  %s4382_s12 = smov 128  }
   0x5   :  { %48 = sst [smem:[#allocation6 + $0x3]] %s4381_s10  ;;  %s4383_s14 = smov 2  }
   0x6   :  { %s3995_s11 = sshll.u32 %s30_s27, 26  ;;  %50 = sst [smem:[#allocation6 + $0x4]] %s4382_s12 }
   0x7   :  { %s3996_s13 = sadd.s32 134217728, %s3995_s11  ;;  %52 = sst [smem:[#allocation6 + $0x5]] %s4383_s14 }
   0x8   :  { %s4384_s15 = smov 256   ;;  %56 = sst [smem:[#allocation6 + $0x7]] %s4381_s10 }
   0x9   :  { %54 = sst [smem:[#allocation6 + $0x6]] %s4384_s15  ;;  %s4385_s16 = smov [#allocation4]  }
   0xa   :  { %58 = sst [smem:[#allocation6 + $0x8]] %s4380_s9  ;;  %s4386_s17 = smov [#allocation5]  }
   0xb   :  { %60 = dma.general %s6947_s6, 32768, %s39_s29, %s4385_s16, %s4386_s17, [#allocation6], %s3996_s13, 0  }
   0xc   :  { %77 = sst [smem:[#allocation8]] %s4384_s15  ;;  %s4387_s20 = smov [#allocation3]  }
   0xd   :  { %79 = sst [smem:[#allocation8 + $0x1]] %s4384_s15  ;;  %s73_s21 = sshll.u32 %s4387_s20, 4  ;;  %s74_s21 = int_to_ptr.vmem [resolvable:$true] %s73_s21 }
   0xe   :  { %81 = sst [smem:[#allocation8 + $0x2]] %s4383_s14  ;;  %s4388_s22 = smov [#allocation4 + $0x1]  }
   0xf   :  { %83 = sst [smem:[#allocation8 + $0x3]] %s4381_s10  ;;  %s4389_s23 = smov [#allocation7]  }
  0x10   :  { %85 = sst [smem:[#allocation8 + $0x4]] %s4382_s12 }
  0x11   :  { %87 = sst [smem:[#allocation8 + $0x5]] %s4383_s14 }
  0x12   :  { %89 = sst [smem:[#allocation8 + $0x6]] %s4382_s12 }
  0x13   :  { %91 = sst [smem:[#allocation8 + $0x7]] %s4381_s10 }
  0x14   :  { %93 = sst [smem:[#allocation8 + $0x8]] %s4380_s9 }
  0x15   :  { %95 = dma.general %s6948_s7, 8192, %s74_s21, %s4388_s22, %s4389_s23, [#allocation8], %s3996_s13, 0  }
  0x16   :  { %v4309_v0 = vld [vmem:[%s6943_s2] sm:$0xff]   ;;  %v97_v2 = vld [vmem:[%s6941_s0 + $0x8] sm:$0xff]  ;;  %v98_v3 = vld [vmem:[%s6941_s0 + $0x10] sm:$0xff] }
  0x17   :  { %v96_v1 = vld [vmem:[%s6941_s0] sm:$0xff]  ;;  %4193 = vmatprep.subr.bf16.mxu0 %v4309_v0  ;;  %v99_v5 = vld [vmem:[%s6941_s0 + $0x18] sm:$0xff]  ;;  %v101_v7 = vld [vmem:[%s6941_s0 + $0x28] sm:$0xff] }
  0x18   :  { %v106_v4 = vpack.c.bf16 %v97_v2, %v96_v1  ;;  %v100_v6 = vld [vmem:[%s6941_s0 + $0x20] sm:$0xff]  ;;  %4194 = vmatpush3.bf16.msra.mxu0 %v4309_v0  ;;  %v107_v8 = vpack.c.bf16 %v99_v5, %v98_v3  ;;  %v102_v10 = vld [vmem:[%s6941_s0 + $0x30] sm:$0xff]  ;;  %v103_v11 = vld [vmem:[%s6941_s0 + $0x38] sm:$0xff] }
  0x19   :  { %v108_v9 = vpack.c.bf16 %v101_v7, %v100_v6  ;;  %v109_v12 = vpack.c.bf16 %v103_v11, %v102_v10  ;;  %v4310_v19 = vld [vmem:[%s6942_s1] sm:$0xff]   ;;  %v4311_v30 = vld [vmem:[%s6942_s1 + $0x8] sm:$0xff]   ;;  %v4312_v31 = vld [vmem:[%s6942_s1 + $0x10] sm:$0xff]  }
  0x1a   :  { %4195 = vmatprep.mubr.msk.bf16.mxu0 %vm116_vm0, %v106_v4  ;;  %v4313_v32 = vld [vmem:[%s6942_s1 + $0x18] sm:$0xff]   ;;  %v4314_v33 = vld [vmem:[%s6942_s1 + $0x20] sm:$0xff]   ;;  %v4315_v34 = vld [vmem:[%s6942_s1 + $0x28] sm:$0xff]  }
  0x1b   :  { %4196 = vmatmul.mubr.msk.bf16.vlgmr.msra.gmra.mrb[0].mxu0 %vm116_vm0, %v107_v8  ;;  %v4316_v35 = vld [vmem:[%s6942_s1 + $0x30] sm:$0xff]   ;;  %v4317_v36 = vld [vmem:[%s6942_s1 + $0x38] sm:$0xff]   ;;  %v4318_v37 = vld [vmem:[%s6942_s1 + $0x40] sm:$0xff]  }
  0x1c   :  { %4199 = vmatprep.mubr.msk.bf16.mxu0 %vm116_vm0, %v108_v9  ;;  %v4319_v38 = vld [vmem:[%s6942_s1 + $0x48] sm:$0xff]   ;;  %v4320_v39 = vld [vmem:[%s6942_s1 + $0x50] sm:$0xff]   ;;  %v4321_v40 = vld [vmem:[%s6942_s1 + $0x58] sm:$0xff]  }
  0x1d   :  { %v4322_v41 = vld [vmem:[%s6943_s2 + $0x8] sm:$0xff]   ;;  %v4323_v42 = vld [vmem:[%s6943_s2 + $0x10] sm:$0xff]   ;;  %v4324_v43 = vld [vmem:[%s6943_s2 + $0x18] sm:$0xff]  }
  0x1e   :  { %v4325_v44 = vld [vmem:[%s6943_s2 + $0x20] sm:$0xff]  }
  0x23   :  { %4200 = vmatmul.mubr.msk.bf16.gmra.mrb[4].mxu0 %vm116_vm0, %v109_v12 }
  0x24   :  { %4211 = vmatprep.mubr.msk.bf16.mxu0 %vm298_vm1, %v4310_v19 }
  0xee   :  { %v4478_v13 = vpop.f32.mrb[0].mxu0 }
  0xef   :  { %v4480_v14 = vpop.f32.mrb[1].mxu0 }
  0xf0   :  { %v4482_v15 = vpop.f32.mrb[2].mxu0 }
  0xf1   :  { %v4484_v16 = vpop.f32.mrb[3].mxu0  ;;  %v219_v17 = vpack.c.bf16 %v4482_v15, %v4478_v13 }
  0xf2   :  { %v218_v18 = vpack.c.bf16 %v4484_v16, %v4480_v14 }
  0xf4   :  { %286 = vrot.lane.b32.xlu0 %v218_v18, %s4381_s10 }
  0xf6   :  { %v4494_v20 = vpop.f32.mrb[4].mxu0 }
  0xf7   :  { %v4497_v21 = vpop.f32.mrb[5].mxu0 }
  0xf8   :  { %288 = vrot.lane.b32.xlu0 %v219_v17, %s4381_s10  ;;  %v4500_v22 = vpop.f32.mrb[6].mxu0 }
  0xf9   :  { %v4502_v23 = vpop.f32.mrb[7].mxu0  ;;  %v221_v24 = vpack.c.bf16 %v4500_v22, %v4494_v20 }
  0xfa   :  { %v220_v25 = vpack.c.bf16 %v4502_v23, %v4497_v21 }
  0xfc   :  { %290 = vrot.lane.b32.xlu1 %v220_v25, %s4381_s10 }
 0x100   :  { %292 = vrot.lane.b32.xlu1 %v221_v24, %s4381_s10 }
 0x166   :  { %v287_v26 = vpop.permute.xlu0 %286 }
 0x167   :  { %4203 = vmatprep.subr.bf16.mxu0 %v287_v26 }
 0x168   :  { %4204 = vmatpush3.bf16.msra.mxu0 %v287_v26 }
 0x16a   :  { %v289_v27 = vpop.permute.xlu0 %288 }
 0x16b   :  { %4205 = vmatprep.subr.bf16.mxu0 %v289_v27 }
 0x16c   :  { %4206 = vmatpush3.bf16.msra.mxu0 %v289_v27 }
 0x16e   :  { %v291_v28 = vpop.permute.xlu1 %290 }
 0x16f   :  { %4207 = vmatprep.subr.bf16.mxu0 %v291_v28 }
 0x170   :  { %4208 = vmatpush3.bf16.msra.mxu0 %v291_v28 }
 0x172   :  { %v293_v29 = vpop.permute.xlu1 %292 }
 0x173   :  { %4209 = vmatprep.subr.bf16.mxu0 %v293_v29 }
 0x174   :  { %4210 = vmatpush3.bf16.msra.mxu0 %v293_v29 }
 0x175   :  { %4235 = vmatprep.subr.bf16.mxu0 %v4322_v41 }
 0x177   :  { %4212 = vmatmul.mubr.msk.bf16.vlgmr.msra.gmra.mrb[8].mxu0 %vm298_vm1, %v4311_v30 }
 0x178   :  { %4215 = vmatprep.mubr.msk.bf16.mxu0 %vm298_vm1, %v4312_v31  ;;  %4236 = vmatpush3.bf16.msra.mxu0 %v4322_v41 }
 0x179   :  { %4237 = vmatprep.subr.bf16.mxu0 %v4323_v42 }
 0x17c   :  { %4238 = vmatpush3.bf16.msra.mxu0 %v4323_v42 }
 0x17d   :  { %4239 = vmatprep.subr.bf16.mxu0 %v4324_v43 }
 0x17f   :  { %4216 = vmatmul.mubr.msk.bf16.gmra.mrb[12].mxu0 %vm298_vm1, %v4313_v32 }
 0x180   :  { %4219 = vmatprep.mubr.msk.bf16.mxu0 %vm298_vm1, %v4314_v33  ;;  %4240 = vmatpush3.bf16.msra.mxu0 %v4324_v43 }
 0x181   :  { %4241 = vmatprep.subr.bf16.mxu0 %v4325_v44 }
 0x184   :  { %4242 = vmatpush3.bf16.msra.mxu0 %v4325_v44 }
 0x187   :  { %4220 = vmatmul.mubr.msk.bf16.gmra.mrb[16].mxu0 %vm298_vm1, %v4315_v34 }
 0x188   :  { %4223 = vmatprep.mubr.msk.bf16.mxu0 %vm298_vm1, %v4316_v35 }
 0x18f   :  { %4224 = vmatmul.mubr.msk.bf16.gmra.mrb[20].mxu0 %vm298_vm1, %v4317_v36 }
 0x190   :  { %4227 = vmatprep.mubr.msk.bf16.mxu0 %vm298_vm1, %v4318_v37 }
 0x197   :  { %4228 = vmatmul.mubr.msk.bf16.gmra.mrb[24].mxu0 %vm298_vm1, %v4319_v38 }
 0x198   :  { %4231 = vmatprep.mubr.msk.bf16.mxu0 %vm298_vm1, %v4320_v39 }
 0x19f   :  { %4232 = vmatmul.mubr.msk.bf16.gmra.mrb[28].mxu0 %vm298_vm1, %v4321_v40 }
 0x24a   :  { %v4213_v45 = vpop.f32.mrb[8].mxu0 }
 0x24b   :  { %v4567_v46 = vadd.f32 %v4213_v45, %v4478_v13  ;;  %v369_v47 = vpop.f32.mrb[9].mxu0 }
 0x24c   :  { %v4570_v48 = vadd.f32 %v369_v47, %v4480_v14  ;;  %v4214_v49 = vpop.f32.mrb[10].mxu0 }
 0x24d   :  { %v4573_v50 = vadd.f32 %v4214_v49, %v4482_v15  ;;  %v372_v51 = vpop.f32.mrb[11].mxu0  ;;  %v547_v54 = vmul.f32 %v4567_v46, %v4567_v46  ;;  %v493_v60 = vsel %vm298_vm1, %v4567_v46, 0.0 }
 0x24e   :  { %v545_v52 = vmul.f32 %v4570_v48, %v4570_v48  ;;  %v4578_v53 = vadd.f32 %v372_v51, %v4484_v16  ;;  %v490_v55 = vsel %vm298_vm1, %v4570_v48, 0.0 }
 0x24f   :  { %v548_v58 = vmul.f32 %v4573_v50, %v4573_v50  ;;  %v572_v4 = vsel %vm298_vm1, %v547_v54, 0.0  ;;  %v495_v5 = vsel %vm298_vm1, %v4573_v50, 0.0 }
 0x250   :  { %v491_v56 = vsel %vm298_vm1, %v4578_v53, 0.0  ;;  %v546_v57 = vmul.f32 %v4578_v53, %v4578_v53  ;;  %v569_v61 = vsel %vm298_vm1, %v545_v52, 0.0 }
 0x251   :  { %v492_v59 = vadd.f32 %v491_v56, %v490_v55  ;;  %v574_v8 = vsel %vm298_vm1, %v548_v58, 0.0 }
 0x252   :  { %v570_v62 = vsel %vm298_vm1, %v546_v57, 0.0  ;;  %v4217_v63 = vpop.f32.mrb[12].mxu0 }
 0x253   :  { %v494_v0 = vadd.f32 %v493_v60, %v492_v59  ;;  %v571_v1 = vadd.f32 %v570_v62, %v569_v61  ;;  %v4595_v2 = vadd.f32 %v4217_v63, %v4494_v20  ;;  %v385_v3 = vpop.f32.mrb[13].mxu0 }
 0x254   :  { %v4601_v6 = vadd.f32 %v385_v3, %v4497_v21  ;;  %v4218_v7 = vpop.f32.mrb[14].mxu0 }
 0x255   :  { %v573_v9 = vadd.f32 %v572_v4, %v571_v1  ;;  %v496_v10 = vadd.f32 %v495_v5, %v494_v0  ;;  %v388_v11 = vpop.f32.mrb[15].mxu0  ;;  %v4609_v18 = vadd.f32 %v4218_v7, %v4500_v22  ;;  %v551_v28 = vmul.f32 %v4595_v2, %v4595_v2 }
 0x256   :  { %v497_v12 = vsel %vm298_vm1, %v4601_v6, 0.0  ;;  %v549_v17 = vmul.f32 %v4601_v6, %v4601_v6  ;;  %v4612_v19 = vadd.f32 %v388_v11, %v4502_v23  ;;  %v501_v32 = vsel %vm298_vm1, %v4595_v2, 0.0 }
 0x257   :  { %v498_v24 = vadd.f32 %v497_v12, %v496_v10  ;;  %v575_v25 = vadd.f32 %v574_v8, %v573_v9  ;;  %v552_v34 = vmul.f32 %v4609_v18, %v4609_v18  ;;  %v503_v39 = vsel %vm298_vm1, %v4609_v18, 0.0 }
 0x258   :  { %v576_v26 = vsel %vm298_vm1, %v549_v17, 0.0  ;;  %v499_v27 = vsel %vm298_vm1, %v4612_v19, 0.0  ;;  %v550_v31 = vmul.f32 %v4612_v19, %v4612_v19  ;;  %v580_v43 = vsel %vm298_vm1, %v551_v28, 0.0 }
 0x259   :  { %v577_v29 = vadd.f32 %v576_v26, %v575_v25  ;;  %v500_v30 = vadd.f32 %v499_v27, %v498_v24  ;;  %v582_v55 = vsel %vm298_vm1, %v552_v34, 0.0 }
 0x25a   :  { %v4221_v33 = vpop.f32.mrb[16].mxu0  ;;  %v578_v36 = vsel %vm298_vm1, %v550_v31, 0.0 }
 0x25b   :  { %v502_v35 = vadd.f32 %v501_v32, %v500_v30  ;;  %v4627_v37 = vadd.f32 %v4221_v33, %v4478_v13  ;;  %v401_v38 = vpop.f32.mrb[17].mxu0  ;;  %v579_v40 = vadd.f32 %v578_v36, %v577_v29 }
 0x25c   :  { %v4632_v41 = vadd.f32 %v401_v38, %v4480_v14  ;;  %v4222_v42 = vpop.f32.mrb[18].mxu0 }
 0x25d   :  { %v504_v44 = vadd.f32 %v503_v39, %v502_v35  ;;  %v4636_v45 = vadd.f32 %v4222_v42, %v4482_v15  ;;  %v404_v47 = vpop.f32.mrb[19].mxu0  ;;  %v581_v49 = vadd.f32 %v580_v43, %v579_v40  ;;  %v555_v61 = vmul.f32 %v4627_v37, %v4627_v37 }
 0x25e   :  { %v505_v51 = vsel %vm298_vm1, %v4632_v41, 0.0  ;;  %v553_v52 = vmul.f32 %v4632_v41, %v4632_v41  ;;  %v4643_v54 = vadd.f32 %v404_v47, %v4484_v16  ;;  %v509_v63 = vsel %vm298_vm1, %v4627_v37, 0.0 }
 0x25f   :  { %v506_v56 = vadd.f32 %v505_v51, %v504_v44  ;;  %v583_v57 = vadd.f32 %v582_v55, %v581_v49  ;;  %v556_v4 = vmul.f32 %v4636_v45, %v4636_v45  ;;  %v511_v9 = vsel %vm298_vm1, %v4636_v45, 0.0 }
 0x260   :  { %v584_v58 = vsel %vm298_vm1, %v553_v52, 0.0  ;;  %v507_v59 = vsel %vm298_vm1, %v4643_v54, 0.0  ;;  %v554_v60 = vmul.f32 %v4643_v54, %v4643_v54  ;;  %v588_v17 = vsel %vm298_vm1, %v555_v61, 0.0 }
 0x261   :  { %v508_v62 = vadd.f32 %v507_v59, %v506_v56  ;;  %v585_v0 = vadd.f32 %v584_v58, %v583_v57  ;;  %v590_v31 = vsel %vm298_vm1, %v556_v4, 0.0 }
 0x262   :  { %v586_v1 = vsel %vm298_vm1, %v554_v60, 0.0  ;;  %v4225_v3 = vpop.f32.mrb[20].mxu0 }
 0x263   :  { %v510_v5 = vadd.f32 %v509_v63, %v508_v62  ;;  %v4659_v7 = vadd.f32 %v4225_v3, %v4494_v20  ;;  %v417_v8 = vpop.f32.mrb[21].mxu0  ;;  %v587_v10 = vadd.f32 %v586_v1, %v585_v0 }
 0x264   :  { %v4664_v11 = vadd.f32 %v417_v8, %v4497_v21  ;;  %v4226_v12 = vpop.f32.mrb[22].mxu0 }
 0x265   :  { %v512_v24 = vadd.f32 %v511_v9, %v510_v5  ;;  %v4668_v25 = vadd.f32 %v4226_v12, %v4500_v22  ;;  %v420_v26 = vpop.f32.mrb[23].mxu0  ;;  %v589_v27 = vadd.f32 %v588_v17, %v587_v10  ;;  %v559_v38 = vmul.f32 %v4659_v7, %v4659_v7 }
 0x266   :  { %v513_v28 = vsel %vm298_vm1, %v4664_v11, 0.0  ;;  %v557_v29 = vmul.f32 %v4664_v11, %v4664_v11  ;;  %v4675_v30 = vadd.f32 %v420_v26, %v4502_v23  ;;  %v517_v40 = vsel %vm298_vm1, %v4659_v7, 0.0 }
 0x267   :  { %v514_v32 = vadd.f32 %v513_v28, %v512_v24  ;;  %v591_v33 = vadd.f32 %v590_v31, %v589_v27  ;;  %v560_v47 = vmul.f32 %v4668_v25, %v4668_v25  ;;  %v519_v55 = vsel %vm298_vm1, %v4668_v25, 0.0 }
 0x268   :  { %v592_v34 = vsel %vm298_vm1, %v557_v29, 0.0  ;;  %v515_v35 = vsel %vm298_vm1, %v4675_v30, 0.0  ;;  %v558_v36 = vmul.f32 %v4675_v30, %v4675_v30  ;;  %v596_v59 = vsel %vm298_vm1, %v559_v38, 0.0 }
 0x269   :  { %v516_v39 = vadd.f32 %v515_v35, %v514_v32  ;;  %v593_v42 = vadd.f32 %v592_v34, %v591_v33 }
 0x26a   :  { %v594_v43 = vsel %vm298_vm1, %v558_v36, 0.0  ;;  %v4229_v44 = vpop.f32.mrb[24].mxu0 }
 0x26b   :  { %v518_v49 = vadd.f32 %v517_v40, %v516_v39  ;;  %v4691_v51 = vadd.f32 %v4229_v44, %v4478_v13  ;;  %v433_v52 = vpop.f32.mrb[25].mxu0  ;;  %v595_v56 = vadd.f32 %v594_v43, %v593_v42 }
 0x26c   :  { %v4696_v57 = vadd.f32 %v433_v52, %v4480_v14  ;;  %v4230_v58 = vpop.f32.mrb[26].mxu0  ;;  %v598_v14 = vsel %vm298_vm1, %v560_v47, 0.0 }
 0x26d   :  { %v520_v60 = vadd.f32 %v519_v55, %v518_v49  ;;  %v4700_v61 = vadd.f32 %v4230_v58, %v4482_v15  ;;  %v436_v62 = vpop.f32.mrb[27].mxu0  ;;  %v597_v63 = vadd.f32 %v596_v59, %v595_v56  ;;  %v563_v9 = vmul.f32 %v4691_v51, %v4691_v51 }
 0x26e   :  { %v521_v13 = vsel %vm298_vm1, %v4696_v57, 0.0  ;;  %v561_v0 = vmul.f32 %v4696_v57, %v4696_v57  ;;  %v4707_v1 = vadd.f32 %v436_v62, %v4484_v16  ;;  %v525_v16 = vsel %vm298_vm1, %v4691_v51, 0.0 }
 0x26f   :  { %v522_v3 = vadd.f32 %v521_v13, %v520_v60  ;;  %v599_v4 = vadd.f32 %v598_v14, %v597_v63  ;;  %v564_v26 = vmul.f32 %v4700_v61, %v4700_v61  ;;  %v527_v31 = vsel %vm298_vm1, %v4700_v61, 0.0 }
 0x270   :  { %v600_v5 = vsel %vm298_vm1, %v561_v0, 0.0  ;;  %v523_v15 = vsel %vm298_vm1, %v4707_v1, 0.0  ;;  %v562_v8 = vmul.f32 %v4707_v1, %v4707_v1  ;;  %v604_v35 = vsel %vm298_vm1, %v563_v9, 0.0 }
 0x271   :  { %v524_v10 = vadd.f32 %v523_v15, %v522_v3  ;;  %v601_v12 = vadd.f32 %v600_v5, %v599_v4 }
 0x272   :  { %v602_v17 = vsel %vm298_vm1, %v562_v8, 0.0  ;;  %v4233_v24 = vpop.f32.mrb[28].mxu0 }
 0x273   :  { %v526_v27 = vadd.f32 %v525_v16, %v524_v10  ;;  %v4723_v28 = vadd.f32 %v4233_v24, %v4494_v20  ;;  %v449_v29 = vpop.f32.mrb[29].mxu0  ;;  %v603_v32 = vadd.f32 %v602_v17, %v601_v12 }
 0x274   :  { %v4728_v33 = vadd.f32 %v449_v29, %v4497_v21  ;;  %v4234_v34 = vpop.f32.mrb[30].mxu0  ;;  %v606_v21 = vsel %vm298_vm1, %v564_v26, 0.0 }
 0x275   :  { %v528_v36 = vadd.f32 %v527_v31, %v526_v27  ;;  %v4732_v38 = vadd.f32 %v4234_v34, %v4500_v22  ;;  %v452_v39 = vpop.f32.mrb[31].mxu0  ;;  %v605_v40 = vadd.f32 %v604_v35, %v603_v32  ;;  %v567_v55 = vmul.f32 %v4723_v28, %v4723_v28 }
 0x276   :  { %v529_v20 = vsel %vm298_vm1, %v4728_v33, 0.0  ;;  %v565_v42 = vmul.f32 %v4728_v33, %v4728_v33  ;;  %v485_v43 = vadd.f32 %v452_v39, %v4502_v23  ;;  %v533_v58 = vsel %vm298_vm1, %v4723_v28, 0.0 }
 0x277   :  { %v530_v44 = vadd.f32 %v529_v20, %v528_v36  ;;  %v607_v47 = vadd.f32 %v606_v21, %v605_v40  ;;  %v568_v23 = vmul.f32 %v4732_v38, %v4732_v38  ;;  %v535_v63 = vsel %vm298_vm1, %v4732_v38, 0.0  ;;  %v488_v40 = vld [vmem:[%s6945_s4] ss:$0 sm:$0xff]  ;;  %v489_v21 = vld [vmem:[%s6945_s4 + $0x1] ss:$0 sm:$0xff] }
 0x278   :  { %v608_v49 = vsel %vm298_vm1, %v565_v42, 0.0  ;;  %v531_v52 = vsel %vm298_vm1, %v485_v43, 0.0  ;;  %v566_v22 = vmul.f32 %v485_v43, %v485_v43  ;;  %v612_v0 = vsel %vm298_vm1, %v567_v55, 0.0 }
 0x279   :  { %v532_v56 = vadd.f32 %v531_v52, %v530_v44  ;;  %v609_v59 = vadd.f32 %v608_v49, %v607_v47  ;;  %v614_v4 = vsel %vm298_vm1, %v568_v23, 0.0 }
 0x27a   :  { %v610_v60 = vsel %vm298_vm1, %v566_v22, 0.0 }
 0x27b   :  { %v534_v62 = vadd.f32 %v533_v58, %v532_v56  ;;  %v611_v13 = vadd.f32 %v610_v60, %v609_v59 }
 0x27d   :  { %v536_v14 = vadd.f32 %v535_v63, %v534_v62  ;;  %v613_v3 = vadd.f32 %v612_v0, %v611_v13 }
 0x27f   :  { %v537_v5 = vrot.slane %v536_v14, 4  ;;  %v615_v15 = vadd.f32 %v614_v4, %v613_v3 }
 0x281   :  { %v538_v8 = vadd.f32 %v537_v5, %v536_v14  ;;  %v616_v9 = vrot.slane %v615_v15, 4 }
 0x283   :  { %v539_v10 = vrot.slane %v538_v8, 2  ;;  %v617_v16 = vadd.f32 %v616_v9, %v615_v15 }
 0x285   :  { %v540_v12 = vadd.f32 %v539_v10, %v538_v8  ;;  %v618_v17 = vrot.slane %v617_v16, 2 }
 0x287   :  { %v541_v24 = vrot.slane %v540_v12, 1  ;;  %v619_v26 = vadd.f32 %v618_v17, %v617_v16 }
 0x289   :  { %v542_v27 = vadd.f32 %v541_v24, %v540_v12  ;;  %v620_v29 = vrot.slane %v619_v26, 1 }
 0x28b   :  { %v544_v31 = vmul.f32 0.0052083335, %v542_v27  ;;  %v621_v32 = vadd.f32 %v620_v29, %v619_v26 }
 0x28d   :  { %v623_v34 = vmul.f32 %v544_v31, %v544_v31  ;;  %v622_v35 = vmul.f32 0.0052083335, %v621_v32 }
 0x28f   :  { %v624_v36 = vsub.f32 %v622_v35, %v623_v34 }
 0x291   :  { %v625_v39 = vadd.f32 1e-05, %v624_v36 }
 0x293   :  { %4326 = vrsqrt.f32 %v625_v39 }
 0x29d   :  { %v4327_v20 = vpop.eup %4326 }
 0x29e   :  { %v4756_v42 = vmul.f32 %v4327_v20, %v488_v40 }
 0x2a0   :  { %v628_v44 = vmul.f32 %v4756_v42, %v544_v31  ;;  %v651_v47 = vmul.f32 %v4756_v42, %v485_v43  ;;  %v630_v49 = vmul.f32 %v4756_v42, %v4570_v48  ;;  %v631_v52 = vmul.f32 %v4756_v42, %v4578_v53 }
 0x2a1   :  { %v632_v22 = vmul.f32 %v4756_v42, %v4567_v46  ;;  %v633_v55 = vmul.f32 %v4756_v42, %v4573_v50  ;;  %v634_v56 = vmul.f32 %v4756_v42, %v4601_v6  ;;  %v635_v43 = vmul.f32 %v4756_v42, %v4612_v19 }
 0x2a2   :  { %v4773_v58 = vsub.f32 %v489_v21, %v628_v44  ;;  %v636_v48 = vmul.f32 %v4756_v42, %v4595_v2  ;;  %v637_v53 = vmul.f32 %v4756_v42, %v4609_v18  ;;  %v638_v46 = vmul.f32 %v4756_v42, %v4632_v41 }
 0x2a3   :  { %v639_v50 = vmul.f32 %v4756_v42, %v4643_v54  ;;  %v640_v6 = vmul.f32 %v4756_v42, %v4627_v37  ;;  %v642_v59 = vmul.f32 %v4756_v42, %v4664_v11  ;;  %v641_v13 = vmul.f32 %v4756_v42, %v4636_v45 }
 0x2a4   :  { %v4790_v19 = vadd.f32 %v651_v47, %v4773_v58  ;;  %v654_v2 = vadd.f32 %v630_v49, %v4773_v58  ;;  %v655_v60 = vadd.f32 %v631_v52, %v4773_v58  ;;  %v656_v18 = vadd.f32 %v632_v22, %v4773_v58 }
 0x2a5   :  { %v657_v41 = vadd.f32 %v633_v55, %v4773_v58  ;;  %v658_v23 = vadd.f32 %v634_v56, %v4773_v58  ;;  %v659_v54 = vadd.f32 %v635_v43, %v4773_v58  ;;  %v660_v37 = vadd.f32 %v636_v48, %v4773_v58 }
 0x2a6   :  { %v678_v62 = vmul.f32 0.2, %v654_v2  ;;  %v679_v63 = vmul.f32 0.2, %v655_v60  ;;  %v661_v11 = vadd.f32 %v637_v53, %v4773_v58  ;;  %v680_v0 = vmul.f32 0.2, %v656_v18 }
 0x2a7   :  { %v681_v14 = vmul.f32 0.2, %v657_v41  ;;  %v682_v3 = vmul.f32 0.2, %v658_v23  ;;  %v662_v4 = vadd.f32 %v638_v46, %v4773_v58  ;;  %v4804_v5 = vmul.f32 0.2, %v4790_v19 }
 0x2a8   :  { %v702_v15 = vmax.f32 %v654_v2, %v678_v62  ;;  %v703_v8 = vmax.f32 %v655_v60, %v679_v63  ;;  %v683_v9 = vmul.f32 0.2, %v659_v54  ;;  %v704_v10 = vmax.f32 %v656_v18, %v680_v0 }
 0x2a9   :  { %v705_v16 = vmax.f32 %v657_v41, %v681_v14  ;;  %v706_v12 = vmax.f32 %v658_v23, %v682_v3  ;;  %v684_v17 = vmul.f32 0.2, %v660_v37  ;;  %v685_v27 = vmul.f32 0.2, %v661_v11 }
 0x2aa   :  { %v734_v24 = vpack.c.bf16 %v703_v8, %v702_v15  ;;  %v707_v26 = vmax.f32 %v659_v54, %v683_v9  ;;  %v663_v45 = vadd.f32 %v639_v50, %v4773_v58  ;;  %v686_v32 = vmul.f32 0.2, %v662_v4 }
 0x2ab   :  { %v735_v29 = vpack.c.bf16 %v705_v16, %v704_v10  ;;  %v708_v31 = vmax.f32 %v660_v37, %v684_v17  ;;  %v664_v34 = vadd.f32 %v640_v6, %v4773_v58  ;;  %v709_v36 = vmax.f32 %v661_v11, %v685_v27 }
 0x2ac   :  { %4243 = vmatprep.mubr.msk.bf16.mxu0 %vm298_vm1, %v734_v24  ;;  %v736_v35 = vpack.c.bf16 %v707_v26, %v706_v12  ;;  %v687_v39 = vmul.f32 0.2, %v663_v45  ;;  %v665_v40 = vadd.f32 %v641_v13, %v4773_v58  ;;  %v710_v20 = vmax.f32 %v662_v4, %v686_v32 }
 0x2ad   :  { %4244 = vmatmul.mubr.msk.bf16.vlgmr.msra.gmra.mrb[32].mxu0 %vm298_vm1, %v735_v29  ;;  %v688_v21 = vmul.f32 0.2, %v664_v34  ;;  %v643_v44 = vmul.f32 %v4756_v42, %v4675_v30  ;;  %v666_v47 = vadd.f32 %v642_v59, %v4773_v58  ;;  %v737_v49 = vpack.c.bf16 %v709_v36, %v708_v31 }
 0x2ae   :  { %4247 = vmatprep.mubr.msk.bf16.mxu0 %vm298_vm1, %v736_v35  ;;  %v711_v52 = vmax.f32 %v663_v45, %v687_v39  ;;  %v689_v22 = vmul.f32 0.2, %v665_v40  ;;  %v644_v55 = vmul.f32 %v4756_v42, %v4659_v7  ;;  %v645_v53 = vmul.f32 %v4756_v42, %v4668_v25 }
 0x2af   :  { %v712_v56 = vmax.f32 %v664_v34, %v688_v21  ;;  %v667_v43 = vadd.f32 %v643_v44, %v4773_v58  ;;  %v690_v48 = vmul.f32 0.2, %v666_v47  ;;  %v646_v6 = vmul.f32 %v4756_v42, %v4696_v57 }
 0x2b0   :  { %v738_v46 = vpack.c.bf16 %v711_v52, %v710_v20  ;;  %v713_v50 = vmax.f32 %v665_v40, %v689_v22  ;;  %v668_v30 = vadd.f32 %v644_v55, %v4773_v58  ;;  %v669_v60 = vadd.f32 %v645_v53, %v4773_v58  ;;  %v1144_v40 = vld [vmem:[%s6944_s3 + $0x20] sm:$0xff]  ;;  %v1157_v52 = vld [vmem:[%s6944_s3 + $0x88] sm:$0xff] }
 0x2b1   :  { %v691_v59 = vmul.f32 0.2, %v667_v43  ;;  %v714_v2 = vmax.f32 %v666_v47, %v690_v48  ;;  %v647_v7 = vmul.f32 %v4756_v42, %v4707_v1  ;;  %v670_v23 = vadd.f32 %v646_v6, %v4773_v58  ;;  %v1149_v47 = vld [vmem:[%s6944_s3 + $0x48] sm:$0xff]  ;;  %v1156_v6 = vld [vmem:[%s6944_s3 + $0x80] sm:$0xff] }
 0x2b2   :  { %v739_v18 = vpack.c.bf16 %v713_v50, %v712_v56  ;;  %v692_v41 = vmul.f32 0.2, %v668_v30  ;;  %v648_v25 = vmul.f32 %v4756_v42, %v4691_v51  ;;  %v693_v37 = vmul.f32 0.2, %v669_v60  ;;  %v1161_v56 = vld [vmem:[%s6944_s3 + $0xa8] sm:$0xff]  ;;  %v1148_v50 = vld [vmem:[%s6944_s3 + $0x40] sm:$0xff] }
 0x2b3   :  { %v715_v54 = vmax.f32 %v667_v43, %v691_v59  ;;  %v671_v62 = vadd.f32 %v647_v7, %v4773_v58  ;;  %v649_v57 = vmul.f32 %v4756_v42, %v4700_v61  ;;  %v694_v11 = vmul.f32 0.2, %v670_v23  ;;  %v1165_v43 = vld [vmem:[%s6944_s3 + $0xc8] sm:$0xff] }
 0x2b4   :  { %v716_v63 = vmax.f32 %v668_v30, %v692_v41  ;;  %v672_v13 = vadd.f32 %v648_v25, %v4773_v58  ;;  %v650_v1 = vmul.f32 %v4756_v42, %v4728_v33  ;;  %v717_v14 = vmax.f32 %v669_v60, %v693_v37  ;;  %v1169_v48 = vld [vmem:[%s6944_s3 + $0xe8] sm:$0xff]  ;;  %v1152_v30 = vld [vmem:[%s6944_s3 + $0x60] sm:$0xff] }
 0x2b5   :  { %4248 = vmatmul.mubr.msk.bf16.gmra.mrb[36].mxu0 %vm298_vm1, %v737_v49  ;;  %v740_v0 = vpack.c.bf16 %v715_v54, %v714_v2  ;;  %v695_v3 = vmul.f32 0.2, %v671_v62  ;;  %v673_v51 = vadd.f32 %v649_v57, %v4773_v58  ;;  %v718_v4 = vmax.f32 %v670_v23, %v694_v11  ;;  %v1153_v49 = vld [vmem:[%s6944_s3 + $0x68] sm:$0xff]  ;;  %v1160_v60 = vld [vmem:[%s6944_s3 + $0xa0] sm:$0xff] }
 0x2b6   :  { %4251 = vmatprep.mubr.msk.bf16.mxu0 %vm298_vm1, %v738_v46  ;;  %v696_v15 = vmul.f32 0.2, %v672_v13  ;;  %v674_v61 = vadd.f32 %v650_v1, %v4773_v58  ;;  %v652_v8 = vmul.f32 %v4756_v42, %v4723_v28  ;;  %v741_v9 = vpack.c.bf16 %v717_v14, %v716_v63  ;;  %v1164_v41 = vld [vmem:[%s6944_s3 + $0xc0] sm:$0xff]  ;;  %v1173_v54 = vld [vmem:[%s6944_s3 + $0x108] sm:$0xff]  ;;  %v4922_v14 = vld [vmem:[%s6944_s3 + $0x10] sm:$0xff] }
 0x2b7   :  { %v719_v10 = vmax.f32 %v671_v62, %v695_v3  ;;  %v697_v16 = vmul.f32 0.2, %v673_v51  ;;  %v653_v33 = vmul.f32 %v4756_v42, %v4732_v38  ;;  %v723_v12 = vmax.f32 %v4790_v19, %v4804_v5  ;;  %v1145_v19 = vld [vmem:[%s6944_s3 + $0x28] sm:$0xff]  ;;  %v1140_v5 = vld [vmem:[%s6944_s3] sm:$0xff]  ;;  %v4927_v3 = vld [vmem:[%s6944_s3 + $0x30] sm:$0xff] }
 0x2b8   :  { %v720_v17 = vmax.f32 %v672_v13, %v696_v15  ;;  %v698_v24 = vmul.f32 0.2, %v674_v61  ;;  %v676_v26 = vadd.f32 %v652_v8, %v4773_v58  ;;  %v4045_v21 = vcombine.high %v1140_v5, %v1144_v40  ;;  %v1168_v23 = vld [vmem:[%s6944_s3 + $0xe0] sm:$0xff]  ;;  %v1177_v37 = vld [vmem:[%s6944_s3 + $0x128] sm:$0xff]  ;;  %v4942_v8 = vld [vmem:[%s6944_s3 + $0x38] sm:$0xff] }
 0x2b9   :  { %v742_v27 = vpack.c.bf16 %v719_v10, %v718_v4  ;;  %v721_v45 = vmax.f32 %v673_v51, %v697_v16  ;;  %v677_v29 = vadd.f32 %v653_v33, %v4773_v58  ;;  %v1141_v58 = vld [vmem:[%s6944_s3 + $0x8] sm:$0xff]  ;;  %v4044_v44 = vcombine.low %v1140_v5, %v1144_v40  ;;  %v1172_v11 = vld [vmem:[%s6944_s3 + $0x100] sm:$0xff] }
 0x2ba   :  { %v722_v31 = vmax.f32 %v674_v61, %v698_v24  ;;  %v700_v32 = vmul.f32 0.2, %v676_v26  ;;  %v4047_v39 = vcombine.high %v1141_v58, %v1145_v19  ;;  %v4046_v20 = vcombine.low %v1141_v58, %v1145_v19  ;;  %1528 = vmatprep.subr.bf16.mxu1 %v4045_v21  ;;  %v1176_v13 = vld [vmem:[%s6944_s3 + $0x120] sm:$0xff]  ;;  %v1185_v4 = vld [vmem:[%s6944_s3 + $0x168] sm:$0xff]  ;;  %v4937_v61 = vld [vmem:[%s6944_s3 + $0x18] sm:$0xff] }
 0x2bb   :  { %v743_v28 = vpack.c.bf16 %v721_v45, %v720_v17  ;;  %v701_v34 = vmul.f32 0.2, %v677_v29  ;;  %v4054_v22 = vcombine.low %v1149_v47, %v1153_v49  ;;  %v4055_v55 = vcombine.high %v1149_v47, %v1153_v49  ;;  %1529 = vmatpush1.bf16.msra.mxu1 %v4044_v44  ;;  %v1180_v33 = vld [vmem:[%s6944_s3 + $0x140] sm:$0xff] }
 0x2bc   :  { %v744_v35 = vpack.c.bf16 %v723_v12, %v722_v31  ;;  %v724_v36 = vmax.f32 %v676_v26, %v700_v32  ;;  %1601 = vmatprep.subr.bf16.mxu0 %v4047_v39  ;;  %v6950_v53 = vmov 0   ;;  %v4063_v46 = vcombine.high %v1157_v52, %v1161_v56  ;;  %v1184_v12 = vld [vmem:[%s6944_s3 + $0x160] sm:$0xff]  ;;  %v1189_v26 = vld [vmem:[%s6944_s3 + $0x188] sm:$0xff] }
 0x2bd   :  { %4252 = vmatmul.mubr.msk.bf16.gmra.mrb[40].mxu0 %vm298_vm1, %v739_v18  ;;  %v725_v38 = vmax.f32 %v677_v29, %v701_v34  ;;  %1560 = vmatprep.mubr.bf16.mxu1 %v6950_v53  ;;  %v4053_v59 = vcombine.high %v1148_v50, %v1152_v30  ;;  %v4052_v2 = vcombine.low %v1148_v50, %v1152_v30  ;;  %v1188_v31 = vld [vmem:[%s6944_s3 + $0x180] sm:$0xff] }
 0x2be   :  { %4255 = vmatprep.mubr.msk.bf16.mxu0 %vm298_vm1, %v740_v0  ;;  %1602 = vmatpush1.bf16.msra.mxu0 %v4046_v20  ;;  %v4062_v7 = vcombine.low %v1157_v52, %v1161_v56  ;;  %v4061_v18 = vcombine.high %v1156_v6, %v1160_v60  ;;  %v4071_v25 = vcombine.high %v1165_v43, %v1169_v48  ;;  %v1181_v0 = vld [vmem:[%s6944_s3 + $0x148] sm:$0xff]  ;;  %v1192_v32 = vld [vmem:[%s6944_s3 + $0x1a0] sm:$0xff] }
 0x2bf   :  { %v745_v42 = vpack.c.bf16 %v725_v38, %v724_v36  ;;  %1603 = vmatprep.subr.bf16.mxu0 %v4055_v55  ;;  %1530 = vmatprep.subr.bf16.mxu1 %v4053_v59  ;;  %v4060_v62 = vcombine.low %v1156_v6, %v1160_v60  ;;  %v4069_v57 = vcombine.high %v1164_v41, %v1168_v23  ;;  %v1201_v36 = vld [vmem:[%s6944_s3 + $0x1e8] sm:$0xff]  ;;  %v1196_v58 = vld [vmem:[%s6944_s3 + $0x1c0] sm:$0xff] }
 0x2c0   :  { %1531 = vmatpush1.bf16.msra.mxu1 %v4052_v2  ;;  %v4070_v63 = vcombine.low %v1165_v43, %v1169_v48  ;;  %v4079_v1 = vcombine.high %v1173_v54, %v1177_v37  ;;  %v4068_v51 = vcombine.low %v1164_v41, %v1168_v23  ;;  %v4078_v16 = vcombine.low %v1173_v54, %v1177_v37  ;;  %v1200_v19 = vld [vmem:[%s6944_s3 + $0x1e0] sm:$0xff] }
 0x2c1   :  { %1532 = vmatprep.subr.bf16.mxu1 %v4061_v18  ;;  %v4087_v17 = vcombine.high %v1181_v0, %v1185_v4  ;;  %v4076_v24 = vcombine.low %v1172_v11, %v1176_v13  ;;  %v4085_v45 = vcombine.high %v1180_v33, %v1184_v12  ;;  %v4086_v29 = vcombine.low %v1181_v0, %v1185_v4 }
 0x2c2   :  { %1604 = vmatpush1.bf16.msra.mxu0 %v4054_v22  ;;  %v4084_v34 = vcombine.low %v1180_v33, %v1184_v12  ;;  %v4093_v38 = vcombine.high %v1188_v31, %v1192_v32  ;;  %v4092_v39 = vcombine.low %v1188_v31, %v1192_v32  ;;  %v4101_v40 = vcombine.high %v1196_v58, %v1200_v19 }
 0x2c3   :  { %1605 = vmatprep.subr.bf16.mxu0 %v4063_v46  ;;  %v4051_v21 = vcombine.high %v4937_v61, %v4942_v8  ;;  %v4100_v44 = vcombine.low %v1196_v58, %v1200_v19  ;;  %v4049_v47 = vcombine.high %v4922_v14, %v4927_v3 }
 0x2c4   :  { %1533 = vmatpush1.bf16.msra.mxu1 %v4060_v62 }
 0x2c5   :  { %4256 = vmatmul.mubr.msk.bf16.gmra.mrb[44].mxu0 %vm298_vm1, %v741_v9  ;;  %1534 = vmatprep.subr.bf16.mxu1 %v4069_v57  ;;  %v4077_v9 = vcombine.high %v1172_v11, %v1176_v13 }
 0x2c6   :  { %4259 = vmatprep.mubr.msk.bf16.mxu0 %vm298_vm1, %v742_v27  ;;  %1606 = vmatpush1.bf16.msra.mxu0 %v4062_v7  ;;  %v1193_v27 = vld [vmem:[%s6944_s3 + $0x1a8] sm:$0xff] }
 0x2c7   :  { %1607 = vmatprep.subr.bf16.mxu0 %v4071_v25 }
 0x2c8   :  { %1535 = vmatpush1.bf16.msra.mxu1 %v4068_v51 }
 0x2c9   :  { %1536 = vmatprep.subr.bf16.mxu1 %v4077_v9 }
 0x2ca   :  { %1608 = vmatpush1.bf16.msra.mxu0 %v4070_v63 }
 0x2cb   :  { %1609 = vmatprep.subr.bf16.mxu0 %v4079_v1 }
 0x2cc   :  { %1537 = vmatpush1.bf16.msra.mxu1 %v4076_v24 }
 0x2cd   :  { %4260 = vmatmul.mubr.msk.bf16.gmra.mrb[48].mxu0 %vm298_vm1, %v743_v28  ;;  %v4095_v28 = vcombine.high %v1189_v26, %v1193_v27  ;;  %1538 = vmatprep.subr.bf16.mxu1 %v4085_v45 }
 0x2ce   :  { %4263 = vmatprep.mubr.msk.bf16.mxu0 %vm298_vm1, %v744_v35  ;;  %1610 = vmatpush1.bf16.msra.mxu0 %v4078_v16  ;;  %v1197_v35 = vld [vmem:[%s6944_s3 + $0x1c8] sm:$0xff] }
 0x2cf   :  { %1611 = vmatprep.subr.bf16.mxu0 %v4087_v17  ;;  %v4103_v5 = vcombine.high %v1197_v35, %v1201_v36  ;;  %v4102_v20 = vcombine.low %v1197_v35, %v1201_v36 }
 0x2d0   :  { %1539 = vmatpush1.bf16.msra.mxu1 %v4084_v34 }
 0x2d1   :  { %1540 = vmatprep.subr.bf16.mxu1 %v4093_v38 }
 0x2d2   :  { %1612 = vmatpush1.bf16.msra.mxu0 %v4086_v29 }
 0x2d3   :  { %1613 = vmatprep.subr.bf16.mxu0 %v4095_v28 }
 0x2d4   :  { %1541 = vmatpush1.bf16.msra.mxu1 %v4092_v39 }
 0x2d5   :  { %4264 = vmatmul.mubr.msk.bf16.gmra.mrb[52].mxu0 %vm298_vm1, %v745_v42  ;;  %v4094_v42 = vcombine.low %v1189_v26, %v1193_v27  ;;  %1542 = vmatprep.subr.bf16.mxu1 %v4101_v40 }
 0x2d6   :  { %1633 = vmatprep.mubr.bf16.mxu0 %v6950_v53 }
 0x2d7   :  { %1614 = vmatpush1.bf16.msra.mxu0 %v4094_v42 }
 0x2d8   :  { %1615 = vmatprep.subr.bf16.mxu0 %v4103_v5  ;;  %1543 = vmatpush1.bf16.msra.mxu1 %v4100_v44 }
 0x2d9   :  { %1674 = vmatprep.subr.bf16.mxu1 %v4049_v47 }
 0x2db   :  { %1616 = vmatpush1.bf16.msra.mxu0 %v4102_v20 }
 0x2dc   :  { %1747 = vmatprep.subr.bf16.mxu0 %v4051_v21 }
 0x380   :  { %v4980_v49 = vpop.f32.mrb[32].mxu0 }
 0x381   :  { %v4982_v52 = vpop.f32.mrb[33].mxu0  ;;  %v969_v46 = vmul.f32 %v4980_v49, %v4980_v49 }
 0x382   :  { %v4984_v22 = vpop.f32.mrb[34].mxu0  ;;  %v967_v56 = vmul.f32 %v4982_v52, %v4982_v52 }
 0x383   :  { %v4986_v55 = vpop.f32.mrb[35].mxu0  ;;  %v970_v6 = vmul.f32 %v4984_v22, %v4984_v22 }
 0x384   :  { %v937_v43 = vadd.f32 %v4986_v55, %v4982_v52  ;;  %v968_v48 = vmul.f32 %v4986_v55, %v4986_v55 }
 0x386   :  { %v938_v50 = vadd.f32 %v4980_v49, %v937_v43  ;;  %v991_v30 = vadd.f32 %v968_v48, %v967_v56 }
 0x388   :  { %v992_v59 = vadd.f32 %v991_v30, %v969_v46  ;;  %v4999_v2 = vpop.f32.mrb[36].mxu0  ;;  %v939_v60 = vadd.f32 %v4984_v22, %v938_v50 }
 0x389   :  { %v5002_v7 = vpop.f32.mrb[37].mxu0  ;;  %v973_v63 = vmul.f32 %v4999_v2, %v4999_v2 }
 0x38a   :  { %v940_v18 = vadd.f32 %v939_v60, %v5002_v7  ;;  %v971_v41 = vmul.f32 %v5002_v7, %v5002_v7  ;;  %v993_v23 = vadd.f32 %v992_v59, %v970_v6  ;;  %v5007_v25 = vpop.f32.mrb[38].mxu0 }
 0x38b   :  { %v5009_v54 = vpop.f32.mrb[39].mxu0  ;;  %v974_v1 = vmul.f32 %v5007_v25, %v5007_v25 }
 0x38c   :  { %v994_v37 = vadd.f32 %v993_v23, %v971_v41  ;;  %v941_v62 = vadd.f32 %v940_v18, %v5009_v54  ;;  %v972_v57 = vmul.f32 %v5009_v54, %v5009_v54 }
 0x38e   :  { %v942_v11 = vadd.f32 %v4999_v2, %v941_v62  ;;  %v995_v13 = vadd.f32 %v994_v37, %v972_v57 }
 0x390   :  { %v996_v0 = vadd.f32 %v995_v13, %v973_v63  ;;  %v5019_v51 = vpop.f32.mrb[40].mxu0  ;;  %v943_v4 = vadd.f32 %v5007_v25, %v942_v11 }
 0x391   :  { %v5022_v9 = vpop.f32.mrb[41].mxu0  ;;  %v977_v29 = vmul.f32 %v5019_v51, %v5019_v51 }
 0x392   :  { %v944_v16 = vadd.f32 %v943_v4, %v5022_v9  ;;  %v975_v33 = vmul.f32 %v5022_v9, %v5022_v9  ;;  %v997_v12 = vadd.f32 %v996_v0, %v974_v1  ;;  %v5027_v17 = vpop.f32.mrb[42].mxu0 }
 0x393   :  { %v5029_v24 = vpop.f32.mrb[43].mxu0  ;;  %v978_v28 = vmul.f32 %v5027_v17, %v5027_v17 }
 0x394   :  { %v998_v26 = vadd.f32 %v997_v12, %v975_v33  ;;  %v945_v27 = vadd.f32 %v944_v16, %v5029_v24  ;;  %v976_v45 = vmul.f32 %v5029_v24, %v5029_v24 }
 0x396   :  { %v946_v31 = vadd.f32 %v5019_v51, %v945_v27  ;;  %v999_v32 = vadd.f32 %v998_v26, %v976_v45 }
 0x398   :  { %v1000_v34 = vadd.f32 %v999_v32, %v977_v29  ;;  %v5039_v35 = vpop.f32.mrb[44].mxu0  ;;  %v947_v36 = vadd.f32 %v5027_v17, %v946_v31 }
 0x399   :  { %v5042_v38 = vpop.f32.mrb[45].mxu0  ;;  %v981_v44 = vmul.f32 %v5039_v35, %v5039_v35 }
 0x39a   :  { %v948_v42 = vadd.f32 %v947_v36, %v5042_v38  ;;  %v979_v58 = vmul.f32 %v5042_v38, %v5042_v38  ;;  %v1001_v19 = vadd.f32 %v1000_v34, %v978_v28  ;;  %v5047_v5 = vpop.f32.mrb[46].mxu0 }
 0x39b   :  { %v5049_v39 = vpop.f32.mrb[47].mxu0  ;;  %v982_v43 = vmul.f32 %v5047_v5, %v5047_v5 }
 0x39c   :  { %v1002_v40 = vadd.f32 %v1001_v19, %v979_v58  ;;  %v949_v20 = vadd.f32 %v948_v42, %v5049_v39  ;;  %v980_v21 = vmul.f32 %v5049_v39, %v5049_v39 }
 0x39e   :  { %v950_v47 = vadd.f32 %v5039_v35, %v949_v20  ;;  %v1003_v56 = vadd.f32 %v1002_v40, %v980_v21 }
 0x3a0   :  { %v1004_v48 = vadd.f32 %v1003_v56, %v981_v44  ;;  %v5059_v46 = vpop.f32.mrb[48].mxu0  ;;  %v951_v50 = vadd.f32 %v5047_v5, %v950_v47 }
 0x3a1   :  { %v5062_v30 = vpop.f32.mrb[49].mxu0  ;;  %v985_v57 = vmul.f32 %v5059_v46, %v5059_v46 }
 0x3a2   :  { %v952_v6 = vadd.f32 %v951_v50, %v5062_v30  ;;  %v983_v59 = vmul.f32 %v5062_v30, %v5062_v30  ;;  %v1005_v60 = vadd.f32 %v1004_v48, %v982_v43  ;;  %v5067_v18 = vpop.f32.mrb[50].mxu0 }
 0x3a3   :  { %v5069_v41 = vpop.f32.mrb[51].mxu0  ;;  %v986_v13 = vmul.f32 %v5067_v18, %v5067_v18 }
 0x3a4   :  { %v1006_v23 = vadd.f32 %v1005_v60, %v983_v59  ;;  %v953_v37 = vadd.f32 %v952_v6, %v5069_v41  ;;  %v984_v62 = vmul.f32 %v5069_v41, %v5069_v41 }
 0x3a6   :  { %v954_v63 = vadd.f32 %v5059_v46, %v953_v37  ;;  %v1007_v11 = vadd.f32 %v1006_v23, %v984_v62 }
 0x3a8   :  { %v1008_v1 = vadd.f32 %v1007_v11, %v985_v57  ;;  %v5079_v0 = vpop.f32.mrb[52].mxu0  ;;  %v955_v4 = vadd.f32 %v5067_v18, %v954_v63 }
 0x3a9   :  { %v5082_v16 = vpop.f32.mrb[53].mxu0  ;;  %v989_v28 = vmul.f32 %v5079_v0, %v5079_v0 }
 0x3aa   :  { %v956_v33 = vadd.f32 %v955_v4, %v5082_v16  ;;  %v987_v12 = vmul.f32 %v5082_v16, %v5082_v16  ;;  %v1009_v26 = vadd.f32 %v1008_v1, %v986_v13  ;;  %v5087_v27 = vpop.f32.mrb[54].mxu0  ;;  %v5098_v13 = vld [vmem:[%s6944_s3 + $0x50] sm:$0xff]  ;;  %v935_v4 = vld [vmem:[%s6945_s4 + $0x2] ss:$0 sm:$0xff] }
 0x3ab   :  { %v923_v45 = vpop.f32.mrb[55].mxu0  ;;  %v990_v42 = vmul.f32 %v5087_v27, %v5087_v27  ;;  %v5103_v1 = vld [vmem:[%s6944_s3 + $0x70] sm:$0xff] }
 0x3ac   :  { %v1010_v29 = vadd.f32 %v1009_v26, %v987_v12  ;;  %v957_v31 = vadd.f32 %v956_v33, %v923_v45  ;;  %v988_v32 = vmul.f32 %v923_v45, %v923_v45  ;;  %v5111_v33 = vld [vmem:[%s6944_s3 + $0x58] sm:$0xff]  ;;  %v5121_v26 = vld [vmem:[%s6944_s3 + $0x90] sm:$0xff] }
 0x3ad   :  { %v5116_v12 = vld [vmem:[%s6944_s3 + $0x78] sm:$0xff] }
 0x3ae   :  { %v958_v34 = vadd.f32 %v5079_v0, %v957_v31  ;;  %v1011_v36 = vadd.f32 %v1010_v29, %v988_v32  ;;  %v5126_v29 = vld [vmem:[%s6944_s3 + $0xb0] sm:$0xff]  ;;  %v5131_v31 = vld [vmem:[%s6944_s3 + $0x98] sm:$0xff] }
 0x3af   :  { %v5136_v32 = vld [vmem:[%s6944_s3 + $0xb8] sm:$0xff] }
 0x3b0   :  { %v959_v58 = vadd.f32 %v5087_v27, %v958_v34  ;;  %v1012_v19 = vadd.f32 %v1011_v36, %v989_v28  ;;  %v5141_v28 = vld [vmem:[%s6944_s3 + $0xd0] sm:$0xff]  ;;  %v5151_v36 = vld [vmem:[%s6944_s3 + $0xd8] sm:$0xff] }
 0x3b1   :  { %v5146_v34 = vld [vmem:[%s6944_s3 + $0xf0] sm:$0xff]  ;;  %7119 = vst [vmem:[#allocation11_spill] sm:$0xff] %v5151_v36 }
 0x3b2   :  { %v960_v40 = vrot.slane %v959_v58, 4  ;;  %v1013_v20 = vadd.f32 %v1012_v19, %v990_v42  ;;  %v5160_v19 = vld [vmem:[%s6944_s3 + $0xf8] sm:$0xff] }
 0x3b3   :  { %7120 = vst [vmem:[#allocation12_spill] sm:$0xff] %v5160_v19 }
 0x3b4   :  { %v961_v21 = vadd.f32 %v960_v40, %v959_v58  ;;  %v1014_v44 = vrot.slane %v1013_v20, 4  ;;  %v5165_v40 = vld [vmem:[%s6944_s3 + $0x110] sm:$0xff] }
 0x3b5   :  { %7121 = vst [vmem:[#allocation13_spill] sm:$0xff] %v5165_v40 }
 0x3b6   :  { %v962_v47 = vrot.slane %v961_v21, 2  ;;  %v1015_v56 = vadd.f32 %v1014_v44, %v1013_v20  ;;  %v5170_v20 = vld [vmem:[%s6944_s3 + $0x130] sm:$0xff] }
 0x3b7   :  { %7122 = vst [vmem:[#allocation14_spill] sm:$0xff] %v5170_v20 }
 0x3b8   :  { %v963_v43 = vadd.f32 %v962_v47, %v961_v21  ;;  %v1016_v48 = vrot.slane %v1015_v56, 2 }
 0x3ba   :  { %v964_v50 = vrot.slane %v963_v43, 1  ;;  %v1017_v6 = vadd.f32 %v1016_v48, %v1015_v56 }
 0x3bc   :  { %v965_v59 = vadd.f32 %v964_v50, %v963_v43  ;;  %v1018_v60 = vrot.slane %v1017_v6, 1 }
 0x3be   :  { %v966_v23 = vmul.f32 0.0052083335, %v965_v59  ;;  %v1019_v37 = vadd.f32 %v1018_v60, %v1017_v6  ;;  %v936_v60 = vld [vmem:[%s6945_s4 + $0x3] ss:$0 sm:$0xff] }
 0x3c0   :  { %v1020_v62 = vmul.f32 0.0052083335, %v1019_v37  ;;  %v1021_v57 = vmul.f32 %v966_v23, %v966_v23 }
 0x3c2   :  { %v1022_v63 = vsub.f32 %v1020_v62, %v1021_v57 }
 0x3c4   :  { %v1023_v11 = vadd.f32 1e-05, %v1022_v63 }
 0x3c6   :  { %4328 = vrsqrt.f32 %v1023_v11 }
 0x3d0   :  { %v4329_v21 = vpop.eup %4328 }
 0x3d1   :  { %v5180_v48 = vmul.f32 %v4329_v21, %v935_v4 }
 0x3d3   :  { %v1026_v11 = vmul.f32 %v5180_v48, %v966_v23  ;;  %v1049_v4 = vmul.f32 %v5180_v48, %v923_v45  ;;  %v1028_v21 = vmul.f32 %v5180_v48, %v4982_v52  ;;  %v1029_v59 = vmul.f32 %v5180_v48, %v4986_v55 }
 0x3d4   :  { %v1036_v37 = vmul.f32 %v5180_v48, %v5022_v9  ;;  %v1037_v62 = vmul.f32 %v5180_v48, %v5029_v24  ;;  %v1044_v57 = vmul.f32 %v5180_v48, %v5062_v30  ;;  %v1045_v23 = vmul.f32 %v5180_v48, %v5069_v41 }
 0x3d5   :  { %v5213_v63 = vsub.f32 %v936_v60, %v1026_v11  ;;  %v1030_v52 = vmul.f32 %v4980_v49, %v5180_v48  ;;  %v1031_v55 = vmul.f32 %v4984_v22, %v5180_v48  ;;  %v1038_v9 = vmul.f32 %v5019_v51, %v5180_v48 }
 0x3d6   :  { %v1039_v24 = vmul.f32 %v5027_v17, %v5180_v48  ;;  %v1046_v30 = vmul.f32 %v5059_v46, %v5180_v48  ;;  %v1047_v41 = vmul.f32 %v5067_v18, %v5180_v48  ;;  %v1032_v45 = vmul.f32 %v5180_v48, %v5002_v7 }
 0x3d7   :  { %v5230_v49 = vadd.f32 %v1049_v4, %v5213_v63  ;;  %v1052_v22 = vadd.f32 %v1028_v21, %v5213_v63  ;;  %v1053_v60 = vadd.f32 %v1029_v59, %v5213_v63  ;;  %v1060_v51 = vadd.f32 %v1036_v37, %v5213_v63 }
 0x3d8   :  { %v1061_v17 = vadd.f32 %v1037_v62, %v5213_v63  ;;  %v1068_v11 = vadd.f32 %v1044_v57, %v5213_v63  ;;  %v1069_v46 = vadd.f32 %v1045_v23, %v5213_v63  ;;  %v1054_v18 = vadd.f32 %v1030_v52, %v5213_v63 }
 0x3d9   :  { %v5240_v50 = vmul.f32 0.2, %v5230_v49  ;;  %v1076_v7 = vmul.f32 0.2, %v1052_v22  ;;  %v1077_v4 = vmul.f32 0.2, %v1053_v60  ;;  %v1055_v56 = vadd.f32 %v1031_v55, %v5213_v63 }
 0x3da   :  { %v1084_v21 = vmul.f32 0.2, %v1060_v51  ;;  %v1085_v6 = vmul.f32 0.2, %v1061_v17  ;;  %v1092_v59 = vmul.f32 0.2, %v1068_v11  ;;  %v1062_v37 = vadd.f32 %v1038_v9, %v5213_v63 }
 0x3db   :  { %v1093_v57 = vmul.f32 0.2, %v1069_v46  ;;  %v1100_v43 = vmax.f32 %v1052_v22, %v1076_v7  ;;  %v1101_v23 = vmax.f32 %v1053_v60, %v1077_v4  ;;  %v1063_v53 = vadd.f32 %v1039_v24, %v5213_v63 }
 0x3dc   :  { %v1108_v44 = vmax.f32 %v1060_v51, %v1084_v21  ;;  %v1109_v52 = vmax.f32 %v1061_v17, %v1085_v6  ;;  %v1116_v42 = vmax.f32 %v1068_v11, %v1092_v59  ;;  %v1070_v58 = vadd.f32 %v1046_v30, %v5213_v63 }
 0x3dd   :  { %v1117_v47 = vmax.f32 %v1069_v46, %v1093_v57  ;;  %v1071_v55 = vadd.f32 %v1047_v41, %v5213_v63  ;;  %v1078_v10 = vmul.f32 0.2, %v1054_v18  ;;  %v1079_v9 = vmul.f32 0.2, %v1055_v56 }
 0x3de   :  { %v1124_v15 = vmax.f32 %v1100_v43, %v1108_v44  ;;  %v1125_v40 = vmax.f32 %v1101_v23, %v1109_v52  ;;  %v1086_v20 = vmul.f32 0.2, %v1062_v37  ;;  %v1087_v19 = vmul.f32 0.2, %v1063_v53 }
 0x3df   :  { %v1094_v62 = vmul.f32 0.2, %v1070_v58  ;;  %v1095_v36 = vmul.f32 0.2, %v1071_v55  ;;  %v1102_v22 = vmax.f32 %v1054_v18, %v1078_v10  ;;  %v1103_v6 = vmax.f32 %v1055_v56, %v1079_v9 }
 0x3e0   :  { %v1132_v60 = vmax.f32 %v1124_v15, %v1116_v42  ;;  %v1133_v51 = vmax.f32 %v1125_v40, %v1117_v47  ;;  %v1110_v17 = vmax.f32 %v1062_v37, %v1086_v20  ;;  %v1111_v11 = vmax.f32 %v1063_v53, %v1087_v19 }
 0x3e1   :  { %v1118_v24 = vmax.f32 %v1070_v58, %v1094_v62  ;;  %v1119_v46 = vmax.f32 %v1071_v55, %v1095_v36  ;;  %v1033_v30 = vmul.f32 %v5180_v48, %v5009_v54  ;;  %v1040_v43 = vmul.f32 %v5180_v48, %v5042_v38 }
 0x3e2   :  { %v5251_v41 = vpack.c.bf16 %v1133_v51, %v1132_v60  ;;  %v1126_v44 = vmax.f32 %v1102_v22, %v1110_v17  ;;  %v1041_v7 = vmul.f32 %v5180_v48, %v5049_v39  ;;  %v1127_v10 = vmax.f32 %v1103_v6, %v1111_v11 }
 0x3e3   :  { %v1048_v15 = vmul.f32 %v5180_v48, %v5082_v16  ;;  %v1056_v53 = vadd.f32 %v1032_v45, %v5213_v63  ;;  %v1057_v36 = vadd.f32 %v1033_v30, %v5213_v63  ;;  %v1064_v42 = vadd.f32 %v1040_v43, %v5213_v63 }
 0x3e4   :  { %1561 = vmatmul.mubr.bf16.vlgmr.msra.gmra.mrb[0].mxu1 %v5251_v41  ;;  %1634 = vmatmul.mubr.bf16.vlgmr.msra.gmra.mrb[56].mxu0 %v5251_v41  ;;  %v1134_v54 = vmax.f32 %v1126_v44, %v1118_v24  ;;  %v1065_v38 = vadd.f32 %v1041_v7, %v5213_v63  ;;  %v7123_v39 = vcombine.low %v4922_v14, %v4927_v3 }
 0x3e5   :  { %v7124_v16 = vcombine.low %v4937_v61, %v4942_v8  ;;  %v1135_v58 = vmax.f32 %v1127_v10, %v1119_v46  ;;  %v1072_v19 = vadd.f32 %v1048_v15, %v5213_v63  ;;  %v1080_v40 = vmul.f32 0.2, %v1056_v53 }
 0x3e6   :  { %1675 = vmatpush1.bf16.msra.mxu1 %v7123_v39  ;;  %v1081_v20 = vmul.f32 0.2, %v1057_v36  ;;  %v7125_v47 = vcombine.high %v5098_v13, %v5103_v1  ;;  %v7126_v56 = vcombine.high %v5111_v33, %v5116_v12  ;;  %v1088_v45 = vmul.f32 0.2, %v1064_v42 }
 0x3e7   :  { %1748 = vmatpush1.bf16.msra.mxu0 %v7124_v16  ;;  %v1089_v14 = vmul.f32 0.2, %v1065_v38  ;;  %v1034_v3 = vmul.f32 %v4999_v2, %v5180_v48  ;;  %v1035_v61 = vmul.f32 %v5007_v25, %v5180_v48  ;;  %v7127_v8 = vmov 0  }
 0x3e8   :  { %1676 = vmatprep.subr.bf16.mxu1 %v7125_v47  ;;  %1749 = vmatprep.subr.bf16.mxu0 %v7126_v56  ;;  %v5284_v18 = vpack.c.bf16 %v1135_v58, %v1134_v54  ;;  %v1096_v4 = vmul.f32 0.2, %v1072_v19  ;;  %v1104_v21 = vmax.f32 %v1056_v53, %v1080_v40  ;;  %v1105_v59 = vmax.f32 %v1057_v36, %v1081_v20  ;;  %v1186_v36 = vld [vmem:[%s6944_s3 + $0x170] sm:$0xff]  ;;  %v1183_v54 = vld [vmem:[%s6944_s3 + $0x158] sm:$0xff] }
 0x3e9   :  { %1570 = vmatprep.mubr.bf16.mxu1 %v7127_v8  ;;  %1643 = vmatprep.mubr.bf16.mxu0 %v7127_v8  ;;  %v1112_v37 = vmax.f32 %v1064_v42, %v1088_v45  ;;  %v1113_v62 = vmax.f32 %v1065_v38, %v1089_v14  ;;  %v1042_v57 = vmul.f32 %v5039_v35, %v5180_v48  ;;  %v1187_v42 = vld [vmem:[%s6944_s3 + $0x178] sm:$0xff] }
 0x3ea   :  { %v1043_v2 = vmul.f32 %v5047_v5, %v5180_v48  ;;  %v7128_v25 = vcombine.low %v5098_v13, %v5103_v1  ;;  %v7129_v23 = vcombine.low %v5111_v33, %v5116_v12  ;;  %v1120_v52 = vmax.f32 %v1072_v19, %v1096_v4  ;;  %v1175_v33 = vld [vmem:[%s6944_s3 + $0x118] sm:$0xff]  ;;  %v7140_v19 = vld [vmem:[#allocation13_spill] sm:$0xff] }
 0x3eb   :  { %v1050_v55 = vmul.f32 %v5079_v0, %v5180_v48  ;;  %v1051_v9 = vmul.f32 %v5087_v27, %v5180_v48  ;;  %v7130_v35 = vcombine.high %v5121_v26, %v5126_v29  ;;  %v7131_v5 = vcombine.high %v5131_v31, %v5136_v32  ;;  %v1179_v0 = vld [vmem:[%s6944_s3 + $0x138] sm:$0xff] }
 0x3ec   :  { %1677 = vmatpush1.bf16.msra.mxu1 %v7128_v25  ;;  %1750 = vmatpush1.bf16.msra.mxu0 %v7129_v23  ;;  %v1128_v13 = vmax.f32 %v1104_v21, %v1112_v37  ;;  %v1129_v1 = vmax.f32 %v1105_v59, %v1113_v62  ;;  %v1058_v27 = vadd.f32 %v1034_v3, %v5213_v63  ;;  %v7139_v58 = vld [vmem:[#allocation14_spill] sm:$0xff]  ;;  %v1190_v37 = vld [vmem:[%s6944_s3 + $0x190] sm:$0xff] }
 0x3ed   :  { %1678 = vmatprep.subr.bf16.mxu1 %v7130_v35  ;;  %1751 = vmatprep.subr.bf16.mxu0 %v7131_v5  ;;  %v1059_v12 = vadd.f32 %v1035_v61, %v5213_v63  ;;  %v1066_v48 = vadd.f32 %v1042_v57, %v5213_v63  ;;  %v1067_v22 = vadd.f32 %v1043_v2, %v5213_v63  ;;  %v1194_v62 = vld [vmem:[%s6944_s3 + $0x1b0] sm:$0xff]  ;;  %v1191_v57 = vld [vmem:[%s6944_s3 + $0x198] sm:$0xff] }
 0x3ee   :  { %v1074_v60 = vadd.f32 %v1050_v55, %v5213_v63  ;;  %1571 = vmatmul.mubr.bf16.gmra.mrb[4].mxu1 %v5284_v18  ;;  %1644 = vmatmul.mubr.bf16.gmra.mrb[60].mxu0 %v5284_v18  ;;  %v1136_v51 = vmax.f32 %v1128_v13, %v1120_v52  ;;  %v7132_v6 = vmax.f32 %v5230_v49, %v5240_v50  ;;  %v1082_v24 = vmul.f32 0.2, %v1058_v27  ;;  %v7136_v50 = vld [vmem:[#allocation11_spill] sm:$0xff]  ;;  %v7137_v49 = vld [vmem:[#allocation12_spill] sm:$0xff]  ;;  %v1195_v2 = vld [vmem:[%s6944_s3 + $0x1b8] sm:$0xff] }
 0x3ef   :  { %v1075_v11 = vadd.f32 %v1051_v9, %v5213_v63  ;;  %v7133_v46 = vcombine.low %v5121_v26, %v5126_v29  ;;  %v7134_v30 = vcombine.low %v5131_v31, %v5136_v32  ;;  %v4083_v44 = vcombine.high %v1175_v33, %v1179_v0  ;;  %v1182_v26 = vld [vmem:[%s6944_s3 + $0x150] sm:$0xff]  ;;  %1580 = vmatprep.mubr.bf16.mxu1 %v7127_v8  ;;  %v1199_v13 = vld [vmem:[%s6944_s3 + $0x1d8] sm:$0xff] }
 0x3f0   :  { %v1137_v17 = vmax.f32 %v1129_v1, %v7132_v6  ;;  %v1083_v43 = vmul.f32 0.2, %v1059_v12  ;;  %v1090_v7 = vmul.f32 0.2, %v1066_v48  ;;  %v1091_v10 = vmul.f32 0.2, %v1067_v22  ;;  %1653 = vmatprep.mubr.bf16.mxu0 %v7127_v8 }
 0x3f1   :  { %1679 = vmatpush1.bf16.msra.mxu1 %v7133_v46  ;;  %1752 = vmatpush1.bf16.msra.mxu0 %v7134_v30  ;;  %v7135_v15 = vcombine.high %v5141_v28, %v5146_v34  ;;  %v7138_v63 = vcombine.high %v7136_v50, %v7137_v49  ;;  %v1098_v29 = vmul.f32 0.2, %v1074_v60  ;;  %v1099_v31 = vmul.f32 0.2, %v1075_v11  ;;  %v1198_v35 = vld [vmem:[%s6944_s3 + $0x1d0] sm:$0xff]  ;;  %v1203_v1 = vld [vmem:[%s6944_s3 + $0x1f8] sm:$0xff] }
 0x3f2   :  { %v5335_v53 = vpack.c.bf16 %v1137_v17, %v1136_v51  ;;  %v1106_v32 = vmax.f32 %v1058_v27, %v1082_v24  ;;  %v1107_v38 = vmax.f32 %v1059_v12, %v1083_v43  ;;  %v1114_v39 = vmax.f32 %v1066_v48, %v1090_v7  ;;  %v1202_v5 = vld [vmem:[%s6944_s3 + $0x1f0] sm:$0xff] }
 0x3f3   :  { %1680 = vmatprep.subr.bf16.mxu1 %v7135_v15  ;;  %1753 = vmatprep.subr.bf16.mxu0 %v7138_v63  ;;  %v1115_v16 = vmax.f32 %v1067_v22, %v1091_v10  ;;  %v4080_v40 = vcombine.low %v7140_v19, %v7139_v58  ;;  %v4082_v20 = vcombine.low %v1175_v33, %v1179_v0  ;;  %v2150_v6 = vlaneseq }
 0x3f4   :  { %v1122_v47 = vmax.f32 %v1074_v60, %v1098_v29  ;;  %v7141_v56 = vcombine.low %v5141_v28, %v5146_v34  ;;  %v7142_v45 = vcombine.low %v7136_v50, %v7137_v49  ;;  %v1123_v14 = vmax.f32 %v1075_v11, %v1099_v31 }
 0x3f5   :  { %v1130_v3 = vmax.f32 %v1106_v32, %v1114_v39  ;;  %v1131_v61 = vmax.f32 %v1107_v38, %v1115_v16  ;;  %v7143_v4 = vcombine.high %v7140_v19, %v7139_v58  ;;  %v4089_v21 = vcombine.high %v1182_v26, %v1186_v36 }
 0x3f6   :  { %1681 = vmatpush1.bf16.msra.mxu1 %v7141_v56  ;;  %1754 = vmatpush1.bf16.msra.mxu0 %v7142_v45  ;;  %v4091_v59 = vcombine.high %v1183_v54, %v1187_v42  ;;  %v4088_v25 = vcombine.low %v1182_v26, %v1186_v36  ;;  %v4090_v23 = vcombine.low %v1183_v54, %v1187_v42  ;;  %v5448_v38 = vshrl.u32 %v2150_v6, 7 }
 0x3f7   :  { %1682 = vmatprep.subr.bf16.mxu1 %v7143_v4  ;;  %1755 = vmatprep.subr.bf16.mxu0 %v4083_v44  ;;  %v1138_v28 = vmax.f32 %v1130_v3, %v1122_v47  ;;  %v1139_v34 = vmax.f32 %v1131_v61, %v1123_v14  ;;  %v4097_v55 = vcombine.high %v1190_v37, %v1194_v62  ;;  %v4391_v39 = vmov 1966171168  }
 0x3f8   :  { %1581 = vmatmul.mubr.bf16.gmra.mrb[8].mxu1 %v5335_v53  ;;  %1654 = vmatmul.mubr.bf16.gmra.mrb[64].mxu0 %v5335_v53  ;;  %v4099_v9 = vcombine.high %v1191_v57, %v1195_v2  ;;  %v4096_v33 = vcombine.low %v1190_v37, %v1194_v62  ;;  %v4098_v0 = vcombine.low %v1191_v57, %v1195_v2  ;;  %v5450_v16 = vunpack.c.l.s4 %v4391_v39 }
 0x3f9   :  { %v1207_v52 = vpack.c.bf16 %v1139_v34, %v1138_v28  ;;  %1590 = vmatprep.mubr.bf16.mxu1 %v7127_v8  ;;  %1663 = vmatprep.mubr.bf16.mxu0 %v7127_v8  ;;  %v4105_v27 = vcombine.high %v1198_v35, %v1202_v5  ;;  %v4107_v12 = vcombine.high %v1199_v13, %v1203_v1 }
 0x3fa   :  { %1683 = vmatpush1.bf16.msra.mxu1 %v4080_v40  ;;  %1756 = vmatpush1.bf16.msra.mxu0 %v4082_v20  ;;  %v4104_v48 = vcombine.low %v1198_v35, %v1202_v5  ;;  %v4106_v22 = vcombine.low %v1199_v13, %v1203_v1  ;;  %7146 = vst [vmem:[#allocation14_spill] sm:$0xff] %v5448_v38 }
 0x3fb   :  { %1684 = vmatprep.subr.bf16.mxu1 %v4089_v21  ;;  %1757 = vmatprep.subr.bf16.mxu0 %v4091_v59 }
 0x3fe   :  { %1685 = vmatpush1.bf16.msra.mxu1 %v4088_v25  ;;  %1758 = vmatpush1.bf16.msra.mxu0 %v4090_v23 }
 0x3ff   :  { %1686 = vmatprep.subr.bf16.mxu1 %v4097_v55  ;;  %1759 = vmatprep.subr.bf16.mxu0 %v4099_v9  ;;  %v4108_v55 = vld [vmem:[%s6945_s4 + $0x4] ss:$8 sm:$0xf] }
 0x400   :  { %1591 = vmatmul.mubr.bf16.gmra.mrb[12].mxu1 %v1207_v52  ;;  %1664 = vmatmul.mubr.bf16.gmra.mrb[68].mxu0 %v1207_v52  ;;  %v4109_v9 = vld [vmem:[%s6945_s4 + $0x4] ss:$8 sm:$0xf0] }
 0x401   :  { %1706 = vmatprep.mubr.bf16.mxu1 %v7127_v8  ;;  %1779 = vmatprep.mubr.bf16.mxu0 %v7127_v8 }
 0x402   :  { %1687 = vmatpush1.bf16.msra.mxu1 %v4096_v33  ;;  %1760 = vmatpush1.bf16.msra.mxu0 %v4098_v0 }
 0x403   :  { %1688 = vmatprep.subr.bf16.mxu1 %v4105_v27  ;;  %1761 = vmatprep.subr.bf16.mxu0 %v4107_v12  ;;  %v5494_v12 = vor.u32 %v4109_v9, %v4108_v55 }
 0x406   :  { %1689 = vmatpush1.bf16.msra.mxu1 %v4104_v48  ;;  %1762 = vmatpush1.bf16.msra.mxu0 %v4106_v22  ;;  %v5497_v48 = vsub.s32 0, %v5448_v38  ;;  %v5500_v22 = vsub.s32 2, %v5448_v38 }
 0x408   :  { %7150 = vst [vmem:[#allocation17_spill] sm:$0xff] %v5497_v48  ;;  %7151 = vst [vmem:[#allocation18_spill] sm:$0xff] %v5500_v22 }
 0x409   :  { %1707 = vmatmul.mubr.bf16.vlgmr.msra.gmra.mrb[16].mxu1 %v5251_v41  ;;  %1780 = vmatmul.mubr.bf16.vlgmr.msra.gmra.mrb[72].mxu0 %v5251_v41 }
 0x40a   :  { %1716 = vmatprep.mubr.bf16.mxu1 %v7127_v8  ;;  %1789 = vmatprep.mubr.bf16.mxu0 %v7127_v8 }
 0x411   :  { %1717 = vmatmul.mubr.bf16.gmra.mrb[20].mxu1 %v5284_v18  ;;  %1790 = vmatmul.mubr.bf16.gmra.mrb[76].mxu0 %v5284_v18 }
 0x412   :  { %1726 = vmatprep.mubr.bf16.mxu1 %v7127_v8  ;;  %1799 = vmatprep.mubr.bf16.mxu0 %v7127_v8 }
 0x419   :  { %1727 = vmatmul.mubr.bf16.gmra.mrb[24].mxu1 %v5335_v53  ;;  %1800 = vmatmul.mubr.bf16.gmra.mrb[80].mxu0 %v5335_v53 }
 0x41a   :  { %1736 = vmatprep.mubr.bf16.mxu1 %v7127_v8  ;;  %1809 = vmatprep.mubr.bf16.mxu0 %v7127_v8 }
 0x421   :  { %1737 = vmatmul.mubr.bf16.gmra.mrb[28].mxu1 %v1207_v52  ;;  %1810 = vmatmul.mubr.bf16.gmra.mrb[84].mxu0 %v1207_v52 }
 0x4b7   :  { %v5404_v41 = vpop.f32.mrb[0].mxu1  ;;  %v5406_v60 = vpop.f32.mrb[56].mxu0 }
 0x4b8   :  { %v5408_v51 = vpop.f32.mrb[1].mxu1  ;;  %v5410_v18 = vpop.f32.mrb[57].mxu0  ;;  %v1941_v17 = vmul.f32 %v5404_v41, %v5404_v41  ;;  %v1943_v11 = vmul.f32 %v5406_v60, %v5406_v60 }
 0x4b9   :  { %7144 = vst [vmem:[#allocation11_spill] sm:$0xff] %v5410_v18  ;;  %v1942_v8 = vmul.f32 %v5408_v51, %v5408_v51  ;;  %v1944_v24 = vmul.f32 %v5410_v18, %v5410_v18  ;;  %v5420_v46 = vpop.f32.mrb[2].mxu1  ;;  %v5422_v30 = vpop.f32.mrb[58].mxu0 }
 0x4ba   :  { %v1828_v44 = vadd.f32 %v5420_v46, %v5404_v41  ;;  %v1949_v43 = vmul.f32 %v5420_v46, %v5420_v46  ;;  %v1854_v7 = vadd.f32 %v5422_v30, %v5406_v60  ;;  %v1951_v10 = vmul.f32 %v5422_v30, %v5422_v30  ;;  %v5432_v15 = vpop.f32.mrb[3].mxu1  ;;  %v5434_v50 = vpop.f32.mrb[59].mxu0 }
 0x4bb   :  { %7145 = vst [vmem:[#allocation12_spill] sm:$0xff] %v5434_v50  ;;  %v1841_v49 = vadd.f32 %v5432_v15, %v5408_v51  ;;  %v1950_v63 = vmul.f32 %v5432_v15, %v5432_v15  ;;  %v1867_v53 = vadd.f32 %v5434_v50, %v5410_v18  ;;  %v1952_v26 = vmul.f32 %v5434_v50, %v5434_v50 }
 0x4bc   :  { %v2005_v29 = vadd.f32 %v1949_v43, %v1941_v17  ;;  %v2031_v31 = vadd.f32 %v1951_v10, %v1943_v11 }
 0x4bd   :  { %v2018_v32 = vadd.f32 %v1950_v63, %v1942_v8  ;;  %v2044_v36 = vadd.f32 %v1952_v26, %v1944_v24  ;;  %v5507_v8 = vsub.s32 1, %v5448_v38  ;;  %v2220_v24 = vunpack.c.0.s8 %v5450_v16 }
 0x4bf   :  { %7152 = vst [vmem:[#allocation19_spill] sm:$0xff] %v5507_v8 }
 0x4c1   :  { %v5444_v54 = vpop.f32.mrb[4].mxu1  ;;  %v5446_v42 = vpop.f32.mrb[60].mxu0 }
 0x4c2   :  { %v1829_v58 = vadd.f32 %v1828_v44, %v5444_v54  ;;  %v1957_v19 = vmul.f32 %v5444_v54, %v5444_v54  ;;  %v1855_v40 = vadd.f32 %v1854_v7, %v5446_v42  ;;  %v1959_v20 = vmul.f32 %v5446_v42, %v5446_v42  ;;  %v5458_v47 = vpop.f32.mrb[5].mxu1  ;;  %v5460_v56 = vpop.f32.mrb[61].mxu0 }
 0x4c3   :  { %7147 = vst [vmem:[#allocation13_spill] sm:$0xff] %v5460_v56  ;;  %v1842_v45 = vadd.f32 %v1841_v49, %v5458_v47  ;;  %v1958_v14 = vmul.f32 %v5458_v47, %v5458_v47  ;;  %v1868_v3 = vadd.f32 %v1867_v53, %v5460_v56  ;;  %v1960_v61 = vmul.f32 %v5460_v56, %v5460_v56  ;;  %v5468_v4 = vpop.f32.mrb[6].mxu1  ;;  %v5470_v21 = vpop.f32.mrb[62].mxu0 }
 0x4c4   :  { %v2006_v59 = vadd.f32 %v2005_v29, %v1957_v19  ;;  %v2032_v37 = vadd.f32 %v2031_v31, %v1959_v20  ;;  %v1830_v28 = vadd.f32 %v1829_v58, %v5468_v4  ;;  %v1965_v34 = vmul.f32 %v5468_v4, %v5468_v4  ;;  %v5475_v62 = vpop.f32.mrb[7].mxu1  ;;  %v5477_v57 = vpop.f32.mrb[63].mxu0 }
 0x4c5   :  { %7148 = vst [vmem:[#allocation15_spill] sm:$0xff] %v5475_v62  ;;  %7149 = vst [vmem:[#allocation16_spill] sm:$0xff] %v5477_v57  ;;  %v2019_v2 = vadd.f32 %v2018_v32, %v1958_v14  ;;  %v2045_v25 = vadd.f32 %v2044_v36, %v1960_v61  ;;  %v1856_v23 = vadd.f32 %v1855_v40, %v5470_v21  ;;  %v5511_v44 = vsub.s32 3, %v5448_v38 }
 0x4c6   :  { %v1967_v52 = vmul.f32 %v5470_v21, %v5470_v21  ;;  %v2007_v35 = vadd.f32 %v2006_v59, %v1965_v34  ;;  %v1843_v5 = vadd.f32 %v1842_v45, %v5475_v62  ;;  %v1966_v13 = vmul.f32 %v5475_v62, %v5475_v62 }
 0x4c7   :  { %v1869_v1 = vadd.f32 %v1868_v3, %v5477_v57  ;;  %v1968_v0 = vmul.f32 %v5477_v57, %v5477_v57  ;;  %7153 = vst [vmem:[#allocation20_spill] sm:$0xff] %v5511_v44 }
 0x4c8   :  { %v2033_v33 = vadd.f32 %v2032_v37, %v1967_v52  ;;  %v2020_v27 = vadd.f32 %v2019_v2, %v1966_v13 }
 0x4c9   :  { %v2046_v6 = vadd.f32 %v2045_v25, %v1968_v0 }
 0x4cb   :  { %v5502_v17 = vpop.f32.mrb[8].mxu1  ;;  %v5504_v11 = vpop.f32.mrb[64].mxu0 }
 0x4cc   :  { %v1831_v43 = vadd.f32 %v1830_v28, %v5502_v17  ;;  %v1973_v7 = vmul.f32 %v5502_v17, %v5502_v17  ;;  %v1857_v10 = vadd.f32 %v1856_v23, %v5504_v11  ;;  %v1975_v49 = vmul.f32 %v5504_v11, %v5504_v11  ;;  %v5519_v63 = vpop.f32.mrb[9].mxu1  ;;  %v5521_v53 = vpop.f32.mrb[65].mxu0 }
 0x4cd   :  { %7154 = vst [vmem:[#allocation21_spill] sm:$0xff] %v5519_v63  ;;  %7155 = vst [vmem:[#allocation22_spill] sm:$0xff] %v5521_v53  ;;  %v1844_v26 = vadd.f32 %v1843_v5, %v5519_v63  ;;  %v1974_v29 = vmul.f32 %v5519_v63, %v5519_v63  ;;  %v1870_v31 = vadd.f32 %v1869_v1, %v5521_v53  ;;  %v5529_v36 = vpop.f32.mrb[10].mxu1  ;;  %v5531_v39 = vpop.f32.mrb[66].mxu0 }
 0x4ce   :  { %v1976_v32 = vmul.f32 %v5521_v53, %v5521_v53  ;;  %v2008_v16 = vadd.f32 %v2007_v35, %v1973_v7  ;;  %v2034_v58 = vadd.f32 %v2033_v33, %v1975_v49  ;;  %v1832_v19 = vadd.f32 %v1831_v43, %v5529_v36  ;;  %v5536_v20 = vpop.f32.mrb[11].mxu1  ;;  %v5538_v45 = vpop.f32.mrb[67].mxu0 }
 0x4cf   :  { %v1981_v40 = vmul.f32 %v5529_v36, %v5529_v36  ;;  %7156 = vst [vmem:[#allocation23_spill] sm:$0xff] %v5536_v20  ;;  %7157 = vst [vmem:[#allocation24_spill] sm:$0xff] %v5538_v45  ;;  %v2021_v14 = vadd.f32 %v2020_v27, %v1974_v29  ;;  %v1858_v61 = vadd.f32 %v1857_v10, %v5531_v39 }
 0x4d0   :  { %v2047_v3 = vadd.f32 %v2046_v6, %v1976_v32  ;;  %v1983_v59 = vmul.f32 %v5531_v39, %v5531_v39  ;;  %v1845_v28 = vadd.f32 %v1844_v26, %v5536_v20  ;;  %v1982_v34 = vmul.f32 %v5536_v20, %v5536_v20 }
 0x4d1   :  { %v2009_v37 = vadd.f32 %v2008_v16, %v1981_v40  ;;  %v1871_v2 = vadd.f32 %v1870_v31, %v5538_v45  ;;  %v1984_v23 = vmul.f32 %v5538_v45, %v5538_v45  ;;  %v5560_v33 = vsub.s32 %v2220_v24, %v5448_v38 }
 0x4d2   :  { %v2035_v25 = vadd.f32 %v2034_v58, %v1983_v59  ;;  %v2022_v52 = vadd.f32 %v2021_v14, %v1982_v34 }
 0x4d3   :  { %v2048_v35 = vadd.f32 %v2047_v3, %v1984_v23  ;;  %v5553_v5 = vpop.f32.mrb[12].mxu1  ;;  %v5555_v13 = vpop.f32.mrb[68].mxu0  ;;  %7158 = vst [vmem:[#allocation25_spill] sm:$0xff] %v5560_v33 }
 0x4d4   :  { %v1833_v27 = vadd.f32 %v1832_v19, %v5553_v5  ;;  %v1989_v6 = vmul.f32 %v5553_v5, %v5553_v5  ;;  %v1859_v43 = vadd.f32 %v1858_v61, %v5555_v13  ;;  %v1991_v7 = vmul.f32 %v5555_v13, %v5555_v13  ;;  %v5570_v10 = vpop.f32.mrb[13].mxu1  ;;  %v5572_v49 = vpop.f32.mrb[69].mxu0 }
 0x4d5   :  { %7159 = vst [vmem:[#allocation26_spill] sm:$0xff] %v5570_v10  ;;  %7160 = vst [vmem:[#allocation27_spill] sm:$0xff] %v5572_v49  ;;  %v1846_v24 = vadd.f32 %v1845_v28, %v5570_v10  ;;  %v1990_v26 = vmul.f32 %v5570_v10, %v5570_v10  ;;  %v1872_v29 = vadd.f32 %v1871_v2, %v5572_v49  ;;  %v5580_v32 = vpop.f32.mrb[14].mxu1  ;;  %v5582_v16 = vpop.f32.mrb[70].mxu0 }
 0x4d6   :  { %v1992_v31 = vmul.f32 %v5572_v49, %v5572_v49  ;;  %v2010_v58 = vadd.f32 %v2009_v37, %v1989_v6  ;;  %v2036_v19 = vadd.f32 %v2035_v25, %v1991_v7  ;;  %v1834_v40 = vadd.f32 %v1833_v27, %v5580_v32  ;;  %v5587_v3 = vpop.f32.mrb[15].mxu1  ;;  %v5589_v61 = vpop.f32.mrb[71].mxu0 }
 0x4d7   :  { %v1997_v14 = vmul.f32 %v5580_v32, %v5580_v32  ;;  %7161 = vst [vmem:[#allocation28_spill] sm:$0xff] %v5587_v3  ;;  %7162 = vst [vmem:[#allocation29_spill] sm:$0xff] %v5589_v61  ;;  %v2023_v59 = vadd.f32 %v2022_v52, %v1990_v26  ;;  %v1860_v34 = vadd.f32 %v1859_v43, %v5582_v16 }
 0x4d8   :  { %v2049_v28 = vadd.f32 %v2048_v35, %v1992_v31  ;;  %v1999_v2 = vmul.f32 %v5582_v16, %v5582_v16  ;;  %v1835_v23 = vrot.slane %v1834_v40, 4  ;;  %v1847_v37 = vadd.f32 %v1846_v24, %v5587_v3 }
 0x4d9   :  { %v2011_v0 = vadd.f32 %v2010_v58, %v1997_v14  ;;  %v1998_v25 = vmul.f32 %v5587_v3, %v5587_v3  ;;  %v1861_v27 = vrot.slane %v1860_v34, 4  ;;  %v1873_v7 = vadd.f32 %v1872_v29, %v5589_v61 }
 0x4da   :  { %v2037_v6 = vadd.f32 %v2036_v19, %v1999_v2  ;;  %v2000_v52 = vmul.f32 %v5589_v61, %v5589_v61  ;;  %v1836_v35 = vadd.f32 %v1835_v23, %v1834_v40  ;;  %v1848_v43 = vrot.slane %v1847_v37, 4 }
 0x4db   :  { %v2012_v26 = vrot.slane %v2011_v0, 4  ;;  %v2024_v31 = vadd.f32 %v2023_v59, %v1998_v25  ;;  %v1862_v1 = vadd.f32 %v1861_v27, %v1860_v34  ;;  %v1874_v55 = vrot.slane %v1873_v7, 4 }
 0x4dc   :  { %v2038_v9 = vrot.slane %v2037_v6, 4  ;;  %v2050_v58 = vadd.f32 %v2049_v28, %v2000_v52  ;;  %v5600_v14 = vpop.f32.mrb[16].mxu1  ;;  %v5602_v24 = vpop.f32.mrb[72].mxu0  ;;  %v1837_v38 = vrot.slane %v1836_v35, 2  ;;  %v1849_v19 = vadd.f32 %v1848_v43, %v1847_v37 }
 0x4dd   :  { %7163 = vst [vmem:[#allocation30_spill] sm:$0xff] %v5600_v14  ;;  %7164 = vst [vmem:[#allocation31_spill] sm:$0xff] %v5602_v24  ;;  %v2013_v49 = vadd.f32 %v2012_v26, %v2011_v0  ;;  %v2025_v2 = vrot.slane %v2024_v31, 4  ;;  %v5604_v29 = vpop.f32.mrb[17].mxu1  ;;  %v5606_v45 = vpop.f32.mrb[73].mxu0  ;;  %v1863_v40 = vrot.slane %v1862_v1, 2  ;;  %v1875_v61 = vadd.f32 %v1874_v55, %v1873_v7 }
 0x4de   :  { %7165 = vst [vmem:[#allocation32_spill] sm:$0xff] %v5604_v29  ;;  %7166 = vst [vmem:[#allocation33_spill] sm:$0xff] %v5606_v45  ;;  %v2039_v23 = vadd.f32 %v2038_v9, %v2037_v6  ;;  %v2051_v59 = vrot.slane %v2050_v58, 4  ;;  %v5608_v34 = vpop.f32.mrb[18].mxu1  ;;  %v5610_v25 = vpop.f32.mrb[74].mxu0  ;;  %v1838_v28 = vadd.f32 %v1837_v38, %v1836_v35  ;;  %v1850_v52 = vrot.slane %v1849_v19, 2 }
 0x4df   :  { %7167 = vst [vmem:[#allocation34_spill] sm:$0xff] %v5608_v34  ;;  %7168 = vst [vmem:[#allocation35_spill] sm:$0xff] %v5610_v25  ;;  %v2014_v27 = vrot.slane %v2013_v49, 2  ;;  %v2026_v53 = vadd.f32 %v2025_v2, %v2024_v31  ;;  %v5612_v57 = vpop.f32.mrb[19].mxu1  ;;  %v5614_v0 = vpop.f32.mrb[75].mxu0  ;;  %v1864_v37 = vadd.f32 %v1863_v40, %v1862_v1  ;;  %v1876_v43 = vrot.slane %v1875_v61, 2 }
 0x4e0   :  { %7169 = vst [vmem:[#allocation36_spill] sm:$0xff] %v5612_v57  ;;  %7170 = vst [vmem:[#allocation37_spill] sm:$0xff] %v5614_v0  ;;  %v2040_v26 = vrot.slane %v2039_v23, 2  ;;  %v2052_v56 = vadd.f32 %v2051_v59, %v2050_v58  ;;  %v1839_v50 = vrot.slane %v1838_v28, 1  ;;  %v1851_v55 = vadd.f32 %v1850_v52, %v1849_v19 }
 0x4e1   :  { %v2015_v9 = vadd.f32 %v2014_v27, %v2013_v49  ;;  %v2027_v6 = vrot.slane %v2026_v53, 2  ;;  %v1865_v7 = vrot.slane %v1864_v37, 1  ;;  %v1877_v3 = vadd.f32 %v1876_v43, %v1875_v61 }
 0x4e2   :  { %v2041_v18 = vadd.f32 %v2040_v26, %v2039_v23  ;;  %v2053_v33 = vrot.slane %v2052_v56, 2  ;;  %v1840_v38 = vadd.f32 %v1839_v50, %v1838_v28  ;;  %v1852_v10 = vrot.slane %v1851_v55, 1 }
 0x4e3   :  { %v2016_v35 = vrot.slane %v2015_v9, 1  ;;  %v2028_v31 = vadd.f32 %v2027_v6, %v2026_v53  ;;  %v1866_v2 = vadd.f32 %v1865_v7, %v1864_v37  ;;  %v1878_v63 = vrot.slane %v1877_v3, 1 }
 0x4e4   :  { %v2042_v20 = vrot.slane %v2041_v18, 1  ;;  %v2054_v62 = vadd.f32 %v2053_v33, %v2052_v56  ;;  %v5616_v1 = vpop.f32.mrb[20].mxu1  ;;  %v5618_v40 = vpop.f32.mrb[76].mxu0  ;;  %v5620_v58 = vmul.f32 0.015625, %v1840_v38  ;;  %v1853_v19 = vadd.f32 %v1852_v10, %v1851_v55 }
 0x4e5   :  { %7171 = vst [vmem:[#allocation38_spill] sm:$0xff] %v5616_v1  ;;  %7172 = vst [vmem:[#allocation39_spill] sm:$0xff] %v5618_v40  ;;  %v2017_v49 = vadd.f32 %v2016_v35, %v2015_v9  ;;  %v2029_v59 = vrot.slane %v2028_v31, 1  ;;  %v5622_v23 = vpop.f32.mrb[21].mxu1  ;;  %v5624_v61 = vpop.f32.mrb[77].mxu0  ;;  %v5626_v50 = vmul.f32 0.015625, %v1866_v2  ;;  %v1879_v28 = vadd.f32 %v1878_v63, %v1877_v3 }
 0x4e6   :  { %7173 = vst [vmem:[#allocation40_spill] sm:$0xff] %v5622_v23  ;;  %7174 = vst [vmem:[#allocation41_spill] sm:$0xff] %v5624_v61  ;;  %v2043_v53 = vadd.f32 %v2042_v20, %v2041_v18  ;;  %v2055_v27 = vrot.slane %v2054_v62, 1  ;;  %v5628_v52 = vpop.f32.mrb[22].mxu1  ;;  %v5630_v56 = vpop.f32.mrb[78].mxu0  ;;  %v2117_v37 = vmul.f32 %v5620_v58, %v5620_v58  ;;  %v5634_v26 = vmul.f32 0.015625, %v1853_v19 }
 0x4e7   :  { %7175 = vst [vmem:[#allocation42_spill] sm:$0xff] %v5628_v52  ;;  %7176 = vst [vmem:[#allocation43_spill] sm:$0xff] %v5630_v56  ;;  %v2109_v33 = vmul.f32 0.015625, %v2017_v49  ;;  %v2030_v10 = vadd.f32 %v2029_v59, %v2028_v31  ;;  %v5636_v43 = vpop.f32.mrb[23].mxu1  ;;  %v5638_v9 = vpop.f32.mrb[79].mxu0  ;;  %v2119_v18 = vmul.f32 %v5626_v50, %v5626_v50  ;;  %v5642_v63 = vmul.f32 0.015625, %v1879_v28 }
 0x4e8   :  { %7177 = vst [vmem:[#allocation44_spill] sm:$0xff] %v5636_v43  ;;  %7178 = vst [vmem:[#allocation45_spill] sm:$0xff] %v5638_v9  ;;  %v2111_v55 = vmul.f32 0.015625, %v2043_v53  ;;  %v2056_v20 = vadd.f32 %v2055_v27, %v2054_v62  ;;  %v2118_v7 = vmul.f32 %v5634_v26, %v5634_v26  ;;  %v1945_v38 = vmul.f32 %v5600_v14, %v5600_v14 }
 0x4e9   :  { %v2125_v3 = vsub.f32 %v2109_v33, %v2117_v37  ;;  %v2110_v6 = vmul.f32 0.015625, %v2030_v10  ;;  %v2120_v2 = vmul.f32 %v5642_v63, %v5642_v63  ;;  %v1947_v49 = vmul.f32 %v5602_v24, %v5602_v24 }
 0x4ea   :  { %v2127_v35 = vsub.f32 %v2111_v55, %v2119_v18  ;;  %v2112_v31 = vmul.f32 0.015625, %v2056_v20  ;;  %v1946_v62 = vmul.f32 %v5604_v29, %v5604_v29  ;;  %v1948_v53 = vmul.f32 %v5606_v45, %v5606_v45 }
 0x4eb   :  { %v2133_v19 = vadd.f32 1e-05, %v2125_v3  ;;  %v2126_v59 = vsub.f32 %v2110_v6, %v2118_v7  ;;  %v1880_v33 = vadd.f32 %v5608_v34, %v5600_v14  ;;  %v1953_v37 = vmul.f32 %v5608_v34, %v5608_v34 }
 0x4ec   :  { %v2135_v28 = vadd.f32 1e-05, %v2127_v35  ;;  %v2128_v27 = vsub.f32 %v2112_v31, %v2120_v2  ;;  %v5660_v10 = vpop.f32.mrb[24].mxu1  ;;  %v5662_v55 = vpop.f32.mrb[80].mxu0  ;;  %v1906_v20 = vadd.f32 %v5610_v25, %v5602_v24  ;;  %v1955_v3 = vmul.f32 %v5610_v25, %v5610_v25 }
 0x4ed   :  { %7179 = vst [vmem:[#allocation46_spill] sm:$0xff] %v5660_v10  ;;  %7180 = vst [vmem:[#allocation47_spill] sm:$0xff] %v5662_v55  ;;  %4330 = vrsqrt.f32 %v2133_v19  ;;  %v2134_v18 = vadd.f32 1e-05, %v2126_v59  ;;  %v5668_v6 = vpop.f32.mrb[25].mxu1  ;;  %v5670_v7 = vpop.f32.mrb[81].mxu0  ;;  %v2057_v31 = vadd.f32 %v1953_v37, %v1945_v38  ;;  %v1893_v2 = vadd.f32 %v5612_v57, %v5604_v29 }
 0x4ee   :  { %4332 = vrsqrt.f32 %v2135_v28  ;;  %v2136_v35 = vadd.f32 1e-05, %v2128_v27  ;;  %v5674_v34 = vpop.f32.mrb[26].mxu1  ;;  %v5676_v19 = vpop.f32.mrb[82].mxu0  ;;  %v2083_v59 = vadd.f32 %v1955_v3, %v1947_v49  ;;  %v1954_v24 = vmul.f32 %v5612_v57, %v5612_v57 }
 0x4ef   :  { %4334 = vrsqrt.f32 %v2134_v18  ;;  %v1919_v25 = vadd.f32 %v5614_v0, %v5606_v45  ;;  %v5682_v14 = vpop.f32.mrb[27].mxu1  ;;  %v5684_v28 = vpop.f32.mrb[83].mxu0  ;;  %v1956_v38 = vmul.f32 %v5614_v0, %v5614_v0  ;;  %v1881_v27 = vadd.f32 %v1880_v33, %v5616_v1 }
 0x4f0   :  { %7181 = vst [vmem:[#allocation48_spill] sm:$0xff] %v5684_v28  ;;  %4336 = vrsqrt.f32 %v2136_v35  ;;  %v1961_v37 = vmul.f32 %v5616_v1, %v5616_v1  ;;  %v2070_v49 = vadd.f32 %v1954_v24, %v1946_v62  ;;  %v1907_v18 = vadd.f32 %v1906_v20, %v5618_v40 }
 0x4f1   :  { %v1963_v3 = vmul.f32 %v5618_v40, %v5618_v40  ;;  %v1894_v45 = vadd.f32 %v1893_v2, %v5622_v23  ;;  %v2096_v57 = vadd.f32 %v1956_v38, %v1948_v53  ;;  %v1962_v35 = vmul.f32 %v5622_v23, %v5622_v23 }
 0x4f2   :  { %v2058_v29 = vadd.f32 %v2057_v31, %v1961_v37  ;;  %v1920_v0 = vadd.f32 %v1919_v25, %v5624_v61  ;;  %v1964_v33 = vmul.f32 %v5624_v61, %v5624_v61  ;;  %v1882_v24 = vadd.f32 %v1881_v27, %v5628_v52 }
 0x4f3   :  { %v2084_v28 = vadd.f32 %v2083_v59, %v1963_v3  ;;  %v1969_v62 = vmul.f32 %v5628_v52, %v5628_v52  ;;  %v2071_v20 = vadd.f32 %v2070_v49, %v1962_v35  ;;  %v1908_v40 = vadd.f32 %v1907_v18, %v5630_v56 }
 0x4f4   :  { %v1971_v53 = vmul.f32 %v5630_v56, %v5630_v56  ;;  %v1895_v31 = vadd.f32 %v1894_v45, %v5636_v43  ;;  %v5707_v2 = vpop.f32.mrb[28].mxu1  ;;  %v5709_v25 = vpop.f32.mrb[84].mxu0  ;;  %v2097_v59 = vadd.f32 %v2096_v57, %v1964_v33  ;;  %v1970_v27 = vmul.f32 %v5636_v43, %v5636_v43 }
 0x4f5   :  { %v2059_v38 = vadd.f32 %v2058_v29, %v1969_v62  ;;  %v1921_v37 = vadd.f32 %v1920_v0, %v5638_v9  ;;  %v5714_v3 = vpop.f32.mrb[29].mxu1  ;;  %v5716_v49 = vpop.f32.mrb[85].mxu0  ;;  %v1972_v35 = vmul.f32 %v5638_v9, %v5638_v9  ;;  %v1883_v45 = vadd.f32 %v1882_v24, %v5660_v10 }
 0x4f6   :  { %v2085_v18 = vadd.f32 %v2084_v28, %v1971_v53  ;;  %v1977_v61 = vmul.f32 %v5660_v10, %v5660_v10  ;;  %v5723_v57 = vpop.f32.mrb[30].mxu1  ;;  %v5725_v29 = vpop.f32.mrb[86].mxu0  ;;  %v2072_v62 = vadd.f32 %v2071_v20, %v1970_v27  ;;  %v1909_v0 = vadd.f32 %v1908_v40, %v5662_v55 }
 0x4f7   :  { %7182 = vst [vmem:[#allocation49_spill] sm:$0xff] %v5725_v29  ;;  %v4331_v33 = vpop.eup %4330  ;;  %v1979_v43 = vmul.f32 %v5662_v55, %v5662_v55  ;;  %v5731_v28 = vadd.f32 %v1895_v31, %v5668_v6  ;;  %v5733_v53 = vpop.f32.mrb[31].mxu1  ;;  %v7185_v23 = vrot.slane %v5494_v12, %v5497_v48  ;;  %v2098_v10 = vadd.f32 %v2097_v59, %v1972_v35 }
 0x4f8   :  { %7183 = vst [vmem:[#allocation50_spill] sm:$0xff] %v5733_v53  ;;  %v5735_v24 = vpop.f32.mrb[87].mxu0  ;;  %v4333_v9 = vpop.eup %4332  ;;  %v2060_v52 = vadd.f32 %v2059_v38, %v1977_v61  ;;  %v1978_v40 = vmul.f32 %v5668_v6, %v5668_v6  ;;  %v7186_v27 = vrot.slane %v5494_v12, %v5500_v22  ;;  %v1922_v1 = vadd.f32 %v1921_v37, %v5670_v7 }
 0x4f9   :  { %7184 = vst [vmem:[#allocation51_spill] sm:$0xff] %v5735_v24  ;;  %v2190_v56 = vmul.f32 %v4331_v33, %v7185_v23  ;;  %v4335_v20 = vpop.eup %4334  ;;  %v2086_v55 = vadd.f32 %v2085_v18, %v1979_v43  ;;  %v1980_v24 = vmul.f32 %v5670_v7, %v5670_v7  ;;  %v7187_v61 = vrot.slane %v5494_v12, %v5507_v8 }
 0x4fa   :  { %v2192_v31 = vmul.f32 %v4333_v9, %v7186_v27  ;;  %v4337_v53 = vpop.eup %4336  ;;  %v2073_v38 = vadd.f32 %v2072_v62, %v1978_v40  ;;  %v7188_v43 = vrot.slane %v5494_v12, %v5511_v44  ;;  %v7201_v27 = vld [vmem:[#allocation15_spill] sm:$0xff] }
 0x4fb   :  { %v2198_v29 = vmul.f32 %v2190_v56, %v5620_v58  ;;  %v2268_v23 = vrot.slane %v2190_v56, %v5497_v48  ;;  %v2191_v59 = vmul.f32 %v4335_v20, %v7187_v61  ;;  %v2099_v18 = vadd.f32 %v2098_v10, %v1980_v24 }
 0x4fc   :  { %v2200_v35 = vmul.f32 %v2192_v31, %v5626_v50  ;;  %v2276_v9 = vrot.slane %v2192_v31, %v5497_v48  ;;  %v2193_v37 = vmul.f32 %v4337_v53, %v7188_v43  ;;  %v1910_v24 = vadd.f32 %v1909_v0, %v5676_v19  ;;  %v7203_v31 = vld [vmem:[#allocation21_spill] sm:$0xff]  ;;  %v7205_v0 = vld [vmem:[#allocation23_spill] sm:$0xff] }
 0x4fd   :  { %v5759_v33 = vmul.f32 %v2268_v23, %v5404_v41  ;;  %v5762_v58 = vmul.f32 %v2268_v23, %v5420_v46  ;;  %v5765_v56 = vmul.f32 %v2268_v23, %v5444_v54  ;;  %v5768_v62 = vmul.f32 %v2268_v23, %v5468_v4 }
 0x4fe   :  { %v5771_v50 = vmul.f32 %v2268_v23, %v5502_v17  ;;  %v5774_v40 = vmul.f32 %v2268_v23, %v5529_v36  ;;  %v5777_v10 = vmul.f32 %v2268_v23, %v5553_v5  ;;  %v5780_v41 = vmul.f32 %v2268_v23, %v5580_v32 }
 0x4ff   :  { %7189 = vst [vmem:[#allocation52_spill] sm:$0xff] %v5768_v62  ;;  %v5783_v46 = vmul.f32 %v2276_v9, %v5406_v60  ;;  %v5786_v54 = vmul.f32 %v2276_v9, %v5422_v30  ;;  %v5789_v4 = vmul.f32 %v2276_v9, %v5446_v42  ;;  %v5792_v17 = vmul.f32 %v2276_v9, %v5470_v21 }
 0x500   :  { %7190 = vst [vmem:[#allocation53_spill] sm:$0xff] %v5771_v50  ;;  %7191 = vst [vmem:[#allocation54_spill] sm:$0xff] %v5774_v40  ;;  %v5795_v36 = vmul.f32 %v2276_v9, %v5504_v11  ;;  %v5798_v5 = vmul.f32 %v2276_v9, %v5531_v39  ;;  %v5801_v32 = vmul.f32 %v2276_v9, %v5555_v13 }
 0x501   :  { %7192 = vst [vmem:[#allocation55_spill] sm:$0xff] %v5777_v10  ;;  %7193 = vst [vmem:[#allocation56_spill] sm:$0xff] %v5780_v41  ;;  %v5804_v60 = vmul.f32 %v2276_v9, %v5582_v16  ;;  %v2199_v30 = vmul.f32 %v2191_v59, %v5634_v26  ;;  %v2272_v42 = vrot.slane %v2191_v59, %v5497_v48  ;;  %v7207_v59 = vld [vmem:[#allocation26_spill] sm:$0xff]  ;;  %v7226_v10 = vld [vmem:[#allocation48_spill] sm:$0xff] }
 0x502   :  { %7194 = vst [vmem:[#allocation57_spill] sm:$0xff] %v5789_v4  ;;  %7195 = vst [vmem:[#allocation58_spill] sm:$0xff] %v5792_v17  ;;  %v2201_v53 = vmul.f32 %v2193_v37, %v5642_v63  ;;  %v2280_v21 = vrot.slane %v2193_v37, %v5497_v48  ;;  %v1884_v11 = vadd.f32 %v1883_v45, %v5674_v34  ;;  %v7212_v37 = vld [vmem:[#allocation11_spill] sm:$0xff] }
 0x503   :  { %7196 = vst [vmem:[#allocation59_spill] sm:$0xff] %v5795_v36  ;;  %7197 = vst [vmem:[#allocation60_spill] sm:$0xff] %v5798_v5  ;;  %v1985_v39 = vmul.f32 %v5674_v34, %v5674_v34  ;;  %v1987_v13 = vmul.f32 %v5676_v19, %v5676_v19  ;;  %v2214_v16 = vcombine.low %v2198_v29, %v2199_v30  ;;  %v7228_v5 = vld [vmem:[#allocation50_spill] sm:$0xff] }
 0x504   :  { %7198 = vst [vmem:[#allocation61_spill] sm:$0xff] %v5801_v32  ;;  %7199 = vst [vmem:[#allocation62_spill] sm:$0xff] %v5804_v60  ;;  %v5817_v20 = vmul.f32 %v2272_v42, %v5408_v51  ;;  %v5820_v26 = vmul.f32 %v2272_v42, %v5432_v15  ;;  %v5823_v63 = vmul.f32 %v2272_v42, %v5458_v47  ;;  %v7209_v51 = vld [vmem:[#allocation25_spill] sm:$0xff]  ;;  %v7210_v15 = vld [vmem:[#allocation28_spill] sm:$0xff] }
 0x505   :  { %v5826_v45 = vmul.f32 %v2272_v42, %v7201_v27  ;;  %v5829_v23 = vmul.f32 %v2272_v42, %v7203_v31  ;;  %v5832_v61 = vmul.f32 %v2272_v42, %v7205_v0  ;;  %v5835_v29 = vmul.f32 %v2272_v42, %v7207_v59  ;;  %v7213_v27 = vld [vmem:[#allocation12_spill] sm:$0xff]  ;;  %v7214_v31 = vld [vmem:[#allocation13_spill] sm:$0xff]  ;;  %v7218_v59 = vld [vmem:[#allocation22_spill] sm:$0xff] }
 0x506   :  { %7200 = vst [vmem:[#allocation63_spill] sm:$0xff] %v5823_v63  ;;  %v5838_v9 = vrot.slane %v2214_v16, %v7209_v51  ;;  %v5841_v43 = vmul.f32 %v2272_v42, %v7210_v15  ;;  %v2215_v47 = vcombine.low %v2200_v35, %v2201_v53  ;;  %v5844_v30 = vmul.f32 %v2280_v21, %v7212_v37  ;;  %v7216_v0 = vld [vmem:[#allocation16_spill] sm:$0xff]  ;;  %v7222_v53 = vld [vmem:[#allocation27_spill] sm:$0xff]  ;;  %v7224_v37 = vld [vmem:[#allocation29_spill] sm:$0xff] }
 0x507   :  { %7202 = vst [vmem:[#allocation15_spill] sm:$0xff] %v5826_v45  ;;  %7204 = vst [vmem:[#allocation21_spill] sm:$0xff] %v5829_v23  ;;  %v5847_v60 = vmul.f32 %v2280_v21, %v7213_v27  ;;  %v5850_v41 = vmul.f32 %v2280_v21, %v7214_v31  ;;  %v5853_v32 = vmul.f32 %v2280_v21, %v7216_v0  ;;  %v7220_v42 = vld [vmem:[#allocation24_spill] sm:$0xff] }
 0x508   :  { %7206 = vst [vmem:[#allocation23_spill] sm:$0xff] %v5832_v61  ;;  %7208 = vst [vmem:[#allocation26_spill] sm:$0xff] %v5835_v29  ;;  %v5856_v29 = vmul.f32 %v2280_v21, %v7218_v59  ;;  %v5859_v16 = vrot.slane %v2215_v47, %v7209_v51  ;;  %v5862_v35 = vmul.f32 %v2280_v21, %v7220_v42 }
 0x509   :  { %7211 = vst [vmem:[#allocation28_spill] sm:$0xff] %v5841_v43  ;;  %7215 = vst [vmem:[#allocation11_spill] sm:$0xff] %v5850_v41  ;;  %v5865_v15 = vmul.f32 %v2280_v21, %v7222_v53  ;;  %v5868_v27 = vmul.f32 %v2280_v21, %v7224_v37  ;;  %v2061_v31 = vadd.f32 %v2060_v52, %v1985_v39 }
 0x50a   :  { %7217 = vst [vmem:[#allocation12_spill] sm:$0xff] %v5853_v32  ;;  %7219 = vst [vmem:[#allocation13_spill] sm:$0xff] %v5856_v29  ;;  %v2087_v43 = vadd.f32 %v2086_v55, %v1987_v13  ;;  %v1897_v0 = vadd.f32 %v5731_v28, %v5682_v14  ;;  %v1986_v59 = vmul.f32 %v5682_v14, %v5682_v14 }
 0x50b   :  { %7221 = vst [vmem:[#allocation16_spill] sm:$0xff] %v5862_v35  ;;  %7223 = vst [vmem:[#allocation22_spill] sm:$0xff] %v5865_v15  ;;  %v1923_v42 = vadd.f32 %v1922_v1, %v7226_v10  ;;  %v1988_v53 = vmul.f32 %v7226_v10, %v7226_v10  ;;  %v1885_v15 = vadd.f32 %v1884_v11, %v5707_v2  ;;  %v7227_v35 = vld [vmem:[#allocation49_spill] sm:$0xff] }
 0x50c   :  { %7225 = vst [vmem:[#allocation24_spill] sm:$0xff] %v5868_v27  ;;  %v2074_v21 = vadd.f32 %v2073_v38, %v1986_v59  ;;  %v1993_v52 = vmul.f32 %v5707_v2, %v5707_v2  ;;  %v1911_v55 = vadd.f32 %v1910_v24, %v5709_v25  ;;  %v1995_v28 = vmul.f32 %v5709_v25, %v5709_v25 }
 0x50d   :  { %v2100_v39 = vadd.f32 %v2099_v18, %v1988_v53  ;;  %v1898_v13 = vadd.f32 %v1897_v0, %v5714_v3  ;;  %v1994_v1 = vmul.f32 %v5714_v3, %v5714_v3  ;;  %v1924_v27 = vadd.f32 %v1923_v42, %v5716_v49 }
 0x50e   :  { %v2062_v37 = vadd.f32 %v2061_v31, %v1993_v52  ;;  %v2088_v47 = vadd.f32 %v2087_v43, %v1995_v28  ;;  %v1996_v38 = vmul.f32 %v5716_v49, %v5716_v49  ;;  %v1886_v59 = vadd.f32 %v1885_v15, %v5723_v57 }
 0x50f   :  { %v2075_v11 = vadd.f32 %v2074_v21, %v1994_v1  ;;  %v2001_v24 = vmul.f32 %v5723_v57, %v5723_v57  ;;  %v1912_v18 = vadd.f32 %v1911_v55, %v7227_v35  ;;  %v2003_v0 = vmul.f32 %v7227_v35, %v7227_v35  ;;  %v7229_v21 = vld [vmem:[#allocation51_spill] sm:$0xff] }
 0x510   :  { %v2101_v53 = vadd.f32 %v2100_v39, %v1996_v38  ;;  %v1899_v31 = vadd.f32 %v1898_v13, %v7228_v5  ;;  %v2002_v43 = vmul.f32 %v7228_v5, %v7228_v5  ;;  %v1887_v42 = vrot.slane %v1886_v59, 4 }
 0x511   :  { %v2063_v52 = vadd.f32 %v2062_v37, %v2001_v24  ;;  %v1913_v28 = vrot.slane %v1912_v18, 4  ;;  %v1925_v1 = vadd.f32 %v1924_v27, %v7229_v21  ;;  %v2089_v15 = vadd.f32 %v2088_v47, %v2003_v0 }
 0x512   :  { %v1900_v61 = vrot.slane %v1899_v31, 4  ;;  %v2076_v40 = vadd.f32 %v2075_v11, %v2002_v43  ;;  %v2004_v55 = vmul.f32 %v7229_v21, %v7229_v21  ;;  %v1888_v39 = vadd.f32 %v1887_v42, %v1886_v59 }
 0x513   :  { %v2064_v38 = vrot.slane %v2063_v52, 4  ;;  %v1914_v29 = vadd.f32 %v1913_v28, %v1912_v18  ;;  %v1926_v36 = vrot.slane %v1925_v1, 4  ;;  %v2090_v23 = vrot.slane %v2089_v15, 4 }
 0x514   :  { %v1901_v13 = vadd.f32 %v1900_v61, %v1899_v31  ;;  %v2077_v50 = vrot.slane %v2076_v40, 4  ;;  %v2102_v32 = vadd.f32 %v2101_v53, %v2004_v55  ;;  %v1889_v17 = vrot.slane %v1888_v39, 2 }
 0x515   :  { %v2065_v45 = vadd.f32 %v2064_v38, %v2063_v52  ;;  %v1915_v37 = vrot.slane %v1914_v29, 2  ;;  %v1927_v24 = vadd.f32 %v1926_v36, %v1925_v1  ;;  %v2091_v62 = vadd.f32 %v2090_v23, %v2089_v15 }
 0x516   :  { %v1902_v27 = vrot.slane %v1901_v13, 2  ;;  %v2078_v47 = vadd.f32 %v2077_v50, %v2076_v40  ;;  %v2103_v0 = vrot.slane %v2102_v32, 4  ;;  %v1890_v11 = vadd.f32 %v1889_v17, %v1888_v39 }
 0x517   :  { %v2066_v43 = vrot.slane %v2065_v45, 2  ;;  %v1916_v41 = vadd.f32 %v1915_v37, %v1914_v29  ;;  %v1928_v4 = vrot.slane %v1927_v24, 2  ;;  %v2092_v59 = vrot.slane %v2091_v62, 2 }
 0x518   :  { %v1903_v42 = vadd.f32 %v1902_v27, %v1901_v13  ;;  %v2079_v18 = vrot.slane %v2078_v47, 2  ;;  %v2104_v28 = vadd.f32 %v2103_v0, %v2102_v32  ;;  %v1891_v63 = vrot.slane %v1890_v11, 1 }
 0x519   :  { %v2067_v61 = vadd.f32 %v2066_v43, %v2065_v45  ;;  %v1917_v31 = vrot.slane %v1916_v41, 1  ;;  %v1929_v53 = vadd.f32 %v1928_v4, %v1927_v24  ;;  %v2093_v55 = vadd.f32 %v2092_v59, %v2091_v62 }
 0x51a   :  { %v1904_v52 = vrot.slane %v1903_v42, 1  ;;  %v2080_v38 = vadd.f32 %v2079_v18, %v2078_v47  ;;  %v2105_v36 = vrot.slane %v2104_v28, 2  ;;  %v1892_v23 = vadd.f32 %v1891_v63, %v1890_v11 }
 0x51b   :  { %v2068_v1 = vrot.slane %v2067_v61, 1  ;;  %v1918_v50 = vadd.f32 %v1917_v31, %v1916_v41  ;;  %v1930_v40 = vrot.slane %v1929_v53, 1  ;;  %v2094_v17 = vrot.slane %v2093_v55, 1 }
 0x51c   :  { %v1905_v15 = vadd.f32 %v1904_v52, %v1903_v42  ;;  %v2081_v29 = vrot.slane %v2080_v38, 1  ;;  %v2106_v39 = vadd.f32 %v2105_v36, %v2104_v28  ;;  %v1937_v37 = vmul.f32 0.015625, %v1892_v23 }
 0x51d   :  { %v2069_v13 = vadd.f32 %v2068_v1, %v2067_v61  ;;  %v1939_v27 = vmul.f32 0.015625, %v1918_v50  ;;  %v1931_v32 = vadd.f32 %v1930_v40, %v1929_v53  ;;  %v2095_v0 = vadd.f32 %v2094_v17, %v2093_v55  ;;  %v7230_v1 = vld [vmem:[#allocation14_spill] sm:$0xff] }
 0x51e   :  { %v1938_v45 = vmul.f32 0.015625, %v1905_v15  ;;  %v2082_v43 = vadd.f32 %v2081_v29, %v2080_v38  ;;  %v2107_v4 = vrot.slane %v2106_v39, 1  ;;  %v2121_v24 = vmul.f32 %v1937_v37, %v1937_v37 }
 0x51f   :  { %v2113_v62 = vmul.f32 0.015625, %v2069_v13  ;;  %v2123_v47 = vmul.f32 %v1939_v27, %v1939_v27  ;;  %v1940_v59 = vmul.f32 0.015625, %v1931_v32  ;;  %v2115_v63 = vmul.f32 0.015625, %v2095_v0 }
 0x520   :  { %v2114_v11 = vmul.f32 0.015625, %v2082_v43  ;;  %v2122_v41 = vmul.f32 %v1938_v45, %v1938_v45  ;;  %v2108_v18 = vadd.f32 %v2107_v4, %v2106_v39  ;;  %v7001_v50 = vsub.s32 4, %v7230_v1 }
 0x521   :  { %v2129_v31 = vsub.f32 %v2113_v62, %v2121_v24  ;;  %v2124_v42 = vmul.f32 %v1940_v59, %v1940_v59  ;;  %v2131_v52 = vsub.f32 %v2115_v63, %v2123_v47  ;;  %v6999_v40 = vsub.s32 6, %v7230_v1 }
 0x522   :  { %v2130_v28 = vsub.f32 %v2114_v11, %v2122_v41  ;;  %v2116_v36 = vmul.f32 0.015625, %v2108_v18  ;;  %v7000_v17 = vsub.s32 5, %v7230_v1  ;;  %v6998_v15 = vsub.s32 7, %v7230_v1 }
 0x523   :  { %v2137_v61 = vadd.f32 1e-05, %v2129_v31  ;;  %v2139_v23 = vadd.f32 1e-05, %v2131_v52  ;;  %v2169_v29 = vrot.slane %v5494_v12, %v7001_v50  ;;  %v2177_v39 = vrot.slane %v5494_v12, %v6999_v40  ;;  %v7231_v52 = vld [vmem:[#allocation30_spill] sm:$0xff]  ;;  %v7244_v40 = vld [vmem:[#allocation44_spill] sm:$0xff] }
 0x524   :  { %v2138_v53 = vadd.f32 1e-05, %v2130_v28  ;;  %v2132_v55 = vsub.f32 %v2116_v36, %v2124_v42  ;;  %v2173_v32 = vrot.slane %v5494_v12, %v7000_v17  ;;  %v2181_v0 = vrot.slane %v5494_v12, %v6998_v15  ;;  %v7232_v36 = vld [vmem:[#allocation34_spill] sm:$0xff]  ;;  %v7243_v15 = vld [vmem:[#allocation40_spill] sm:$0xff] }
 0x525   :  { %4338 = vrsqrt.f32 %v2137_v61 }
 0x526   :  { %4340 = vrsqrt.f32 %v2139_v23  ;;  %v2140_v38 = vadd.f32 1e-05, %v2132_v55  ;;  %v7233_v23 = vld [vmem:[#allocation38_spill] sm:$0xff] }
 0x527   :  { %4342 = vrsqrt.f32 %v2138_v53  ;;  %v7234_v53 = vld [vmem:[#allocation42_spill] sm:$0xff] }
 0x528   :  { %4344 = vrsqrt.f32 %v2140_v38  ;;  %v7235_v38 = vld [vmem:[#allocation46_spill] sm:$0xff] }
 0x52f   :  { %v4339_v13 = vpop.eup %4338 }
 0x530   :  { %v4341_v43 = vpop.eup %4340  ;;  %v2194_v4 = vmul.f32 %v4339_v13, %v2169_v29  ;;  %v7236_v13 = vld [vmem:[#allocation31_spill] sm:$0xff] }
 0x531   :  { %v4343_v62 = vpop.eup %4342  ;;  %v2196_v24 = vmul.f32 %v4341_v43, %v2177_v39 }
 0x532   :  { %v4345_v47 = vpop.eup %4344  ;;  %v2202_v63 = vmul.f32 %v2194_v4, %v1937_v37  ;;  %v2284_v11 = vrot.slane %v2194_v4, %v5497_v48  ;;  %v2195_v31 = vmul.f32 %v4343_v62, %v2173_v32  ;;  %v7238_v4 = vld [vmem:[#allocation39_spill] sm:$0xff] }
 0x533   :  { %v2204_v41 = vmul.f32 %v2196_v24, %v1939_v27  ;;  %v2292_v18 = vrot.slane %v2196_v24, %v5497_v48  ;;  %v2197_v42 = vmul.f32 %v4345_v47, %v2181_v0  ;;  %v7237_v0 = vld [vmem:[#allocation35_spill] sm:$0xff] }
 0x534   :  { %v2301_v28 = vmul.f32 %v2284_v11, %v7231_v52  ;;  %v5923_v61 = vmul.f32 %v2284_v11, %v7232_v36  ;;  %v5926_v12 = vmul.f32 %v2284_v11, %v7233_v23  ;;  %v5929_v55 = vmul.f32 %v2284_v11, %v7234_v53  ;;  %v7239_v24 = vld [vmem:[#allocation43_spill] sm:$0xff] }
 0x535   :  { %v5932_v37 = vmul.f32 %v2284_v11, %v7235_v38  ;;  %v5935_v27 = vmul.f32 %v2284_v11, %v5674_v34  ;;  %v5938_v29 = vmul.f32 %v2284_v11, %v5707_v2  ;;  %v5941_v39 = vmul.f32 %v2284_v11, %v5723_v57  ;;  %v7240_v52 = vld [vmem:[#allocation47_spill] sm:$0xff] }
 0x536   :  { %v2303_v32 = vmul.f32 %v2292_v18, %v7236_v13  ;;  %v2311_v43 = vmul.f32 %v2292_v18, %v7237_v0  ;;  %v5946_v62 = vmul.f32 %v2292_v18, %v7238_v4  ;;  %v5949_v47 = vmul.f32 %v2292_v18, %v7239_v24  ;;  %v7241_v0 = vld [vmem:[#allocation32_spill] sm:$0xff] }
 0x537   :  { %v5952_v36 = vmul.f32 %v2292_v18, %v7240_v52  ;;  %v5955_v34 = vmul.f32 %v2292_v18, %v5676_v19  ;;  %v5958_v2 = vmul.f32 %v2292_v18, %v5709_v25  ;;  %v5961_v57 = vmul.f32 %v2292_v18, %v7227_v35  ;;  %v7242_v24 = vld [vmem:[#allocation36_spill] sm:$0xff] }
 0x538   :  { %v2203_v11 = vmul.f32 %v2195_v31, %v1938_v45  ;;  %v2288_v23 = vrot.slane %v2195_v31, %v5497_v48  ;;  %v2205_v53 = vmul.f32 %v2197_v42, %v1940_v59  ;;  %v2296_v38 = vrot.slane %v2197_v42, %v5497_v48  ;;  %v7245_v31 = vld [vmem:[#allocation33_spill] sm:$0xff] }
 0x53a   :  { %v2216_v13 = vcombine.low %v2202_v63, %v2203_v11  ;;  %v2302_v4 = vmul.f32 %v2288_v23, %v7241_v0  ;;  %v2310_v52 = vmul.f32 %v2288_v23, %v7242_v24  ;;  %v2318_v19 = vmul.f32 %v2288_v23, %v7243_v15  ;;  %v7246_v15 = vld [vmem:[#allocation37_spill] sm:$0xff] }
 0x53b   :  { %v2326_v17 = vmul.f32 %v2288_v23, %v7244_v40  ;;  %v5970_v25 = vmul.f32 %v2288_v23, %v5668_v6  ;;  %v5973_v35 = vmul.f32 %v2288_v23, %v5682_v14  ;;  %v5976_v45 = vmul.f32 %v2288_v23, %v5714_v3  ;;  %v7247_v40 = vld [vmem:[#allocation41_spill] sm:$0xff] }
 0x53c   :  { %v2238_v59 = vrot.slane %v2216_v13, %v7209_v51  ;;  %v5980_v63 = vmul.f32 %v2288_v23, %v7228_v5  ;;  %v2217_v18 = vcombine.low %v2204_v41, %v2205_v53  ;;  %v2304_v42 = vmul.f32 %v2296_v38, %v7245_v31  ;;  %v7248_v6 = vld [vmem:[#allocation45_spill] sm:$0xff] }
 0x53d   :  { %v2312_v11 = vmul.f32 %v2296_v38, %v7246_v15  ;;  %v2320_v0 = vmul.f32 %v2296_v38, %v7247_v40  ;;  %v2328_v24 = vmul.f32 %v2296_v38, %v7248_v6  ;;  %v2336_v14 = vmul.f32 %v2296_v38, %v5670_v7  ;;  %v4110_v41 = vld [vmem:[%s6945_s4 + $0x5] ss:$8 sm:$0xf] }
 0x53e   :  { %v2245_v50 = vrot.slane %v2217_v18, %v7209_v51  ;;  %v5989_v3 = vmul.f32 %v2296_v38, %v7226_v10  ;;  %v5992_v13 = vmul.f32 %v2296_v38, %v5716_v49  ;;  %v5995_v5 = vmul.f32 %v2296_v38, %v7229_v21  ;;  %v4111_v23 = vld [vmem:[%s6945_s4 + $0x5] ss:$8 sm:$0xf0] }
 0x53f   :  { %v7249_v10 = vcombine.low %v5838_v9, %v5859_v16  ;;  %v1827_v18 = vor.u32 %v4111_v23, %v4110_v41  ;;  %v7250_v9 = vsub.s32 4, %v7230_v1  ;;  %v7252_v41 = vsub.s32 6, %v7230_v1 }
 0x540   :  { %v2247_v7 = vcombine.low %v2238_v59, %v2245_v50  ;;  %v7251_v59 = vsub.s32 5, %v7230_v1 }
 0x541   :  { %v2254_v53 = vrot.slane %v7249_v10, %v7209_v51 }
 0x542   :  { %v2261_v49 = vrot.slane %v2247_v7, %v7209_v51  ;;  %v7253_v7 = vsub.s32 7, %v7230_v1 }
 0x544   :  { %v2262_v31 = vcombine.low %v2254_v53, %v2261_v49 }
 0x546   :  { %v2264_v21 = vsub.f32 %v1827_v18, %v2262_v31 }
 0x548   :  { %v6009_v38 = vrot.slane %v2264_v21, %v5497_v48  ;;  %v6012_v15 = vrot.slane %v2264_v21, %v5507_v8  ;;  %v6015_v40 = vrot.slane %v2264_v21, %v5500_v22  ;;  %v6018_v50 = vrot.slane %v2264_v21, %v5511_v44 }
 0x549   :  { %v6022_v16 = vrot.slane %v2264_v21, %v7250_v9  ;;  %v6026_v6 = vrot.slane %v2264_v21, %v7251_v59  ;;  %v6030_v23 = vrot.slane %v2264_v21, %v7252_v41  ;;  %v6034_v10 = vrot.slane %v2264_v21, %v7253_v7  ;;  %v7270_v9 = vld [vmem:[#allocation63_spill] sm:$0xff]  ;;  %v7272_v59 = vld [vmem:[#allocation57_spill] sm:$0xff] }
 0x54a   :  { %v6038_v53 = vadd.f32 %v6009_v38, %v5759_v33  ;;  %v6042_v18 = vadd.f32 %v6012_v15, %v5817_v20  ;;  %v6046_v49 = vadd.f32 %v6015_v40, %v5783_v46  ;;  %v6050_v31 = vadd.f32 %v6018_v50, %v5844_v30 }
 0x54b   :  { %v6053_v1 = vadd.f32 %v6022_v16, %v2301_v28  ;;  %v6056_v21 = vadd.f32 %v6026_v6, %v2302_v4  ;;  %v6059_v33 = vadd.f32 %v6030_v23, %v2303_v32  ;;  %v6062_v20 = vadd.f32 %v6034_v10, %v2304_v42 }
 0x54c   :  { %7254 = vst [vmem:[#allocation27_spill] sm:$0xff] %v6038_v53  ;;  %7255 = vst [vmem:[#allocation29_spill] sm:$0xff] %v6042_v18  ;;  %v6066_v46 = vadd.f32 %v6009_v38, %v5762_v58  ;;  %v6070_v30 = vadd.f32 %v6012_v15, %v5820_v26  ;;  %v6074_v28 = vadd.f32 %v6015_v40, %v5786_v54 }
 0x54d   :  { %7256 = vst [vmem:[#allocation48_spill] sm:$0xff] %v6046_v49  ;;  %7257 = vst [vmem:[#allocation49_spill] sm:$0xff] %v6050_v31  ;;  %v6078_v4 = vadd.f32 %v6018_v50, %v5847_v60  ;;  %v6082_v32 = vadd.f32 %v6022_v16, %v5923_v61  ;;  %v6085_v42 = vadd.f32 %v6026_v6, %v2310_v52  ;;  %v7273_v52 = vld [vmem:[#allocation11_spill] sm:$0xff] }
 0x54e   :  { %7258 = vst [vmem:[#allocation50_spill] sm:$0xff] %v6053_v1  ;;  %7259 = vst [vmem:[#allocation51_spill] sm:$0xff] %v6056_v21  ;;  %v6088_v58 = vadd.f32 %v6030_v23, %v2311_v43  ;;  %v6091_v26 = vadd.f32 %v6034_v10, %v2312_v11  ;;  %v6095_v54 = vadd.f32 %v6009_v38, %v5765_v56 }
 0x54f   :  { %7260 = vst [vmem:[#allocation14_spill] sm:$0xff] %v6059_v33  ;;  %7261 = vst [vmem:[#allocation30_spill] sm:$0xff] %v6062_v20  ;;  %v6099_v60 = vadd.f32 %v6012_v15, %v7270_v9  ;;  %v6103_v61 = vadd.f32 %v6015_v40, %v7272_v59  ;;  %v6107_v41 = vadd.f32 %v6018_v50, %v7273_v52  ;;  %v7277_v9 = vld [vmem:[#allocation52_spill] sm:$0xff]  ;;  %v7278_v52 = vld [vmem:[#allocation15_spill] sm:$0xff] }
 0x550   :  { %7262 = vst [vmem:[#allocation34_spill] sm:$0xff] %v6066_v46  ;;  %7263 = vst [vmem:[#allocation38_spill] sm:$0xff] %v6070_v30  ;;  %v6111_v43 = vadd.f32 %v6022_v16, %v5926_v12  ;;  %v6114_v11 = vadd.f32 %v6026_v6, %v2318_v19  ;;  %v6118_v56 = vadd.f32 %v6030_v23, %v5946_v62  ;;  %v7279_v12 = vld [vmem:[#allocation58_spill] sm:$0xff]  ;;  %v7281_v19 = vld [vmem:[#allocation12_spill] sm:$0xff] }
 0x551   :  { %7264 = vst [vmem:[#allocation42_spill] sm:$0xff] %v6074_v28  ;;  %7265 = vst [vmem:[#allocation46_spill] sm:$0xff] %v6078_v4  ;;  %v6121_v7 = vadd.f32 %v6034_v10, %v2320_v0  ;;  %v6125_v59 = vadd.f32 %v6009_v38, %v7277_v9  ;;  %v6129_v51 = vadd.f32 %v6012_v15, %v7278_v52 }
 0x552   :  { %7266 = vst [vmem:[#allocation31_spill] sm:$0xff] %v6082_v32  ;;  %7267 = vst [vmem:[#allocation35_spill] sm:$0xff] %v6085_v42  ;;  %v6133_v44 = vadd.f32 %v6015_v40, %v7279_v12  ;;  %v6137_v8 = vadd.f32 %v6018_v50, %v7281_v19  ;;  %v6141_v62 = vadd.f32 %v6022_v16, %v5929_v55  ;;  %v7285_v12 = vld [vmem:[#allocation53_spill] sm:$0xff]  ;;  %v7288_v55 = vld [vmem:[#allocation59_spill] sm:$0xff] }
 0x553   :  { %7268 = vst [vmem:[#allocation39_spill] sm:$0xff] %v6088_v58  ;;  %7269 = vst [vmem:[#allocation43_spill] sm:$0xff] %v6091_v26  ;;  %v6144_v0 = vadd.f32 %v6026_v6, %v2326_v17  ;;  %v6148_v9 = vadd.f32 %v6030_v23, %v5949_v47  ;;  %v6151_v52 = vadd.f32 %v6034_v10, %v2328_v24  ;;  %v7287_v19 = vld [vmem:[#allocation21_spill] sm:$0xff] }
 0x554   :  { %7271 = vst [vmem:[#allocation47_spill] sm:$0xff] %v6099_v60  ;;  %7274 = vst [vmem:[#allocation32_spill] sm:$0xff] %v6111_v43  ;;  %v6155_v22 = vadd.f32 %v6009_v38, %v7285_v12  ;;  %v6159_v48 = vadd.f32 %v6012_v15, %v7287_v19  ;;  %v7290_v17 = vld [vmem:[#allocation13_spill] sm:$0xff]  ;;  %v6171_v47 = vadd.f32 %v6022_v16, %v5932_v37  ;;  %v7300_v37 = vld [vmem:[#allocation60_spill] sm:$0xff] }
 0x555   :  { %7275 = vst [vmem:[#allocation36_spill] sm:$0xff] %v6118_v56  ;;  %7276 = vst [vmem:[#allocation40_spill] sm:$0xff] %v6121_v7  ;;  %v6175_v24 = vadd.f32 %v6026_v6, %v5970_v25  ;;  %v6179_v12 = vadd.f32 %v6030_v23, %v5952_v36  ;;  %v6182_v19 = vadd.f32 %v6034_v10, %v2336_v14  ;;  %v7301_v25 = vld [vmem:[#allocation16_spill] sm:$0xff] }
 0x556   :  { %7280 = vst [vmem:[#allocation44_spill] sm:$0xff] %v6133_v44  ;;  %7282 = vst [vmem:[#allocation33_spill] sm:$0xff] %v6141_v62  ;;  %v6163_v62 = vadd.f32 %v6015_v40, %v7288_v55  ;;  %v7296_v55 = vld [vmem:[#allocation54_spill] sm:$0xff]  ;;  %v6202_v36 = vadd.f32 %v6022_v16, %v5935_v27  ;;  %v6206_v14 = vadd.f32 %v6026_v6, %v5973_v35 }
 0x557   :  { %7283 = vst [vmem:[#allocation37_spill] sm:$0xff] %v6144_v0  ;;  %7284 = vst [vmem:[#allocation41_spill] sm:$0xff] %v6151_v52  ;;  %v6167_v0 = vadd.f32 %v6018_v50, %v7290_v17  ;;  %v7298_v17 = vld [vmem:[#allocation23_spill] sm:$0xff] }
 0x558   :  { %7286 = vst [vmem:[#allocation45_spill] sm:$0xff] %v6155_v22  ;;  %7289 = vst [vmem:[#allocation63_spill] sm:$0xff] %v6163_v62  ;;  %v6186_v62 = vadd.f32 %v6009_v38, %v7296_v55  ;;  %v6210_v55 = vadd.f32 %v6030_v23, %v5955_v34 }
 0x559   :  { %7291 = vst [vmem:[#allocation57_spill] sm:$0xff] %v6167_v0  ;;  %7292 = vst [vmem:[#allocation11_spill] sm:$0xff] %v6171_v47  ;;  %v6190_v0 = vadd.f32 %v6012_v15, %v7298_v17  ;;  %v6194_v47 = vadd.f32 %v6015_v40, %v7300_v37  ;;  %v6214_v17 = vadd.f32 %v6034_v10, %v5989_v3  ;;  %v7307_v37 = vld [vmem:[#allocation55_spill] sm:$0xff] }
 0x55a   :  { %7293 = vst [vmem:[#allocation52_spill] sm:$0xff] %v6175_v24  ;;  %7294 = vst [vmem:[#allocation15_spill] sm:$0xff] %v6179_v12  ;;  %v6198_v24 = vadd.f32 %v6018_v50, %v7301_v25  ;;  %v6218_v25 = vadd.f32 %v6009_v38, %v7307_v37  ;;  %v6234_v3 = vadd.f32 %v6022_v16, %v5938_v29 }
 0x55b   :  { %7295 = vst [vmem:[#allocation58_spill] sm:$0xff] %v6182_v19  ;;  %7297 = vst [vmem:[#allocation12_spill] sm:$0xff] %v6186_v62  ;;  %v6238_v37 = vadd.f32 %v6026_v6, %v5976_v45 }
 0x55c   :  { %7299 = vst [vmem:[#allocation53_spill] sm:$0xff] %v6190_v0  ;;  %7302 = vst [vmem:[#allocation21_spill] sm:$0xff] %v6198_v24  ;;  %v7309_v24 = vld [vmem:[#allocation26_spill] sm:$0xff] }
 0x55d   :  { %7303 = vst [vmem:[#allocation59_spill] sm:$0xff] %v6202_v36  ;;  %7304 = vst [vmem:[#allocation13_spill] sm:$0xff] %v6206_v14  ;;  %v6222_v27 = vadd.f32 %v6012_v15, %v7309_v24  ;;  %v7311_v36 = vld [vmem:[#allocation61_spill] sm:$0xff]  ;;  %v7313_v14 = vld [vmem:[#allocation22_spill] sm:$0xff]  ;;  %v6242_v24 = vadd.f32 %v6030_v23, %v5958_v2 }
 0x55e   :  { %7305 = vst [vmem:[#allocation54_spill] sm:$0xff] %v6210_v55  ;;  %7306 = vst [vmem:[#allocation23_spill] sm:$0xff] %v6214_v17  ;;  %v6226_v35 = vadd.f32 %v6015_v40, %v7311_v36  ;;  %v6230_v34 = vadd.f32 %v6018_v50, %v7313_v14  ;;  %v6246_v36 = vadd.f32 %v6034_v10, %v5992_v13 }
 0x55f   :  { %7308 = vst [vmem:[#allocation60_spill] sm:$0xff] %v6218_v25  ;;  %7310 = vst [vmem:[#allocation16_spill] sm:$0xff] %v6222_v27  ;;  %v6266_v13 = vadd.f32 %v6022_v16, %v5941_v39  ;;  %v6287_v39 = vmul.f32 0.2, %v6046_v49  ;;  %v6293_v16 = vmul.f32 0.2, %v6053_v1 }
 0x560   :  { %7312 = vst [vmem:[#allocation55_spill] sm:$0xff] %v6226_v35  ;;  %7314 = vst [vmem:[#allocation26_spill] sm:$0xff] %v6230_v34  ;;  %v7319_v35 = vld [vmem:[#allocation56_spill] sm:$0xff]  ;;  %v6354_v49 = vmul.f32 0.2, %v6114_v11 }
 0x561   :  { %7315 = vst [vmem:[#allocation61_spill] sm:$0xff] %v6234_v3  ;;  %7316 = vst [vmem:[#allocation22_spill] sm:$0xff] %v6238_v37  ;;  %v6250_v14 = vadd.f32 %v6009_v38, %v7319_v35  ;;  %v7321_v34 = vld [vmem:[#allocation28_spill] sm:$0xff]  ;;  %v7323_v3 = vld [vmem:[#allocation62_spill] sm:$0xff]  ;;  %v6270_v38 = vadd.f32 %v6026_v6, %v5980_v63  ;;  %v6281_v35 = vmul.f32 0.2, %v6038_v53 }
 0x562   :  { %7317 = vst [vmem:[#allocation64_spill] sm:$0xff] %v6242_v24  ;;  %7318 = vst [vmem:[#allocation65_spill] sm:$0xff] %v6246_v36  ;;  %v6254_v29 = vadd.f32 %v6012_v15, %v7321_v34  ;;  %v6258_v45 = vadd.f32 %v6015_v40, %v7323_v3  ;;  %v7325_v37 = vld [vmem:[#allocation24_spill] sm:$0xff]  ;;  %v6274_v15 = vadd.f32 %v6030_v23, %v5961_v57  ;;  %v6290_v63 = vmul.f32 0.2, %v6050_v31 }
 0x563   :  { %7320 = vst [vmem:[#allocation56_spill] sm:$0xff] %v6250_v14  ;;  %v6262_v2 = vadd.f32 %v6018_v50, %v7325_v37  ;;  %7327 = vst [vmem:[#allocation66_spill] sm:$0xff] %v6266_v13  ;;  %v6278_v40 = vadd.f32 %v6034_v10, %v5995_v5  ;;  %v6284_v50 = vmul.f32 0.2, %v6042_v18  ;;  %v6296_v57 = vmul.f32 0.2, %v6056_v21 }
 0x564   :  { %7322 = vst [vmem:[#allocation28_spill] sm:$0xff] %v6254_v29  ;;  %7324 = vst [vmem:[#allocation62_spill] sm:$0xff] %v6258_v45  ;;  %v6299_v5 = vmul.f32 0.2, %v6059_v33  ;;  %v6302_v6 = vmul.f32 0.2, %v6062_v20 }
 0x565   :  { %7326 = vst [vmem:[#allocation24_spill] sm:$0xff] %v6262_v2  ;;  %7328 = vst [vmem:[#allocation67_spill] sm:$0xff] %v6270_v38  ;;  %v6305_v23 = vmul.f32 0.2, %v6066_v46  ;;  %v6310_v34 = vmul.f32 0.2, %v6070_v30 }
 0x566   :  { %7329 = vst [vmem:[#allocation68_spill] sm:$0xff] %v6274_v15  ;;  %7330 = vst [vmem:[#allocation69_spill] sm:$0xff] %v6278_v40  ;;  %v6313_v3 = vmul.f32 0.2, %v6074_v28  ;;  %v6316_v37 = vmul.f32 0.2, %v6078_v4 }
 0x567   :  { %7331 = vst [vmem:[#allocation70_spill] sm:$0xff] %v6281_v35  ;;  %7332 = vst [vmem:[#allocation71_spill] sm:$0xff] %v6284_v50  ;;  %v6321_v15 = vmul.f32 0.2, %v6082_v32  ;;  %v6324_v38 = vmul.f32 0.2, %v6085_v42 }
 0x568   :  { %7333 = vst [vmem:[#allocation72_spill] sm:$0xff] %v6287_v39  ;;  %7334 = vst [vmem:[#allocation73_spill] sm:$0xff] %v6290_v63  ;;  %v6327_v10 = vmul.f32 0.2, %v6088_v58  ;;  %v6332_v53 = vmul.f32 0.2, %v6091_v26 }
 0x569   :  { %7335 = vst [vmem:[#allocation74_spill] sm:$0xff] %v6293_v16  ;;  %7336 = vst [vmem:[#allocation75_spill] sm:$0xff] %v6296_v57  ;;  %v6335_v13 = vmul.f32 0.2, %v6095_v54  ;;  %v6338_v40 = vmul.f32 0.2, %v6099_v60 }
 0x56a   :  { %7337 = vst [vmem:[#allocation76_spill] sm:$0xff] %v6299_v5  ;;  %7338 = vst [vmem:[#allocation77_spill] sm:$0xff] %v6302_v6  ;;  %v6343_v18 = vmul.f32 0.2, %v6103_v61  ;;  %v6346_v2 = vmul.f32 0.2, %v6107_v41 }
 0x56b   :  { %7339 = vst [vmem:[#allocation78_spill] sm:$0xff] %v6305_v23  ;;  %7340 = vst [vmem:[#allocation79_spill] sm:$0xff] %v6310_v34  ;;  %v6349_v35 = vmul.f32 0.2, %v6111_v43  ;;  %v6357_v60 = vmul.f32 0.2, %v6118_v56 }
 0x56c   :  { %7341 = vst [vmem:[#allocation80_spill] sm:$0xff] %v6313_v3  ;;  %7342 = vst [vmem:[#allocation81_spill] sm:$0xff] %v6316_v37  ;;  %v6360_v50 = vmul.f32 0.2, %v6121_v7  ;;  %v6365_v31 = vmul.f32 0.2, %v6125_v59 }
 0x56d   :  { %7343 = vst [vmem:[#allocation82_spill] sm:$0xff] %v6321_v15  ;;  %7344 = vst [vmem:[#allocation83_spill] sm:$0xff] %v6324_v38  ;;  %v6368_v43 = vmul.f32 0.2, %v6129_v51  ;;  %v6371_v39 = vmul.f32 0.2, %v6133_v44 }
 0x56e   :  { %7345 = vst [vmem:[#allocation84_spill] sm:$0xff] %v6327_v10  ;;  %7346 = vst [vmem:[#allocation85_spill] sm:$0xff] %v6332_v53  ;;  %v6376_v1 = vmul.f32 0.2, %v6137_v8  ;;  %v7348_v7 = vld [vmem:[#allocation33_spill] sm:$0xff]  ;;  %v7354_v20 = vld [vmem:[#allocation11_spill] sm:$0xff]  ;;  %v2546_v10 = vmax.f32 %v6095_v54, %v6335_v13  ;;  %v2548_v13 = vmax.f32 %v6103_v61, %v6343_v18  ;;  %v2554_v18 = vmax.f32 %v6125_v59, %v6365_v31 }
 0x56f   :  { %7347 = vst [vmem:[#allocation86_spill] sm:$0xff] %v6360_v50  ;;  %v6379_v50 = vmul.f32 0.2, %v7348_v7  ;;  %v7349_v56 = vld [vmem:[#allocation37_spill] sm:$0xff]  ;;  %v6387_v21 = vmul.f32 0.2, %v6148_v9  ;;  %v2555_v61 = vmax.f32 %v6129_v51, %v6368_v43 }
 0x570   :  { %v6382_v63 = vmul.f32 0.2, %v7349_v56  ;;  %v6390_v44 = vmul.f32 0.2, %v6151_v52  ;;  %v6393_v16 = vmul.f32 0.2, %v6155_v22 }
 0x571   :  { %v6398_v33 = vmul.f32 0.2, %v6159_v48  ;;  %v7352_v56 = vld [vmem:[#allocation63_spill] sm:$0xff]  ;;  %v7353_v7 = vld [vmem:[#allocation57_spill] sm:$0xff]  ;;  %v6409_v52 = vmul.f32 0.2, %v7354_v20 }
 0x572   :  { %7350 = vst [vmem:[#allocation87_spill] sm:$0xff] %v6382_v63  ;;  %7351 = vst [vmem:[#allocation88_spill] sm:$0xff] %v6393_v16  ;;  %v6401_v63 = vmul.f32 0.2, %v7352_v56  ;;  %v6404_v57 = vmul.f32 0.2, %v7353_v7 }
 0x573   :  { %7355 = vst [vmem:[#allocation63_spill] sm:$0xff] %v6409_v52  ;;  %v7356_v22 = vld [vmem:[#allocation52_spill] sm:$0xff]  ;;  %v6415_v5 = vmul.f32 0.2, %v6179_v12  ;;  %v6420_v46 = vmul.f32 0.2, %v6182_v19 }
 0x574   :  { %v6412_v16 = vmul.f32 0.2, %v7356_v22  ;;  %v6423_v7 = vmul.f32 0.2, %v6186_v62  ;;  %v6426_v6 = vmul.f32 0.2, %v6190_v0 }
 0x575   :  { %7358 = vst [vmem:[#allocation89_spill] sm:$0xff] %v6415_v5  ;;  %7359 = vst [vmem:[#allocation90_spill] sm:$0xff] %v6420_v46  ;;  %v6431_v30 = vmul.f32 0.2, %v6194_v47  ;;  %v7360_v12 = vld [vmem:[#allocation21_spill] sm:$0xff]  ;;  %v7361_v22 = vld [vmem:[#allocation59_spill] sm:$0xff] }
 0x576   :  { %7357 = vst [vmem:[#allocation11_spill] sm:$0xff] %v6412_v16  ;;  %v6434_v5 = vmul.f32 0.2, %v7360_v12  ;;  %v6437_v23 = vmul.f32 0.2, %v7361_v22  ;;  %v7363_v28 = vld [vmem:[#allocation13_spill] sm:$0xff] }
 0x577   :  { %v6442_v62 = vmul.f32 0.2, %v7363_v28  ;;  %v6445_v0 = vmul.f32 0.2, %v6210_v55  ;;  %v6448_v34 = vmul.f32 0.2, %v6214_v17 }
 0x578   :  { %7362 = vst [vmem:[#allocation21_spill] sm:$0xff] %v6437_v23  ;;  %v6453_v4 = vmul.f32 0.2, %v6218_v25  ;;  %v6456_v22 = vmul.f32 0.2, %v6222_v27  ;;  %v7369_v23 = vld [vmem:[#allocation55_spill] sm:$0xff] }
 0x579   :  { %7364 = vst [vmem:[#allocation13_spill] sm:$0xff] %v6442_v62  ;;  %7365 = vst [vmem:[#allocation91_spill] sm:$0xff] %v6445_v0  ;;  %v6459_v3 = vmul.f32 0.2, %v7369_v23  ;;  %v7371_v32 = vld [vmem:[#allocation26_spill] sm:$0xff]  ;;  %v7373_v17 = vld [vmem:[#allocation61_spill] sm:$0xff] }
 0x57a   :  { %7366 = vst [vmem:[#allocation92_spill] sm:$0xff] %v6448_v34  ;;  %7367 = vst [vmem:[#allocation93_spill] sm:$0xff] %v6453_v4  ;;  %v6464_v55 = vmul.f32 0.2, %v7371_v32  ;;  %v6467_v34 = vmul.f32 0.2, %v7373_v17 }
 0x57b   :  { %7368 = vst [vmem:[#allocation94_spill] sm:$0xff] %v6456_v22  ;;  %7370 = vst [vmem:[#allocation95_spill] sm:$0xff] %v6459_v3  ;;  %v7375_v0 = vld [vmem:[#allocation22_spill] sm:$0xff]  ;;  %v6475_v42 = vmul.f32 0.2, %v6242_v24  ;;  %v7384_v53 = vld [vmem:[#allocation47_spill] sm:$0xff] }
 0x57c   :  { %7372 = vst [vmem:[#allocation96_spill] sm:$0xff] %v6464_v55  ;;  %7374 = vst [vmem:[#allocation97_spill] sm:$0xff] %v6467_v34  ;;  %v6470_v37 = vmul.f32 0.2, %v7375_v0  ;;  %v6478_v23 = vmul.f32 0.2, %v6246_v36  ;;  %v2547_v26 = vmax.f32 %v7384_v53, %v6338_v40 }
 0x57d   :  { %7377 = vst [vmem:[#allocation99_spill] sm:$0xff] %v6475_v42  ;;  %v6481_v15 = vmul.f32 0.2, %v6250_v14  ;;  %v6486_v58 = vmul.f32 0.2, %v6254_v29  ;;  %v7385_v36 = vld [vmem:[#allocation66_spill] sm:$0xff] }
 0x57e   :  { %7376 = vst [vmem:[#allocation98_spill] sm:$0xff] %v6470_v37  ;;  %7378 = vst [vmem:[#allocation100_spill] sm:$0xff] %v6478_v23  ;;  %v6489_v0 = vmul.f32 0.2, %v6258_v45  ;;  %v7382_v37 = vld [vmem:[#allocation24_spill] sm:$0xff]  ;;  %v7387_v14 = vld [vmem:[#allocation67_spill] sm:$0xff] }
 0x57f   :  { %7379 = vst [vmem:[#allocation101_spill] sm:$0xff] %v6481_v15  ;;  %7380 = vst [vmem:[#allocation102_spill] sm:$0xff] %v6486_v58  ;;  %v6492_v38 = vmul.f32 0.2, %v7382_v37  ;;  %v6497_v23 = vmul.f32 0.2, %v7385_v36  ;;  %v2549_v37 = vmax.f32 %v6107_v41, %v6346_v2  ;;  %v2551_v36 = vmax.f32 %v6114_v11, %v6354_v49 }
 0x580   :  { %7381 = vst [vmem:[#allocation103_spill] sm:$0xff] %v6489_v0  ;;  %v6500_v15 = vmul.f32 0.2, %v7387_v14  ;;  %v7389_v24 = vld [vmem:[#allocation68_spill] sm:$0xff]  ;;  %v7391_v45 = vld [vmem:[#allocation69_spill] sm:$0xff]  ;;  %v7433_v43 = vld [vmem:[#allocation34_spill] sm:$0xff] }
 0x581   :  { %7383 = vst [vmem:[#allocation104_spill] sm:$0xff] %v6492_v38  ;;  %7386 = vst [vmem:[#allocation47_spill] sm:$0xff] %v6497_v23  ;;  %v6503_v54 = vmul.f32 0.2, %v7389_v24  ;;  %v6508_v0 = vmul.f32 0.2, %v7391_v45 }
 0x582   :  { %7388 = vst [vmem:[#allocation105_spill] sm:$0xff] %v6500_v15  ;;  %v7393_v53 = vld [vmem:[#allocation32_spill] sm:$0xff]  ;;  %v7395_v24 = vld [vmem:[#allocation86_spill] sm:$0xff]  ;;  %v7398_v49 = vld [vmem:[#allocation33_spill] sm:$0xff] }
 0x583   :  { %7390 = vst [vmem:[#allocation106_spill] sm:$0xff] %v6503_v54  ;;  %7392 = vst [vmem:[#allocation107_spill] sm:$0xff] %v6508_v0  ;;  %v2550_v40 = vmax.f32 %v7393_v53, %v6349_v35  ;;  %v7394_v14 = vld [vmem:[#allocation36_spill] sm:$0xff]  ;;  %v2557_v35 = vmax.f32 %v6137_v8, %v6376_v1  ;;  %v2558_v11 = vmax.f32 %v7398_v49, %v6379_v50  ;;  %v7399_v53 = vld [vmem:[#allocation87_spill] sm:$0xff] }
 0x584   :  { %v2552_v15 = vmax.f32 %v7394_v14, %v6357_v60  ;;  %v7396_v54 = vld [vmem:[#allocation40_spill] sm:$0xff]  ;;  %v7400_v60 = vld [vmem:[#allocation37_spill] sm:$0xff]  ;;  %v7436_v29 = vld [vmem:[#allocation27_spill] sm:$0xff] }
 0x585   :  { %v2553_v23 = vmax.f32 %v7396_v54, %v7395_v24  ;;  %v7397_v41 = vld [vmem:[#allocation44_spill] sm:$0xff]  ;;  %v2559_v14 = vmax.f32 %v7400_v60, %v7399_v53  ;;  %v2560_v24 = vmax.f32 %v6148_v9, %v6387_v21  ;;  %v7401_v31 = vld [vmem:[#allocation41_spill] sm:$0xff]  ;;  %v7411_v9 = vld [vmem:[#allocation59_spill] sm:$0xff] }
 0x586   :  { %v2556_v2 = vmax.f32 %v7397_v41, %v6371_v39  ;;  %v2561_v59 = vmax.f32 %v7401_v31, %v6390_v44  ;;  %v7402_v54 = vld [vmem:[#allocation88_spill] sm:$0xff]  ;;  %v7403_v51 = vld [vmem:[#allocation45_spill] sm:$0xff]  ;;  %v7434_v21 = vld [vmem:[#allocation78_spill] sm:$0xff] }
 0x587   :  { %v7404_v1 = vld [vmem:[#allocation57_spill] sm:$0xff]  ;;  %v7408_v31 = vld [vmem:[#allocation12_spill] sm:$0xff]  ;;  %v7435_v58 = vmax.f32 %v7433_v43, %v7434_v21  ;;  %v7437_v55 = vld [vmem:[#allocation70_spill] sm:$0xff] }
 0x588   :  { %v7409_v8 = vld [vmem:[#allocation53_spill] sm:$0xff]  ;;  %v7438_v3 = vmax.f32 %v7436_v29, %v7437_v55  ;;  %v7439_v34 = vld [vmem:[#allocation38_spill] sm:$0xff]  ;;  %v7440_v38 = vld [vmem:[#allocation79_spill] sm:$0xff] }
 0x589   :  { %v7410_v52 = vld [vmem:[#allocation21_spill] sm:$0xff]  ;;  %v7441_v53 = vmax.f32 %v7439_v34, %v7440_v38  ;;  %v7443_v17 = vld [vmem:[#allocation71_spill] sm:$0xff]  ;;  %v7445_v46 = vld [vmem:[#allocation42_spill] sm:$0xff] }
 0x58a   :  { %v2594_v16 = vmax.f32 %v7438_v3, %v7435_v58  ;;  %v7442_v62 = vld [vmem:[#allocation29_spill] sm:$0xff]  ;;  %v7446_v19 = vld [vmem:[#allocation80_spill] sm:$0xff]  ;;  %v7451_v45 = vld [vmem:[#allocation46_spill] sm:$0xff] }
 0x58b   :  { %v7444_v49 = vmax.f32 %v7442_v62, %v7443_v17  ;;  %v7447_v39 = vmax.f32 %v7445_v46, %v7446_v19  ;;  %v7448_v44 = vld [vmem:[#allocation48_spill] sm:$0xff]  ;;  %v7452_v43 = vld [vmem:[#allocation81_spill] sm:$0xff]  ;;  %v7457_v3 = vld [vmem:[#allocation31_spill] sm:$0xff] }
 0x58c   :  { %v7449_v60 = vld [vmem:[#allocation72_spill] sm:$0xff]  ;;  %v7453_v21 = vmax.f32 %v7451_v45, %v7452_v43  ;;  %v7454_v4 = vld [vmem:[#allocation49_spill] sm:$0xff]  ;;  %v7458_v38 = vld [vmem:[#allocation82_spill] sm:$0xff] }
 0x58d   :  { %v2603_v42 = vmax.f32 %v7444_v49, %v7441_v53  ;;  %v7450_v22 = vmax.f32 %v7448_v44, %v7449_v60  ;;  %v7455_v55 = vld [vmem:[#allocation73_spill] sm:$0xff]  ;;  %v7459_v34 = vmax.f32 %v7457_v3, %v7458_v38  ;;  %v7460_v50 = vld [vmem:[#allocation50_spill] sm:$0xff]  ;;  %v7463_v53 = vld [vmem:[#allocation35_spill] sm:$0xff]  ;;  %v2595_v60 = vmax.f32 %v2594_v16, %v2546_v10 }
 0x58e   :  { %v7456_v58 = vmax.f32 %v7454_v4, %v7455_v55  ;;  %v7461_v62 = vld [vmem:[#allocation74_spill] sm:$0xff]  ;;  %v7464_v46 = vld [vmem:[#allocation83_spill] sm:$0xff]  ;;  %v7470_v41 = vld [vmem:[#allocation84_spill] sm:$0xff] }
 0x58f   :  { %v2612_v0 = vmax.f32 %v7450_v22, %v7447_v39  ;;  %v7462_v17 = vmax.f32 %v7460_v50, %v7461_v62  ;;  %v7465_v19 = vmax.f32 %v7463_v53, %v7464_v46  ;;  %v7466_v32 = vld [vmem:[#allocation51_spill] sm:$0xff]  ;;  %v2604_v45 = vmax.f32 %v2603_v42, %v2547_v26  ;;  %v7473_v55 = vld [vmem:[#allocation76_spill] sm:$0xff]  ;;  %v7476_v27 = vld [vmem:[#allocation85_spill] sm:$0xff] }
 0x590   :  { %v2621_v29 = vmax.f32 %v7456_v58, %v7453_v21  ;;  %v7467_v44 = vld [vmem:[#allocation75_spill] sm:$0xff]  ;;  %v7472_v21 = vld [vmem:[#allocation14_spill] sm:$0xff]  ;;  %v7479_v62 = vld [vmem:[#allocation77_spill] sm:$0xff]  ;;  %v2596_v16 = vmax.f32 %v2595_v60, %v2554_v18 }
 0x591   :  { %v2630_v49 = vmax.f32 %v7462_v17, %v7459_v34  ;;  %v7468_v22 = vmax.f32 %v7466_v32, %v7467_v44  ;;  %v7469_v43 = vld [vmem:[#allocation39_spill] sm:$0xff]  ;;  %v7474_v58 = vmax.f32 %v7472_v21, %v7473_v55  ;;  %v7478_v34 = vld [vmem:[#allocation30_spill] sm:$0xff]  ;;  %v2613_v46 = vmax.f32 %v2612_v0, %v2548_v13 }
 0x592   :  { %v7471_v4 = vmax.f32 %v7469_v43, %v7470_v41  ;;  %v7475_v38 = vld [vmem:[#allocation43_spill] sm:$0xff]  ;;  %v7480_v17 = vmax.f32 %v7478_v34, %v7479_v62  ;;  %v2622_v25 = vmax.f32 %v2621_v29, %v2549_v37  ;;  %v2605_v42 = vmax.f32 %v2604_v45, %v2555_v61 }
 0x593   :  { %v2639_v39 = vmax.f32 %v7468_v22, %v7465_v19  ;;  %v7477_v50 = vmax.f32 %v7475_v38, %v7476_v27  ;;  %v2631_v32 = vmax.f32 %v2630_v49, %v2550_v40  ;;  %v2614_v41 = vmax.f32 %v2613_v46, %v2556_v2 }
 0x594   :  { %v2648_v3 = vmax.f32 %v7474_v58, %v7471_v4  ;;  %v2623_v44 = vmax.f32 %v2622_v25, %v2557_v35  ;;  %v2597_v4 = vrot.slane %v2596_v16, 4  ;;  %v2606_v21 = vrot.slane %v2605_v42, 4 }
 0x595   :  { %v2657_v53 = vmax.f32 %v7480_v17, %v7477_v50  ;;  %v2640_v19 = vmax.f32 %v2639_v39, %v2551_v36  ;;  %v2632_v22 = vmax.f32 %v2631_v32, %v2558_v11  ;;  %v2615_v58 = vrot.slane %v2614_v41, 4 }
 0x596   :  { %v2649_v26 = vmax.f32 %v2648_v3, %v2552_v15  ;;  %v2624_v38 = vrot.slane %v2623_v44, 4  ;;  %v2598_v0 = vmax.f32 %v2596_v16, %v2597_v4  ;;  %v2607_v37 = vmax.f32 %v2605_v42, %v2606_v21 }
 0x597   :  { %v2658_v10 = vmax.f32 %v2657_v53, %v2553_v23  ;;  %v2641_v43 = vmax.f32 %v2640_v19, %v2559_v14  ;;  %v2633_v34 = vrot.slane %v2632_v22, 4  ;;  %v2616_v40 = vmax.f32 %v2614_v41, %v2615_v58 }
 0x598   :  { %v2650_v55 = vmax.f32 %v2649_v26, %v2560_v24  ;;  %v2625_v18 = vmax.f32 %v2623_v44, %v2624_v38  ;;  %v2599_v61 = vrot.slane %v2598_v0, 2  ;;  %v2608_v25 = vrot.slane %v2607_v37, 2 }
 0x599   :  { %v2659_v27 = vmax.f32 %v2658_v10, %v2561_v59  ;;  %v2642_v50 = vrot.slane %v2641_v43, 4  ;;  %v2634_v15 = vmax.f32 %v2632_v22, %v2633_v34  ;;  %v2617_v11 = vrot.slane %v2616_v40, 2 }
 0x59a   :  { %v2651_v13 = vrot.slane %v2650_v55, 4  ;;  %v2626_v14 = vrot.slane %v2625_v18, 2  ;;  %v2600_v29 = vmax.f32 %v2598_v0, %v2599_v61  ;;  %v2609_v49 = vmax.f32 %v2607_v37, %v2608_v25  ;;  %v7497_v61 = vld [vmem:[#allocation60_spill] sm:$0xff] }
 0x59b   :  { %v2660_v36 = vrot.slane %v2659_v27, 4  ;;  %v2643_v23 = vmax.f32 %v2641_v43, %v2642_v50  ;;  %v2635_v24 = vrot.slane %v2634_v15, 2  ;;  %v2618_v45 = vmax.f32 %v2616_v40, %v2617_v11 }
 0x59c   :  { %v2652_v2 = vmax.f32 %v2650_v55, %v2651_v13  ;;  %v2627_v3 = vmax.f32 %v2625_v18, %v2626_v14  ;;  %v2601_v53 = vrot.slane %v2600_v29, 1  ;;  %v2610_v46 = vrot.slane %v2609_v49, 1  ;;  %v7507_v14 = vld [vmem:[#allocation89_spill] sm:$0xff] }
 0x59d   :  { %v2661_v35 = vmax.f32 %v2659_v27, %v2660_v36  ;;  %v2644_v59 = vrot.slane %v2643_v23, 2  ;;  %v2636_v62 = vmax.f32 %v2634_v15, %v2635_v24  ;;  %v2619_v16 = vrot.slane %v2618_v45, 1 }
 0x59e   :  { %v2653_v39 = vrot.slane %v2652_v2, 2  ;;  %v2628_v42 = vrot.slane %v2627_v3, 1  ;;  %v6648_v41 = vmax.f32 %v2600_v29, %v2601_v53  ;;  %v6650_v44 = vmax.f32 %v2609_v49, %v2610_v46  ;;  %v7510_v29 = vld [vmem:[#allocation92_spill] sm:$0xff] }
 0x59f   :  { %v2662_v60 = vrot.slane %v2661_v35, 2  ;;  %v2645_v17 = vmax.f32 %v2643_v23, %v2644_v59  ;;  %v2637_v26 = vrot.slane %v2636_v62, 1  ;;  %v6652_v4 = vmax.f32 %v2618_v45, %v2619_v16 }
 0x5a0   :  { %v2654_v32 = vmax.f32 %v2652_v2, %v2653_v39  ;;  %v6654_v21 = vmax.f32 %v2627_v3, %v2628_v42  ;;  %v7481_v34 = vmax.f32 %v7408_v31, %v6423_v7  ;;  %v7482_v50 = vmax.f32 %v7403_v51, %v7402_v54  ;;  %v7494_v31 = vld [vmem:[#allocation52_spill] sm:$0xff]  ;;  %v7512_v39 = vld [vmem:[#allocation58_spill] sm:$0xff] }
 0x5a1   :  { %v2663_v19 = vmax.f32 %v2661_v35, %v2662_v60  ;;  %v2646_v10 = vrot.slane %v2645_v17, 1  ;;  %v6656_v55 = vmax.f32 %v2636_v62, %v2637_v26  ;;  %v7483_v37 = vmax.f32 %v7409_v8, %v6426_v6  ;;  %v7513_v60 = vld [vmem:[#allocation90_spill] sm:$0xff]  ;;  %v7515_v62 = vld [vmem:[#allocation55_spill] sm:$0xff]  ;;  %v7521_v26 = vld [vmem:[#allocation61_spill] sm:$0xff] }
 0x5a2   :  { %v2655_v22 = vrot.slane %v2654_v32, 1  ;;  %v2666_v0 = vmax.f32 %v7482_v50, %v7481_v34  ;;  %v7484_v13 = vmax.f32 %v6159_v48, %v6398_v33  ;;  %v7485_v40 = vmax.f32 %v6194_v47, %v6431_v30  ;;  %v7490_v48 = vld [vmem:[#allocation63_spill] sm:$0xff]  ;;  %v7492_v30 = vld [vmem:[#allocation13_spill] sm:$0xff]  ;;  %v7524_v34 = vld [vmem:[#allocation22_spill] sm:$0xff] }
 0x5a3   :  { %v2664_v43 = vrot.slane %v2663_v19, 1  ;;  %v6658_v27 = vmax.f32 %v2645_v17, %v2646_v10  ;;  %v7486_v18 = vmax.f32 %v7352_v56, %v6401_v63  ;;  %v7487_v7 = vmax.f32 %v7360_v12, %v6434_v5  ;;  %v7495_v56 = vld [vmem:[#allocation11_spill] sm:$0xff]  ;;  %v7498_v12 = vld [vmem:[#allocation93_spill] sm:$0xff]  ;;  %v7525_v50 = vld [vmem:[#allocation98_spill] sm:$0xff] }
 0x5a4   :  { %v6660_v58 = vmax.f32 %v2654_v32, %v2655_v22  ;;  %v2675_v36 = vmax.f32 %v7484_v13, %v7483_v37  ;;  %v7488_v54 = vmax.f32 %v7404_v1, %v6404_v57  ;;  %v7489_v6 = vmax.f32 %v7411_v9, %v7410_v52  ;;  %v7500_v57 = vld [vmem:[#allocation16_spill] sm:$0xff]  ;;  %v7501_v1 = vld [vmem:[#allocation94_spill] sm:$0xff]  ;;  %v7504_v9 = vld [vmem:[#allocation91_spill] sm:$0xff] }
 0x5a5   :  { %v6662_v38 = vmax.f32 %v2663_v19, %v2664_v43  ;;  %v2684_v15 = vmax.f32 %v7486_v18, %v7485_v40  ;;  %v7491_v33 = vmax.f32 %v7354_v20, %v7490_v48  ;;  %v7493_v47 = vmax.f32 %v7363_v28, %v7492_v30  ;;  %v7503_v52 = vld [vmem:[#allocation54_spill] sm:$0xff]  ;;  %v7506_v20 = vld [vmem:[#allocation15_spill] sm:$0xff]  ;;  %v7519_v19 = vld [vmem:[#allocation96_spill] sm:$0xff] }
 0x5a6   :  { %v2693_v51 = vmax.f32 %v7488_v54, %v7487_v7  ;;  %v7496_v63 = vmax.f32 %v7494_v31, %v7495_v56  ;;  %v7499_v5 = vmax.f32 %v7497_v61, %v7498_v12  ;;  %v7502_v2 = vmax.f32 %v7500_v57, %v7501_v1  ;;  %v7509_v28 = vld [vmem:[#allocation23_spill] sm:$0xff]  ;;  %v7518_v32 = vld [vmem:[#allocation26_spill] sm:$0xff]  ;;  %v7522_v10 = vld [vmem:[#allocation97_spill] sm:$0xff] }
 0x5a7   :  { %v2702_v8 = vmax.f32 %v7491_v33, %v7489_v6  ;;  %v7505_v11 = vmax.f32 %v7503_v52, %v7504_v9  ;;  %v7508_v24 = vmax.f32 %v7506_v20, %v7507_v14  ;;  %v7511_v49 = vmax.f32 %v7509_v28, %v7510_v29  ;;  %v7516_v17 = vld [vmem:[#allocation95_spill] sm:$0xff]  ;;  %v7527_v13 = vld [vmem:[#allocation56_spill] sm:$0xff]  ;;  %v7531_v54 = vld [vmem:[#allocation102_spill] sm:$0xff] }
 0x5a8   :  { %v2711_v23 = vmax.f32 %v7496_v63, %v7493_v47  ;;  %v2667_v25 = vmax.f32 %v2666_v0, %v7499_v5  ;;  %v2676_v35 = vmax.f32 %v2675_v36, %v7502_v2  ;;  %v7514_v45 = vmax.f32 %v7512_v39, %v7513_v60  ;;  %v7528_v36 = vld [vmem:[#allocation101_spill] sm:$0xff]  ;;  %v7530_v7 = vld [vmem:[#allocation28_spill] sm:$0xff]  ;;  %v7534_v33 = vld [vmem:[#allocation99_spill] sm:$0xff] }
 0x5a9   :  { %v2720_v59 = vmax.f32 %v7508_v24, %v7505_v11  ;;  %v7517_v53 = vmax.f32 %v7515_v62, %v7516_v17  ;;  %v7520_v16 = vmax.f32 %v7518_v32, %v7519_v19  ;;  %v7523_v22 = vmax.f32 %v7521_v26, %v7522_v10  ;;  %v7533_v48 = vld [vmem:[#allocation64_spill] sm:$0xff]  ;;  %v7536_v47 = vld [vmem:[#allocation65_spill] sm:$0xff]  ;;  %v7539_v63 = vld [vmem:[#allocation62_spill] sm:$0xff] }
 0x5aa   :  { %v2729_v3 = vmax.f32 %v7514_v45, %v7511_v49  ;;  %v7526_v0 = vmax.f32 %v7524_v34, %v7525_v50  ;;  %v7529_v40 = vmax.f32 %v7527_v13, %v7528_v36  ;;  %v7532_v6 = vmax.f32 %v7530_v7, %v7531_v54  ;;  %v7537_v31 = vld [vmem:[#allocation100_spill] sm:$0xff]  ;;  %v7540_v61 = vld [vmem:[#allocation103_spill] sm:$0xff]  ;;  %v7545_v2 = vld [vmem:[#allocation66_spill] sm:$0xff] }
 0x5ab   :  { %v2685_v46 = vmax.f32 %v2684_v15, %v7517_v53  ;;  %v2694_v42 = vmax.f32 %v2693_v51, %v7520_v16  ;;  %v2703_v43 = vmax.f32 %v2702_v8, %v7523_v22  ;;  %v7535_v30 = vmax.f32 %v7533_v48, %v7534_v33  ;;  %v7542_v5 = vld [vmem:[#allocation24_spill] sm:$0xff]  ;;  %v7546_v52 = vld [vmem:[#allocation47_spill] sm:$0xff]  ;;  %v7549_v20 = vld [vmem:[#allocation105_spill] sm:$0xff] }
 0x5ac   :  { %v2712_v37 = vmax.f32 %v2711_v23, %v7526_v0  ;;  %v2668_v18 = vmax.f32 %v2667_v25, %v7529_v40  ;;  %v2677_v15 = vmax.f32 %v2676_v35, %v7532_v6  ;;  %v7538_v56 = vmax.f32 %v7536_v47, %v7537_v31  ;;  %v7543_v57 = vld [vmem:[#allocation104_spill] sm:$0xff]  ;;  %v7548_v11 = vld [vmem:[#allocation67_spill] sm:$0xff]  ;;  %v7552_v49 = vld [vmem:[#allocation106_spill] sm:$0xff] }
 0x5ad   :  { %v2721_v51 = vmax.f32 %v2720_v59, %v7535_v30  ;;  %v7541_v12 = vmax.f32 %v7539_v63, %v7540_v61  ;;  %v7544_v1 = vmax.f32 %v7542_v5, %v7543_v57  ;;  %v7547_v9 = vmax.f32 %v7545_v2, %v7546_v52  ;;  %v7551_v29 = vld [vmem:[#allocation68_spill] sm:$0xff]  ;;  %v7554_v45 = vld [vmem:[#allocation69_spill] sm:$0xff] }
 0x5ae   :  { %v2730_v8 = vmax.f32 %v2729_v3, %v7538_v56  ;;  %v7550_v14 = vmax.f32 %v7548_v11, %v7549_v20  ;;  %v2669_v59 = vrot.slane %v2668_v18, 4  ;;  %v2678_v28 = vrot.slane %v2677_v15, 4  ;;  %v7555_v3 = vld [vmem:[#allocation107_spill] sm:$0xff] }
 0x5af   :  { %v2686_v23 = vmax.f32 %v2685_v46, %v7541_v12  ;;  %v2695_v25 = vmax.f32 %v2694_v42, %v7544_v1  ;;  %v2704_v35 = vmax.f32 %v2703_v43, %v7547_v9  ;;  %v7553_v39 = vmax.f32 %v7551_v29, %v7552_v49 }
 0x5b0   :  { %v2713_v24 = vmax.f32 %v2712_v37, %v7550_v14  ;;  %v7556_v62 = vmax.f32 %v7554_v45, %v7555_v3  ;;  %v2670_v16 = vmax.f32 %v2668_v18, %v2669_v59  ;;  %v2679_v42 = vmax.f32 %v2677_v15, %v2678_v28 }
 0x5b1   :  { %v2722_v60 = vmax.f32 %v2721_v51, %v7553_v39  ;;  %v2687_v53 = vrot.slane %v2686_v23, 4  ;;  %v2696_v46 = vrot.slane %v2695_v25, 4  ;;  %v2705_v32 = vrot.slane %v2704_v35, 4 }
 0x5b2   :  { %v2731_v17 = vmax.f32 %v2730_v8, %v7556_v62  ;;  %v2714_v19 = vrot.slane %v2713_v24, 4  ;;  %v2671_v0 = vrot.slane %v2670_v16, 2  ;;  %v2680_v37 = vrot.slane %v2679_v42, 2 }
 0x5b3   :  { %v2723_v26 = vrot.slane %v2722_v60, 4  ;;  %v2688_v22 = vmax.f32 %v2686_v23, %v2687_v53  ;;  %v2697_v43 = vmax.f32 %v2695_v25, %v2696_v46  ;;  %v2706_v34 = vmax.f32 %v2704_v35, %v2705_v32 }
 0x5b4   :  { %v2732_v10 = vrot.slane %v2731_v17, 4  ;;  %v2715_v50 = vmax.f32 %v2713_v24, %v2714_v19  ;;  %v2672_v48 = vmax.f32 %v2670_v16, %v2671_v0  ;;  %v2681_v33 = vmax.f32 %v2679_v42, %v2680_v37 }
 0x5b5   :  { %v2724_v13 = vmax.f32 %v2722_v60, %v2723_v26  ;;  %v2689_v40 = vrot.slane %v2688_v22, 2  ;;  %v2698_v7 = vrot.slane %v2697_v43, 2  ;;  %v2707_v54 = vrot.slane %v2706_v34, 2 }
 0x5b6   :  { %v2733_v36 = vmax.f32 %v2731_v17, %v2732_v10  ;;  %v2716_v6 = vrot.slane %v2715_v50, 2  ;;  %v2673_v56 = vrot.slane %v2672_v48, 1  ;;  %v2682_v8 = vrot.slane %v2681_v33, 1 }
 0x5b7   :  { %v2725_v30 = vrot.slane %v2724_v13, 2  ;;  %v2690_v18 = vmax.f32 %v2688_v22, %v2689_v40  ;;  %v2699_v15 = vmax.f32 %v2697_v43, %v2698_v7  ;;  %v2708_v47 = vmax.f32 %v2706_v34, %v2707_v54 }
 0x5b8   :  { %v2734_v51 = vrot.slane %v2733_v36, 2  ;;  %v2717_v31 = vmax.f32 %v2715_v50, %v2716_v6  ;;  %v2674_v1 = vmax.f32 %v2672_v48, %v2673_v56  ;;  %v2683_v25 = vmax.f32 %v2681_v33, %v2682_v8 }
 0x5b9   :  { %v2726_v63 = vmax.f32 %v2724_v13, %v2725_v30  ;;  %v2691_v12 = vrot.slane %v2690_v18, 1  ;;  %v2700_v23 = vrot.slane %v2699_v15, 1  ;;  %v2709_v5 = vrot.slane %v2708_v47, 1 }
 0x5ba   :  { %v2735_v61 = vmax.f32 %v2733_v36, %v2734_v51  ;;  %v2718_v57 = vrot.slane %v2717_v31, 1  ;;  %v6762_v59 = vsel %vm2738_vm2, %v6648_v41, %v2674_v1  ;;  %v2740_v28 = vsel %vm2738_vm2, %v6650_v44, %v2683_v25 }
 0x5bb   :  { %v2727_v2 = vrot.slane %v2726_v63, 1  ;;  %v2692_v9 = vmax.f32 %v2690_v18, %v2691_v12  ;;  %v2701_v35 = vmax.f32 %v2699_v15, %v2700_v23  ;;  %v2710_v11 = vmax.f32 %v2708_v47, %v2709_v5 }
 0x5bc   :  { %v2736_v52 = vrot.slane %v2735_v61, 1  ;;  %v2719_v20 = vmax.f32 %v2717_v31, %v2718_v57 }
 0x5bd   :  { %v2728_v14 = vmax.f32 %v2726_v63, %v2727_v2  ;;  %v6768_v29 = vsel %vm2738_vm2, %v6652_v4, %v2692_v9  ;;  %v6772_v49 = vsel %vm2738_vm2, %v6654_v21, %v2701_v35  ;;  %v6776_v39 = vsel %vm2738_vm2, %v6656_v55, %v2710_v11 }
 0x5be   :  { %v2737_v24 = vmax.f32 %v2735_v61, %v2736_v52  ;;  %v6780_v60 = vsel %vm2738_vm2, %v6658_v27, %v2719_v20 }
 0x5bf   :  { %v6784_v41 = vsel %vm2738_vm2, %v6660_v58, %v2728_v14 }
 0x5c0   :  { %v6788_v44 = vsel %vm2738_vm2, %v6662_v38, %v2737_v24 }
 0x5c1   :  { %4374 = dma.done.wait [#allocation4], 32768 }
 0x5c2   :  { %4375 = vsyncadd [#allocation4], 4294934528  ;;  %v3008_v4 = vpack.c.bf16 %v2740_v28, %v2740_v28  ;;  %v2752_v21 = vld [vmem:[#allocation2 + $0x8] sm:$0xff]  ;;  %v2754_v55 = vld [vmem:[#allocation2 + $0x18] sm:$0xff]  ;;  %vm3347_vm3 = vcmask 1041408  }
 0x5c3   :  { %v2751_v45 = vld [vmem:[#allocation2] sm:$0xff]  ;;  %3015 = vmatprep.subr.bf16.mxu1 %v2752_v21  ;;  %3179 = vmatprep.subr.bf16.mxu0 %v2754_v55  ;;  %v2753_v27 = vld [vmem:[#allocation2 + $0x10] sm:$0xff]  ;;  %v2756_v3 = vld [vmem:[#allocation2 + $0x28] sm:$0xff] }
 0x5c4   :  { %3047 = vmatprep.mubr.bf16.mxu1 %v3008_v4  ;;  %3211 = vmatprep.mubr.bf16.mxu0 %v3008_v4  ;;  %v2758_v62 = vld [vmem:[#allocation2 + $0x38] sm:$0xff]  ;;  %v2755_v58 = vld [vmem:[#allocation2 + $0x20] sm:$0xff]  ;;  %v2757_v38 = vld [vmem:[#allocation2 + $0x30] sm:$0xff] }
 0x5c5   :  { %3016 = vmatpush1.bf16.msra.mxu1 %v2751_v45  ;;  %3180 = vmatpush1.bf16.msra.mxu0 %v2753_v27  ;;  %v2760_v17 = vld [vmem:[#allocation2 + $0x48] sm:$0xff]  ;;  %v2762_v53 = vld [vmem:[#allocation2 + $0x58] sm:$0xff]  ;;  %v2759_v46 = vld [vmem:[#allocation2 + $0x40] sm:$0xff] }
 0x5c6   :  { %3017 = vmatprep.subr.bf16.mxu1 %v2756_v3  ;;  %3181 = vmatprep.subr.bf16.mxu0 %v2758_v62  ;;  %v2761_v32 = vld [vmem:[#allocation2 + $0x50] sm:$0xff]  ;;  %v2764_v19 = vld [vmem:[#allocation2 + $0x68] sm:$0xff]  ;;  %v2766_v16 = vld [vmem:[#allocation2 + $0x78] sm:$0xff] }
 0x5c7   :  { %v2763_v42 = vld [vmem:[#allocation2 + $0x60] sm:$0xff]  ;;  %v2765_v26 = vld [vmem:[#allocation2 + $0x70] sm:$0xff]  ;;  %v2768_v10 = vld [vmem:[#allocation2 + $0x88] sm:$0xff] }
 0x5c8   :  { %v2770_v22 = vld [vmem:[#allocation2 + $0x98] sm:$0xff]  ;;  %v2767_v43 = vld [vmem:[#allocation2 + $0x80] sm:$0xff]  ;;  %v2769_v34 = vld [vmem:[#allocation2 + $0x90] sm:$0xff] }
 0x5c9   :  { %3018 = vmatpush1.bf16.msra.mxu1 %v2755_v58  ;;  %3182 = vmatpush1.bf16.msra.mxu0 %v2757_v38  ;;  %v2772_v50 = vld [vmem:[#allocation2 + $0xa8] sm:$0xff]  ;;  %v2774_v0 = vld [vmem:[#allocation2 + $0xb8] sm:$0xff]  ;;  %v2771_v37 = vld [vmem:[#allocation2 + $0xa0] sm:$0xff] }
 0x5ca   :  { %3019 = vmatprep.subr.bf16.mxu1 %v2760_v17  ;;  %3183 = vmatprep.subr.bf16.mxu0 %v2762_v53  ;;  %v2773_v13 = vld [vmem:[#allocation2 + $0xb0] sm:$0xff]  ;;  %v2776_v36 = vld [vmem:[#allocation2 + $0xc8] sm:$0xff]  ;;  %v2778_v40 = vld [vmem:[#allocation2 + $0xd8] sm:$0xff]  ;;  %v3007_v53 = vpack.c.bf16 %v6762_v59, %v6762_v59 }
 0x5cb   :  { %v2775_v7 = vld [vmem:[#allocation2 + $0xc0] sm:$0xff]  ;;  %v2777_v54 = vld [vmem:[#allocation2 + $0xd0] sm:$0xff]  ;;  %v2780_v6 = vld [vmem:[#allocation2 + $0xe8] sm:$0xff] }
 0x5cc   :  { %v2782_v48 = vld [vmem:[#allocation2 + $0xf8] sm:$0xff]  ;;  %v2779_v33 = vld [vmem:[#allocation2 + $0xe0] sm:$0xff]  ;;  %v2781_v30 = vld [vmem:[#allocation2 + $0xf0] sm:$0xff] }
 0x5cd   :  { %3020 = vmatpush1.bf16.msra.mxu1 %v2759_v46  ;;  %3184 = vmatpush1.bf16.msra.mxu0 %v2761_v32  ;;  %v2784_v51 = vld [vmem:[#allocation2 + $0x108] sm:$0xff]  ;;  %v2786_v18 = vld [vmem:[#allocation2 + $0x118] sm:$0xff]  ;;  %v2783_v15 = vld [vmem:[#allocation2 + $0x100] sm:$0xff] }
 0x5ce   :  { %3021 = vmatprep.subr.bf16.mxu1 %v2764_v19  ;;  %3185 = vmatprep.subr.bf16.mxu0 %v2766_v16  ;;  %v2785_v47 = vld [vmem:[#allocation2 + $0x110] sm:$0xff]  ;;  %v2788_v31 = vld [vmem:[#allocation2 + $0x128] sm:$0xff]  ;;  %v2790_v56 = vld [vmem:[#allocation2 + $0x138] sm:$0xff] }
 0x5cf   :  { %v2787_v8 = vld [vmem:[#allocation2 + $0x120] sm:$0xff]  ;;  %v2789_v63 = vld [vmem:[#allocation2 + $0x130] sm:$0xff]  ;;  %v2792_v61 = vld [vmem:[#allocation2 + $0x148] sm:$0xff] }
 0x5d0   :  { %v2794_v12 = vld [vmem:[#allocation2 + $0x158] sm:$0xff]  ;;  %v2791_v23 = vld [vmem:[#allocation2 + $0x140] sm:$0xff]  ;;  %v2793_v5 = vld [vmem:[#allocation2 + $0x150] sm:$0xff] }
 0x5d1   :  { %3022 = vmatpush1.bf16.msra.mxu1 %v2763_v42  ;;  %3186 = vmatpush1.bf16.msra.mxu0 %v2765_v26  ;;  %v2796_v57 = vld [vmem:[#allocation2 + $0x168] sm:$0xff]  ;;  %v2798_v1 = vld [vmem:[#allocation2 + $0x178] sm:$0xff]  ;;  %v2795_v25 = vld [vmem:[#allocation2 + $0x160] sm:$0xff]  ;;  %v3010_v42 = vpack.c.bf16 %v6772_v49, %v6772_v49 }
 0x5d2   :  { %3023 = vmatprep.subr.bf16.mxu1 %v2768_v10  ;;  %3187 = vmatprep.subr.bf16.mxu0 %v2770_v22  ;;  %v2797_v2 = vld [vmem:[#allocation2 + $0x170] sm:$0xff]  ;;  %v2800_v52 = vld [vmem:[#allocation2 + $0x188] sm:$0xff]  ;;  %v2802_v9 = vld [vmem:[#allocation2 + $0x198] sm:$0xff] }
 0x5d3   :  { %v2799_v35 = vld [vmem:[#allocation2 + $0x180] sm:$0xff]  ;;  %v2801_v11 = vld [vmem:[#allocation2 + $0x190] sm:$0xff]  ;;  %v2804_v20 = vld [vmem:[#allocation2 + $0x1a8] sm:$0xff] }
 0x5d4   :  { %v2806_v14 = vld [vmem:[#allocation2 + $0x1b8] sm:$0xff]  ;;  %v2803_v24 = vld [vmem:[#allocation2 + $0x1a0] sm:$0xff]  ;;  %v2805_v28 = vld [vmem:[#allocation2 + $0x1b0] sm:$0xff] }
 0x5d5   :  { %3024 = vmatpush1.bf16.msra.mxu1 %v2767_v43  ;;  %3188 = vmatpush1.bf16.msra.mxu0 %v2769_v34  ;;  %v2808_v4 = vld [vmem:[#allocation2 + $0x1c8] sm:$0xff]  ;;  %v2810_v21 = vld [vmem:[#allocation2 + $0x1d8] sm:$0xff]  ;;  %v2807_v55 = vld [vmem:[#allocation2 + $0x1c0] sm:$0xff] }
 0x5d6   :  { %3025 = vmatprep.subr.bf16.mxu1 %v2772_v50  ;;  %3189 = vmatprep.subr.bf16.mxu0 %v2774_v0  ;;  %v2809_v45 = vld [vmem:[#allocation2 + $0x1d0] sm:$0xff]  ;;  %v2812_v27 = vld [vmem:[#allocation2 + $0x1e8] sm:$0xff]  ;;  %v2814_v3 = vld [vmem:[#allocation2 + $0x1f8] sm:$0xff] }
 0x5d7   :  { %v2811_v62 = vld [vmem:[#allocation2 + $0x1e0] sm:$0xff]  ;;  %v2813_v58 = vld [vmem:[#allocation2 + $0x1f0] sm:$0xff]  ;;  %v2816_v38 = vld [vmem:[#allocation2 + $0x208] sm:$0xff] }
 0x5d8   :  { %v2818_v17 = vld [vmem:[#allocation2 + $0x218] sm:$0xff]  ;;  %v2815_v46 = vld [vmem:[#allocation2 + $0x200] sm:$0xff]  ;;  %v2817_v32 = vld [vmem:[#allocation2 + $0x210] sm:$0xff] }
 0x5d9   :  { %3026 = vmatpush1.bf16.msra.mxu1 %v2771_v37  ;;  %3190 = vmatpush1.bf16.msra.mxu0 %v2773_v13  ;;  %v2820_v19 = vld [vmem:[#allocation2 + $0x228] sm:$0xff]  ;;  %v2822_v16 = vld [vmem:[#allocation2 + $0x238] sm:$0xff]  ;;  %v2819_v26 = vld [vmem:[#allocation2 + $0x220] sm:$0xff] }
 0x5da   :  { %3027 = vmatprep.subr.bf16.mxu1 %v2776_v36  ;;  %3191 = vmatprep.subr.bf16.mxu0 %v2778_v40  ;;  %v2821_v10 = vld [vmem:[#allocation2 + $0x230] sm:$0xff]  ;;  %v2824_v59 = vld [vmem:[#allocation2 + $0x248] sm:$0xff]  ;;  %v2826_v22 = vld [vmem:[#allocation2 + $0x258] sm:$0xff] }
 0x5db   :  { %v2823_v43 = vld [vmem:[#allocation2 + $0x240] sm:$0xff]  ;;  %v2825_v34 = vld [vmem:[#allocation2 + $0x250] sm:$0xff]  ;;  %v2828_v50 = vld [vmem:[#allocation2 + $0x268] sm:$0xff] }
 0x5dc   :  { %v2830_v49 = vld [vmem:[#allocation2 + $0x278] sm:$0xff]  ;;  %v2827_v0 = vld [vmem:[#allocation2 + $0x260] sm:$0xff]  ;;  %v2829_v37 = vld [vmem:[#allocation2 + $0x270] sm:$0xff] }
 0x5dd   :  { %3028 = vmatpush1.bf16.msra.mxu1 %v2775_v7  ;;  %3192 = vmatpush1.bf16.msra.mxu0 %v2777_v54  ;;  %v2832_v13 = vld [vmem:[#allocation2 + $0x288] sm:$0xff]  ;;  %v2834_v36 = vld [vmem:[#allocation2 + $0x298] sm:$0xff]  ;;  %v2831_v40 = vld [vmem:[#allocation2 + $0x280] sm:$0xff] }
 0x5de   :  { %3029 = vmatprep.subr.bf16.mxu1 %v2780_v6  ;;  %3193 = vmatprep.subr.bf16.mxu0 %v2782_v48  ;;  %v2833_v7 = vld [vmem:[#allocation2 + $0x290] sm:$0xff]  ;;  %v2836_v54 = vld [vmem:[#allocation2 + $0x2a8] sm:$0xff]  ;;  %v2838_v6 = vld [vmem:[#allocation2 + $0x2b8] sm:$0xff] }
 0x5df   :  { %v2835_v48 = vld [vmem:[#allocation2 + $0x2a0] sm:$0xff] }
 0x5e1   :  { %3030 = vmatpush1.bf16.msra.mxu1 %v2779_v33  ;;  %3194 = vmatpush1.bf16.msra.mxu0 %v2781_v30  ;;  %v2837_v33 = vld [vmem:[#allocation2 + $0x2b0] sm:$0xff]  ;;  %v2840_v30 = vld [vmem:[#allocation2 + $0x2c8] sm:$0xff] }
 0x5e2   :  { %3031 = vmatprep.subr.bf16.mxu1 %v2784_v51  ;;  %3195 = vmatprep.subr.bf16.mxu0 %v2786_v18  ;;  %v2842_v51 = vld [vmem:[#allocation2 + $0x2d8] sm:$0xff]  ;;  %v2839_v18 = vld [vmem:[#allocation2 + $0x2c0] sm:$0xff] }
 0x5e5   :  { %3032 = vmatpush1.bf16.msra.mxu1 %v2783_v15  ;;  %3196 = vmatpush1.bf16.msra.mxu0 %v2785_v47  ;;  %v2841_v15 = vld [vmem:[#allocation2 + $0x2d0] sm:$0xff]  ;;  %v2844_v47 = vld [vmem:[#allocation2 + $0x2e8] sm:$0xff] }
 0x5e6   :  { %3033 = vmatprep.subr.bf16.mxu1 %v2788_v31  ;;  %3197 = vmatprep.subr.bf16.mxu0 %v2790_v56  ;;  %v2846_v31 = vld [vmem:[#allocation2 + $0x2f8] sm:$0xff]  ;;  %v2843_v56 = vld [vmem:[#allocation2 + $0x2e0] sm:$0xff] }
 0x5e9   :  { %3034 = vmatpush1.bf16.msra.mxu1 %v2787_v8  ;;  %3198 = vmatpush1.bf16.msra.mxu0 %v2789_v63  ;;  %v2845_v8 = vld [vmem:[#allocation2 + $0x2f0] sm:$0xff]  ;;  %v2848_v63 = vld [vmem:[#allocation2 + $0x308] sm:$0xff] }
 0x5ea   :  { %3035 = vmatprep.subr.bf16.mxu1 %v2792_v61  ;;  %3199 = vmatprep.subr.bf16.mxu0 %v2794_v12  ;;  %v2850_v61 = vld [vmem:[#allocation2 + $0x318] sm:$0xff]  ;;  %v2847_v12 = vld [vmem:[#allocation2 + $0x300] sm:$0xff] }
 0x5ed   :  { %3036 = vmatpush1.bf16.msra.mxu1 %v2791_v23  ;;  %3200 = vmatpush1.bf16.msra.mxu0 %v2793_v5  ;;  %v2849_v23 = vld [vmem:[#allocation2 + $0x310] sm:$0xff]  ;;  %v2852_v5 = vld [vmem:[#allocation2 + $0x328] sm:$0xff] }
 0x5ee   :  { %3037 = vmatprep.subr.bf16.mxu1 %v2796_v57  ;;  %3201 = vmatprep.subr.bf16.mxu0 %v2798_v1  ;;  %v2854_v57 = vld [vmem:[#allocation2 + $0x338] sm:$0xff]  ;;  %v2851_v1 = vld [vmem:[#allocation2 + $0x320] sm:$0xff] }
 0x5f1   :  { %3038 = vmatpush1.bf16.msra.mxu1 %v2795_v25  ;;  %3202 = vmatpush1.bf16.msra.mxu0 %v2797_v2  ;;  %v2853_v25 = vld [vmem:[#allocation2 + $0x330] sm:$0xff]  ;;  %v2856_v2 = vld [vmem:[#allocation2 + $0x348] sm:$0xff] }
 0x5f2   :  { %3039 = vmatprep.subr.bf16.mxu1 %v2800_v52  ;;  %3203 = vmatprep.subr.bf16.mxu0 %v2802_v9  ;;  %v2858_v52 = vld [vmem:[#allocation2 + $0x358] sm:$0xff]  ;;  %v2855_v9 = vld [vmem:[#allocation2 + $0x340] sm:$0xff] }
 0x5f5   :  { %3040 = vmatpush1.bf16.msra.mxu1 %v2799_v35  ;;  %3204 = vmatpush1.bf16.msra.mxu0 %v2801_v11  ;;  %v2857_v35 = vld [vmem:[#allocation2 + $0x350] sm:$0xff]  ;;  %v2860_v11 = vld [vmem:[#allocation2 + $0x368] sm:$0xff] }
 0x5f6   :  { %3041 = vmatprep.subr.bf16.mxu1 %v2804_v20  ;;  %3205 = vmatprep.subr.bf16.mxu0 %v2806_v14  ;;  %v2862_v20 = vld [vmem:[#allocation2 + $0x378] sm:$0xff]  ;;  %v2859_v14 = vld [vmem:[#allocation2 + $0x360] sm:$0xff] }
 0x5f9   :  { %3042 = vmatpush1.bf16.msra.mxu1 %v2803_v24  ;;  %3206 = vmatpush1.bf16.msra.mxu0 %v2805_v28  ;;  %v2861_v24 = vld [vmem:[#allocation2 + $0x370] sm:$0xff]  ;;  %v2864_v28 = vld [vmem:[#allocation2 + $0x388] sm:$0xff] }
 0x5fa   :  { %3043 = vmatprep.subr.bf16.mxu1 %v2808_v4  ;;  %3207 = vmatprep.subr.bf16.mxu0 %v2810_v21  ;;  %v2866_v4 = vld [vmem:[#allocation2 + $0x398] sm:$0xff]  ;;  %v2863_v21 = vld [vmem:[#allocation2 + $0x380] sm:$0xff] }
 0x5fd   :  { %3044 = vmatpush1.bf16.msra.mxu1 %v2807_v55  ;;  %3208 = vmatpush1.bf16.msra.mxu0 %v2809_v45  ;;  %v2865_v55 = vld [vmem:[#allocation2 + $0x390] sm:$0xff]  ;;  %v2868_v45 = vld [vmem:[#allocation2 + $0x3a8] sm:$0xff] }
 0x5fe   :  { %3045 = vmatprep.subr.bf16.mxu1 %v2812_v27  ;;  %3209 = vmatprep.subr.bf16.mxu0 %v2814_v3  ;;  %v2870_v27 = vld [vmem:[#allocation2 + $0x3b8] sm:$0xff]  ;;  %v2867_v3 = vld [vmem:[#allocation2 + $0x3a0] sm:$0xff] }
 0x601   :  { %3046 = vmatpush1.bf16.msra.mxu1 %v2811_v62  ;;  %3210 = vmatpush1.bf16.msra.mxu0 %v2813_v58  ;;  %v2869_v62 = vld [vmem:[#allocation2 + $0x3b0] sm:$0xff]  ;;  %v2872_v58 = vld [vmem:[#allocation2 + $0x3c8] sm:$0xff] }
 0x602   :  { %3056 = vmatprep.subr.bf16.mxu1 %v2816_v38  ;;  %3220 = vmatprep.subr.bf16.mxu0 %v2818_v17  ;;  %v2874_v38 = vld [vmem:[#allocation2 + $0x3d8] sm:$0xff]  ;;  %v2871_v17 = vld [vmem:[#allocation2 + $0x3c0] sm:$0xff] }
 0x604   :  { %3048 = vmatmul.mubr.bf16.vlgmr.msra.gmra.mrb[32].mxu1 %v3007_v53  ;;  %3212 = vmatmul.mubr.bf16.vlgmr.msra.gmra.mrb[88].mxu0 %v3007_v53  ;;  %v2873_v53 = vld [vmem:[#allocation2 + $0x3d0] sm:$0xff] }
 0x605   :  { %3057 = vmatpush1.bf16.msra.mxu1 %v2815_v46  ;;  %3221 = vmatpush1.bf16.msra.mxu0 %v2817_v32  ;;  %v2876_v46 = vld [vmem:[#allocation2 + $0x3e8] sm:$0xff]  ;;  %v2878_v32 = vld [vmem:[#allocation2 + $0x3f8] sm:$0xff] }
 0x606   :  { %3058 = vmatprep.subr.bf16.mxu1 %v2820_v19  ;;  %3222 = vmatprep.subr.bf16.mxu0 %v2822_v16  ;;  %v2875_v19 = vld [vmem:[#allocation2 + $0x3e0] sm:$0xff]  ;;  %v2877_v16 = vld [vmem:[#allocation2 + $0x3f0] sm:$0xff] }
 0x607   :  { %3088 = vmatprep.mubr.bf16.mxu1 %v3010_v42  ;;  %3252 = vmatprep.mubr.bf16.mxu0 %v3010_v42  ;;  %v2880_v42 = vld [vmem:[#allocation2 + $0x408] sm:$0xff] }
 0x609   :  { %3059 = vmatpush1.bf16.msra.mxu1 %v2819_v26  ;;  %3223 = vmatpush1.bf16.msra.mxu0 %v2821_v10  ;;  %v2882_v26 = vld [vmem:[#allocation2 + $0x418] sm:$0xff]  ;;  %v3009_v10 = vpack.c.bf16 %v6768_v29, %v6768_v29  ;;  %v2888_v29 = vld [vmem:[#allocation2 + $0x448] sm:$0xff] }
 0x60a   :  { %3060 = vmatprep.subr.bf16.mxu1 %v2824_v59  ;;  %3224 = vmatprep.subr.bf16.mxu0 %v2826_v22  ;;  %v2879_v59 = vld [vmem:[#allocation2 + $0x400] sm:$0xff]  ;;  %v2881_v22 = vld [vmem:[#allocation2 + $0x410] sm:$0xff] }
 0x60d   :  { %3061 = vmatpush1.bf16.msra.mxu1 %v2823_v43  ;;  %3225 = vmatpush1.bf16.msra.mxu0 %v2825_v34  ;;  %v2884_v43 = vld [vmem:[#allocation2 + $0x428] sm:$0xff]  ;;  %v2886_v34 = vld [vmem:[#allocation2 + $0x438] sm:$0xff] }
 0x60e   :  { %3062 = vmatprep.subr.bf16.mxu1 %v2828_v50  ;;  %3226 = vmatprep.subr.bf16.mxu0 %v2830_v49  ;;  %v3012_v50 = vpack.c.bf16 %v6780_v60, %v6780_v60  ;;  %v2883_v49 = vld [vmem:[#allocation2 + $0x420] sm:$0xff]  ;;  %v2894_v60 = vld [vmem:[#allocation2 + $0x478] sm:$0xff] }
 0x611   :  { %3063 = vmatpush1.bf16.msra.mxu1 %v2827_v0  ;;  %3227 = vmatpush1.bf16.msra.mxu0 %v2829_v37  ;;  %v2885_v0 = vld [vmem:[#allocation2 + $0x430] sm:$0xff]  ;;  %v2890_v37 = vld [vmem:[#allocation2 + $0x458] sm:$0xff] }
 0x612   :  { %3064 = vmatprep.subr.bf16.mxu1 %v2832_v13  ;;  %3228 = vmatprep.subr.bf16.mxu0 %v2834_v36  ;;  %v2887_v13 = vld [vmem:[#allocation2 + $0x440] sm:$0xff]  ;;  %v2889_v36 = vld [vmem:[#allocation2 + $0x450] sm:$0xff] }
 0x615   :  { %3065 = vmatpush1.bf16.msra.mxu1 %v2831_v40  ;;  %3229 = vmatpush1.bf16.msra.mxu0 %v2833_v7  ;;  %v2892_v40 = vld [vmem:[#allocation2 + $0x468] sm:$0xff]  ;;  %v2891_v7 = vld [vmem:[#allocation2 + $0x460] sm:$0xff] }
 0x616   :  { %3066 = vmatprep.subr.bf16.mxu1 %v2836_v54  ;;  %3230 = vmatprep.subr.bf16.mxu0 %v2838_v6  ;;  %v2893_v54 = vld [vmem:[#allocation2 + $0x470] sm:$0xff]  ;;  %v2896_v6 = vld [vmem:[#allocation2 + $0x488] sm:$0xff] }
 0x619   :  { %3067 = vmatpush1.bf16.msra.mxu1 %v2835_v48  ;;  %3231 = vmatpush1.bf16.msra.mxu0 %v2837_v33  ;;  %v2898_v48 = vld [vmem:[#allocation2 + $0x498] sm:$0xff]  ;;  %v2895_v33 = vld [vmem:[#allocation2 + $0x480] sm:$0xff] }
 0x61a   :  { %3068 = vmatprep.subr.bf16.mxu1 %v2840_v30  ;;  %3232 = vmatprep.subr.bf16.mxu0 %v2842_v51  ;;  %v2897_v30 = vld [vmem:[#allocation2 + $0x490] sm:$0xff]  ;;  %v2900_v51 = vld [vmem:[#allocation2 + $0x4a8] sm:$0xff] }
 0x61d   :  { %3069 = vmatpush1.bf16.msra.mxu1 %v2839_v18  ;;  %3233 = vmatpush1.bf16.msra.mxu0 %v2841_v15  ;;  %v2902_v18 = vld [vmem:[#allocation2 + $0x4b8] sm:$0xff]  ;;  %v2899_v15 = vld [vmem:[#allocation2 + $0x4a0] sm:$0xff] }
 0x61e   :  { %3070 = vmatprep.subr.bf16.mxu1 %v2844_v47  ;;  %3234 = vmatprep.subr.bf16.mxu0 %v2846_v31  ;;  %v2901_v47 = vld [vmem:[#allocation2 + $0x4b0] sm:$0xff]  ;;  %v2904_v31 = vld [vmem:[#allocation2 + $0x4c8] sm:$0xff] }
 0x621   :  { %3071 = vmatpush1.bf16.msra.mxu1 %v2843_v56  ;;  %3235 = vmatpush1.bf16.msra.mxu0 %v2845_v8  ;;  %v2906_v56 = vld [vmem:[#allocation2 + $0x4d8] sm:$0xff]  ;;  %v2903_v8 = vld [vmem:[#allocation2 + $0x4c0] sm:$0xff] }
 0x622   :  { %3072 = vmatprep.subr.bf16.mxu1 %v2848_v63  ;;  %3236 = vmatprep.subr.bf16.mxu0 %v2850_v61  ;;  %v2905_v63 = vld [vmem:[#allocation2 + $0x4d0] sm:$0xff]  ;;  %v2908_v61 = vld [vmem:[#allocation2 + $0x4e8] sm:$0xff] }
 0x625   :  { %3073 = vmatpush1.bf16.msra.mxu1 %v2847_v12  ;;  %3237 = vmatpush1.bf16.msra.mxu0 %v2849_v23  ;;  %v2910_v12 = vld [vmem:[#allocation2 + $0x4f8] sm:$0xff]  ;;  %v2907_v23 = vld [vmem:[#allocation2 + $0x4e0] sm:$0xff] }
 0x626   :  { %3074 = vmatprep.subr.bf16.mxu1 %v2852_v5  ;;  %3238 = vmatprep.subr.bf16.mxu0 %v2854_v57  ;;  %v2909_v5 = vld [vmem:[#allocation2 + $0x4f0] sm:$0xff]  ;;  %v2912_v57 = vld [vmem:[#allocation2 + $0x508] sm:$0xff] }
 0x629   :  { %3075 = vmatpush1.bf16.msra.mxu1 %v2851_v1  ;;  %3239 = vmatpush1.bf16.msra.mxu0 %v2853_v25  ;;  %v2914_v1 = vld [vmem:[#allocation2 + $0x518] sm:$0xff]  ;;  %v2911_v25 = vld [vmem:[#allocation2 + $0x500] sm:$0xff] }
 0x62a   :  { %3076 = vmatprep.subr.bf16.mxu1 %v2856_v2  ;;  %3240 = vmatprep.subr.bf16.mxu0 %v2858_v52  ;;  %v2913_v2 = vld [vmem:[#allocation2 + $0x510] sm:$0xff]  ;;  %v2916_v52 = vld [vmem:[#allocation2 + $0x528] sm:$0xff] }
 0x62d   :  { %3077 = vmatpush1.bf16.msra.mxu1 %v2855_v9  ;;  %3241 = vmatpush1.bf16.msra.mxu0 %v2857_v35  ;;  %v2918_v9 = vld [vmem:[#allocation2 + $0x538] sm:$0xff]  ;;  %v2915_v35 = vld [vmem:[#allocation2 + $0x520] sm:$0xff] }
 0x62e   :  { %3078 = vmatprep.subr.bf16.mxu1 %v2860_v11  ;;  %3242 = vmatprep.subr.bf16.mxu0 %v2862_v20  ;;  %v2917_v11 = vld [vmem:[#allocation2 + $0x530] sm:$0xff]  ;;  %v2920_v20 = vld [vmem:[#allocation2 + $0x548] sm:$0xff] }
 0x631   :  { %3079 = vmatpush1.bf16.msra.mxu1 %v2859_v14  ;;  %3243 = vmatpush1.bf16.msra.mxu0 %v2861_v24  ;;  %v2922_v14 = vld [vmem:[#allocation2 + $0x558] sm:$0xff]  ;;  %v2919_v24 = vld [vmem:[#allocation2 + $0x540] sm:$0xff] }
 0x632   :  { %3080 = vmatprep.subr.bf16.mxu1 %v2864_v28  ;;  %3244 = vmatprep.subr.bf16.mxu0 %v2866_v4  ;;  %v2921_v28 = vld [vmem:[#allocation2 + $0x550] sm:$0xff]  ;;  %v2924_v4 = vld [vmem:[#allocation2 + $0x568] sm:$0xff] }
 0x635   :  { %3081 = vmatpush1.bf16.msra.mxu1 %v2863_v21  ;;  %3245 = vmatpush1.bf16.msra.mxu0 %v2865_v55  ;;  %v2926_v21 = vld [vmem:[#allocation2 + $0x578] sm:$0xff]  ;;  %v2923_v55 = vld [vmem:[#allocation2 + $0x560] sm:$0xff] }
 0x636   :  { %3082 = vmatprep.subr.bf16.mxu1 %v2868_v45  ;;  %3246 = vmatprep.subr.bf16.mxu0 %v2870_v27  ;;  %v2925_v45 = vld [vmem:[#allocation2 + $0x570] sm:$0xff]  ;;  %v2928_v27 = vld [vmem:[#allocation2 + $0x588] sm:$0xff] }
 0x639   :  { %3083 = vmatpush1.bf16.msra.mxu1 %v2867_v3  ;;  %3247 = vmatpush1.bf16.msra.mxu0 %v2869_v62  ;;  %v2930_v3 = vld [vmem:[#allocation2 + $0x598] sm:$0xff]  ;;  %v2927_v62 = vld [vmem:[#allocation2 + $0x580] sm:$0xff] }
 0x63a   :  { %3084 = vmatprep.subr.bf16.mxu1 %v2872_v58  ;;  %3248 = vmatprep.subr.bf16.mxu0 %v2874_v38  ;;  %v2929_v58 = vld [vmem:[#allocation2 + $0x590] sm:$0xff]  ;;  %v2932_v38 = vld [vmem:[#allocation2 + $0x5a8] sm:$0xff] }
 0x63d   :  { %3085 = vmatpush1.bf16.msra.mxu1 %v2871_v17  ;;  %3249 = vmatpush1.bf16.msra.mxu0 %v2873_v53  ;;  %v2934_v17 = vld [vmem:[#allocation2 + $0x5b8] sm:$0xff]  ;;  %v2931_v53 = vld [vmem:[#allocation2 + $0x5a0] sm:$0xff] }
 0x63e   :  { %3086 = vmatprep.subr.bf16.mxu1 %v2876_v46  ;;  %3250 = vmatprep.subr.bf16.mxu0 %v2878_v32  ;;  %v2933_v46 = vld [vmem:[#allocation2 + $0x5b0] sm:$0xff]  ;;  %v2936_v32 = vld [vmem:[#allocation2 + $0x5c8] sm:$0xff] }
 0x641   :  { %3087 = vmatpush1.bf16.msra.mxu1 %v2875_v19  ;;  %3251 = vmatpush1.bf16.msra.mxu0 %v2877_v16  ;;  %v2938_v19 = vld [vmem:[#allocation2 + $0x5d8] sm:$0xff]  ;;  %v2935_v16 = vld [vmem:[#allocation2 + $0x5c0] sm:$0xff] }
 0x642   :  { %3097 = vmatprep.subr.bf16.mxu1 %v2880_v42  ;;  %3261 = vmatprep.subr.bf16.mxu0 %v2882_v26  ;;  %v2937_v42 = vld [vmem:[#allocation2 + $0x5d0] sm:$0xff]  ;;  %v2940_v26 = vld [vmem:[#allocation2 + $0x5e8] sm:$0xff] }
 0x644   :  { %3089 = vmatmul.mubr.bf16.vlgmr.msra.gmra.mrb[32].mxu1 %v3009_v10  ;;  %3253 = vmatmul.mubr.bf16.vlgmr.msra.gmra.mrb[88].mxu0 %v3009_v10  ;;  %v2942_v10 = vld [vmem:[#allocation2 + $0x5f8] sm:$0xff] }
 0x645   :  { %3098 = vmatpush1.bf16.msra.mxu1 %v2879_v59  ;;  %3262 = vmatpush1.bf16.msra.mxu0 %v2881_v22  ;;  %v2939_v59 = vld [vmem:[#allocation2 + $0x5e0] sm:$0xff]  ;;  %v2941_v22 = vld [vmem:[#allocation2 + $0x5f0] sm:$0xff] }
 0x646   :  { %3099 = vmatprep.subr.bf16.mxu1 %v2884_v43  ;;  %3263 = vmatprep.subr.bf16.mxu0 %v2886_v34  ;;  %v2944_v43 = vld [vmem:[#allocation2 + $0x608] sm:$0xff]  ;;  %v2946_v34 = vld [vmem:[#allocation2 + $0x618] sm:$0xff] }
 0x647   :  { %3129 = vmatprep.mubr.bf16.mxu1 %v3012_v50  ;;  %3293 = vmatprep.mubr.bf16.mxu0 %v3012_v50  ;;  %v3011_v50 = vpack.c.bf16 %v6776_v39, %v6776_v39  ;;  %v2952_v39 = vld [vmem:[#allocation2 + $0x648] sm:$0xff] }
 0x649   :  { %3100 = vmatpush1.bf16.msra.mxu1 %v2883_v49  ;;  %3264 = vmatpush1.bf16.msra.mxu0 %v2885_v0  ;;  %v2943_v49 = vld [vmem:[#allocation2 + $0x600] sm:$0xff]  ;;  %v2945_v0 = vld [vmem:[#allocation2 + $0x610] sm:$0xff] }
 0x64a   :  { %3101 = vmatprep.subr.bf16.mxu1 %v2888_v29  ;;  %3265 = vmatprep.subr.bf16.mxu0 %v2890_v37  ;;  %v2948_v29 = vld [vmem:[#allocation2 + $0x628] sm:$0xff]  ;;  %v2950_v37 = vld [vmem:[#allocation2 + $0x638] sm:$0xff] }
 0x64d   :  { %3102 = vmatpush1.bf16.msra.mxu1 %v2887_v13  ;;  %3266 = vmatpush1.bf16.msra.mxu0 %v2889_v36  ;;  %v3014_v13 = vpack.c.bf16 %v6788_v44, %v6788_v44  ;;  %v2947_v36 = vld [vmem:[#allocation2 + $0x620] sm:$0xff]  ;;  %v2958_v44 = vld [vmem:[#allocation2 + $0x678] sm:$0xff] }
 0x64e   :  { %3103 = vmatprep.subr.bf16.mxu1 %v2892_v40  ;;  %3267 = vmatprep.subr.bf16.mxu0 %v2894_v60  ;;  %v2949_v40 = vld [vmem:[#allocation2 + $0x630] sm:$0xff]  ;;  %v2954_v60 = vld [vmem:[#allocation2 + $0x658] sm:$0xff] }
 0x651   :  { %3104 = vmatpush1.bf16.msra.mxu1 %v2891_v7  ;;  %3268 = vmatpush1.bf16.msra.mxu0 %v2893_v54  ;;  %v2951_v7 = vld [vmem:[#allocation2 + $0x640] sm:$0xff]  ;;  %v2953_v54 = vld [vmem:[#allocation2 + $0x650] sm:$0xff] }
 0x652   :  { %3105 = vmatprep.subr.bf16.mxu1 %v2896_v6  ;;  %3269 = vmatprep.subr.bf16.mxu0 %v2898_v48  ;;  %v2956_v6 = vld [vmem:[#allocation2 + $0x668] sm:$0xff]  ;;  %v2955_v48 = vld [vmem:[#allocation2 + $0x660] sm:$0xff] }
 0x655   :  { %3106 = vmatpush1.bf16.msra.mxu1 %v2895_v33  ;;  %3270 = vmatpush1.bf16.msra.mxu0 %v2897_v30  ;;  %v2957_v33 = vld [vmem:[#allocation2 + $0x670] sm:$0xff]  ;;  %v2960_v30 = vld [vmem:[#allocation2 + $0x688] sm:$0xff] }
 0x656   :  { %3107 = vmatprep.subr.bf16.mxu1 %v2900_v51  ;;  %3271 = vmatprep.subr.bf16.mxu0 %v2902_v18  ;;  %v2962_v51 = vld [vmem:[#allocation2 + $0x698] sm:$0xff]  ;;  %v2959_v18 = vld [vmem:[#allocation2 + $0x680] sm:$0xff] }
 0x659   :  { %3108 = vmatpush1.bf16.msra.mxu1 %v2899_v15  ;;  %3272 = vmatpush1.bf16.msra.mxu0 %v2901_v47  ;;  %v2961_v15 = vld [vmem:[#allocation2 + $0x690] sm:$0xff]  ;;  %v2964_v47 = vld [vmem:[#allocation2 + $0x6a8] sm:$0xff] }
 0x65a   :  { %3109 = vmatprep.subr.bf16.mxu1 %v2904_v31  ;;  %3273 = vmatprep.subr.bf16.mxu0 %v2906_v56  ;;  %v2966_v31 = vld [vmem:[#allocation2 + $0x6b8] sm:$0xff]  ;;  %v2963_v56 = vld [vmem:[#allocation2 + $0x6a0] sm:$0xff] }
 0x65d   :  { %3110 = vmatpush1.bf16.msra.mxu1 %v2903_v8  ;;  %3274 = vmatpush1.bf16.msra.mxu0 %v2905_v63  ;;  %v2965_v8 = vld [vmem:[#allocation2 + $0x6b0] sm:$0xff]  ;;  %v2968_v63 = vld [vmem:[#allocation2 + $0x6c8] sm:$0xff] }
 0x65e   :  { %3111 = vmatprep.subr.bf16.mxu1 %v2908_v61  ;;  %3275 = vmatprep.subr.bf16.mxu0 %v2910_v12  ;;  %v2970_v61 = vld [vmem:[#allocation2 + $0x6d8] sm:$0xff]  ;;  %v2967_v12 = vld [vmem:[#allocation2 + $0x6c0] sm:$0xff] }
 0x661   :  { %3112 = vmatpush1.bf16.msra.mxu1 %v2907_v23  ;;  %3276 = vmatpush1.bf16.msra.mxu0 %v2909_v5  ;;  %v2969_v23 = vld [vmem:[#allocation2 + $0x6d0] sm:$0xff]  ;;  %v2972_v5 = vld [vmem:[#allocation2 + $0x6e8] sm:$0xff] }
 0x662   :  { %3113 = vmatprep.subr.bf16.mxu1 %v2912_v57  ;;  %3277 = vmatprep.subr.bf16.mxu0 %v2914_v1  ;;  %v2974_v57 = vld [vmem:[#allocation2 + $0x6f8] sm:$0xff]  ;;  %v2971_v1 = vld [vmem:[#allocation2 + $0x6e0] sm:$0xff] }
 0x665   :  { %3114 = vmatpush1.bf16.msra.mxu1 %v2911_v25  ;;  %3278 = vmatpush1.bf16.msra.mxu0 %v2913_v2  ;;  %v2973_v25 = vld [vmem:[#allocation2 + $0x6f0] sm:$0xff]  ;;  %v2976_v2 = vld [vmem:[#allocation2 + $0x708] sm:$0xff] }
 0x666   :  { %3115 = vmatprep.subr.bf16.mxu1 %v2916_v52  ;;  %3279 = vmatprep.subr.bf16.mxu0 %v2918_v9  ;;  %v2978_v52 = vld [vmem:[#allocation2 + $0x718] sm:$0xff]  ;;  %v2975_v9 = vld [vmem:[#allocation2 + $0x700] sm:$0xff] }
 0x669   :  { %3116 = vmatpush1.bf16.msra.mxu1 %v2915_v35  ;;  %3280 = vmatpush1.bf16.msra.mxu0 %v2917_v11  ;;  %v2977_v35 = vld [vmem:[#allocation2 + $0x710] sm:$0xff]  ;;  %v2980_v11 = vld [vmem:[#allocation2 + $0x728] sm:$0xff] }
 0x66a   :  { %3117 = vmatprep.subr.bf16.mxu1 %v2920_v20  ;;  %3281 = vmatprep.subr.bf16.mxu0 %v2922_v14  ;;  %v2982_v20 = vld [vmem:[#allocation2 + $0x738] sm:$0xff]  ;;  %v2979_v14 = vld [vmem:[#allocation2 + $0x720] sm:$0xff] }
 0x66d   :  { %3118 = vmatpush1.bf16.msra.mxu1 %v2919_v24  ;;  %3282 = vmatpush1.bf16.msra.mxu0 %v2921_v28  ;;  %v2981_v24 = vld [vmem:[#allocation2 + $0x730] sm:$0xff]  ;;  %v2984_v28 = vld [vmem:[#allocation2 + $0x748] sm:$0xff] }
 0x66e   :  { %3119 = vmatprep.subr.bf16.mxu1 %v2924_v4  ;;  %3283 = vmatprep.subr.bf16.mxu0 %v2926_v21  ;;  %v2986_v4 = vld [vmem:[#allocation2 + $0x758] sm:$0xff]  ;;  %v2983_v21 = vld [vmem:[#allocation2 + $0x740] sm:$0xff] }
 0x671   :  { %3120 = vmatpush1.bf16.msra.mxu1 %v2923_v55  ;;  %3284 = vmatpush1.bf16.msra.mxu0 %v2925_v45  ;;  %v2985_v55 = vld [vmem:[#allocation2 + $0x750] sm:$0xff]  ;;  %v2988_v45 = vld [vmem:[#allocation2 + $0x768] sm:$0xff] }
 0x672   :  { %3121 = vmatprep.subr.bf16.mxu1 %v2928_v27  ;;  %3285 = vmatprep.subr.bf16.mxu0 %v2930_v3  ;;  %v2990_v27 = vld [vmem:[#allocation2 + $0x778] sm:$0xff]  ;;  %v2987_v3 = vld [vmem:[#allocation2 + $0x760] sm:$0xff] }
 0x675   :  { %3122 = vmatpush1.bf16.msra.mxu1 %v2927_v62  ;;  %3286 = vmatpush1.bf16.msra.mxu0 %v2929_v58  ;;  %v2989_v62 = vld [vmem:[#allocation2 + $0x770] sm:$0xff]  ;;  %v2992_v58 = vld [vmem:[#allocation2 + $0x788] sm:$0xff] }
 0x676   :  { %3123 = vmatprep.subr.bf16.mxu1 %v2932_v38  ;;  %3287 = vmatprep.subr.bf16.mxu0 %v2934_v17  ;;  %v2994_v38 = vld [vmem:[#allocation2 + $0x798] sm:$0xff]  ;;  %v2991_v17 = vld [vmem:[#allocation2 + $0x780] sm:$0xff] }
 0x679   :  { %3124 = vmatpush1.bf16.msra.mxu1 %v2931_v53  ;;  %3288 = vmatpush1.bf16.msra.mxu0 %v2933_v46  ;;  %v2993_v53 = vld [vmem:[#allocation2 + $0x790] sm:$0xff]  ;;  %v2996_v46 = vld [vmem:[#allocation2 + $0x7a8] sm:$0xff] }
 0x67a   :  { %3125 = vmatprep.subr.bf16.mxu1 %v2936_v32  ;;  %3289 = vmatprep.subr.bf16.mxu0 %v2938_v19  ;;  %v2998_v32 = vld [vmem:[#allocation2 + $0x7b8] sm:$0xff]  ;;  %v2995_v19 = vld [vmem:[#allocation2 + $0x7a0] sm:$0xff] }
 0x67d   :  { %3126 = vmatpush1.bf16.msra.mxu1 %v2935_v16  ;;  %3290 = vmatpush1.bf16.msra.mxu0 %v2937_v42  ;;  %v2997_v16 = vld [vmem:[#allocation2 + $0x7b0] sm:$0xff]  ;;  %v3000_v42 = vld [vmem:[#allocation2 + $0x7c8] sm:$0xff] }
 0x67e   :  { %3127 = vmatprep.subr.bf16.mxu1 %v2940_v26  ;;  %3291 = vmatprep.subr.bf16.mxu0 %v2942_v10  ;;  %v3002_v26 = vld [vmem:[#allocation2 + $0x7d8] sm:$0xff]  ;;  %v2999_v10 = vld [vmem:[#allocation2 + $0x7c0] sm:$0xff] }
 0x681   :  { %3128 = vmatpush1.bf16.msra.mxu1 %v2939_v59  ;;  %3292 = vmatpush1.bf16.msra.mxu0 %v2941_v22  ;;  %v3001_v59 = vld [vmem:[#allocation2 + $0x7d0] sm:$0xff]  ;;  %v3004_v22 = vld [vmem:[#allocation2 + $0x7e8] sm:$0xff] }
 0x682   :  { %3138 = vmatprep.subr.bf16.mxu1 %v2944_v43  ;;  %3302 = vmatprep.subr.bf16.mxu0 %v2946_v34  ;;  %v3006_v43 = vld [vmem:[#allocation2 + $0x7f8] sm:$0xff]  ;;  %v3003_v34 = vld [vmem:[#allocation2 + $0x7e0] sm:$0xff] }
 0x684   :  { %3130 = vmatmul.mubr.bf16.vlgmr.msra.gmra.mrb[32].mxu1 %v3011_v50  ;;  %3294 = vmatmul.mubr.bf16.vlgmr.msra.gmra.mrb[88].mxu0 %v3011_v50  ;;  %v3005_v50 = vld [vmem:[#allocation2 + $0x7f0] sm:$0xff] }
 0x685   :  { %3139 = vmatpush1.bf16.msra.mxu1 %v2943_v49  ;;  %3303 = vmatpush1.bf16.msra.mxu0 %v2945_v0  ;;  %v3013_v49 = vpack.c.bf16 %v6784_v41, %v6784_v41 }
 0x686   :  { %3140 = vmatprep.subr.bf16.mxu1 %v2948_v29  ;;  %3304 = vmatprep.subr.bf16.mxu0 %v2950_v37 }
 0x687   :  { %3170 = vmatprep.mubr.bf16.mxu1 %v3014_v13  ;;  %3334 = vmatprep.mubr.bf16.mxu0 %v3014_v13 }
 0x689   :  { %3141 = vmatpush1.bf16.msra.mxu1 %v2947_v36  ;;  %3305 = vmatpush1.bf16.msra.mxu0 %v2949_v40 }
 0x68a   :  { %3142 = vmatprep.subr.bf16.mxu1 %v2952_v39  ;;  %3306 = vmatprep.subr.bf16.mxu0 %v2954_v60 }
 0x68d   :  { %3143 = vmatpush1.bf16.msra.mxu1 %v2951_v7  ;;  %3307 = vmatpush1.bf16.msra.mxu0 %v2953_v54 }
 0x68e   :  { %3144 = vmatprep.subr.bf16.mxu1 %v2956_v6  ;;  %3308 = vmatprep.subr.bf16.mxu0 %v2958_v44 }
 0x691   :  { %3145 = vmatpush1.bf16.msra.mxu1 %v2955_v48  ;;  %3309 = vmatpush1.bf16.msra.mxu0 %v2957_v33 }
 0x692   :  { %3146 = vmatprep.subr.bf16.mxu1 %v2960_v30  ;;  %3310 = vmatprep.subr.bf16.mxu0 %v2962_v51 }
 0x695   :  { %3147 = vmatpush1.bf16.msra.mxu1 %v2959_v18  ;;  %3311 = vmatpush1.bf16.msra.mxu0 %v2961_v15 }
 0x696   :  { %3148 = vmatprep.subr.bf16.mxu1 %v2964_v47  ;;  %3312 = vmatprep.subr.bf16.mxu0 %v2966_v31 }
 0x699   :  { %3149 = vmatpush1.bf16.msra.mxu1 %v2963_v56  ;;  %3313 = vmatpush1.bf16.msra.mxu0 %v2965_v8 }
 0x69a   :  { %3150 = vmatprep.subr.bf16.mxu1 %v2968_v63  ;;  %3314 = vmatprep.subr.bf16.mxu0 %v2970_v61 }
 0x69d   :  { %3151 = vmatpush1.bf16.msra.mxu1 %v2967_v12  ;;  %3315 = vmatpush1.bf16.msra.mxu0 %v2969_v23 }
 0x69e   :  { %3152 = vmatprep.subr.bf16.mxu1 %v2972_v5  ;;  %3316 = vmatprep.subr.bf16.mxu0 %v2974_v57 }
 0x6a1   :  { %3153 = vmatpush1.bf16.msra.mxu1 %v2971_v1  ;;  %3317 = vmatpush1.bf16.msra.mxu0 %v2973_v25 }
 0x6a2   :  { %3154 = vmatprep.subr.bf16.mxu1 %v2976_v2  ;;  %3318 = vmatprep.subr.bf16.mxu0 %v2978_v52 }
 0x6a5   :  { %3155 = vmatpush1.bf16.msra.mxu1 %v2975_v9  ;;  %3319 = vmatpush1.bf16.msra.mxu0 %v2977_v35 }
 0x6a6   :  { %3156 = vmatprep.subr.bf16.mxu1 %v2980_v11  ;;  %3320 = vmatprep.subr.bf16.mxu0 %v2982_v20 }
 0x6a9   :  { %3157 = vmatpush1.bf16.msra.mxu1 %v2979_v14  ;;  %3321 = vmatpush1.bf16.msra.mxu0 %v2981_v24 }
 0x6aa   :  { %3158 = vmatprep.subr.bf16.mxu1 %v2984_v28  ;;  %3322 = vmatprep.subr.bf16.mxu0 %v2986_v4 }
 0x6ad   :  { %3159 = vmatpush1.bf16.msra.mxu1 %v2983_v21  ;;  %3323 = vmatpush1.bf16.msra.mxu0 %v2985_v55 }
 0x6ae   :  { %3160 = vmatprep.subr.bf16.mxu1 %v2988_v45  ;;  %3324 = vmatprep.subr.bf16.mxu0 %v2990_v27 }
 0x6b1   :  { %3161 = vmatpush1.bf16.msra.mxu1 %v2987_v3  ;;  %3325 = vmatpush1.bf16.msra.mxu0 %v2989_v62 }
 0x6b2   :  { %3162 = vmatprep.subr.bf16.mxu1 %v2992_v58  ;;  %3326 = vmatprep.subr.bf16.mxu0 %v2994_v38 }
 0x6b5   :  { %3163 = vmatpush1.bf16.msra.mxu1 %v2991_v17  ;;  %3327 = vmatpush1.bf16.msra.mxu0 %v2993_v53 }
 0x6b6   :  { %3164 = vmatprep.subr.bf16.mxu1 %v2996_v46  ;;  %3328 = vmatprep.subr.bf16.mxu0 %v2998_v32 }
 0x6b9   :  { %3165 = vmatpush1.bf16.msra.mxu1 %v2995_v19  ;;  %3329 = vmatpush1.bf16.msra.mxu0 %v2997_v16 }
 0x6ba   :  { %3166 = vmatprep.subr.bf16.mxu1 %v3000_v42  ;;  %3330 = vmatprep.subr.bf16.mxu0 %v3002_v26 }
 0x6bd   :  { %3167 = vmatpush1.bf16.msra.mxu1 %v2999_v10  ;;  %3331 = vmatpush1.bf16.msra.mxu0 %v3001_v59 }
 0x6be   :  { %3168 = vmatprep.subr.bf16.mxu1 %v3004_v22  ;;  %3332 = vmatprep.subr.bf16.mxu0 %v3006_v43 }
 0x6c1   :  { %3169 = vmatpush1.bf16.msra.mxu1 %v3003_v34  ;;  %3333 = vmatpush1.bf16.msra.mxu0 %v3005_v50 }
 0x6c4   :  { %3171 = vmatmul.mubr.bf16.vlgmr.msra.gmra.mrb[32].mxu1 %v3013_v49  ;;  %3335 = vmatmul.mubr.bf16.vlgmr.msra.gmra.mrb[88].mxu0 %v3013_v49 }
 0x797   :  { %v6804_v0 = vpop.f32.mrb[32].mxu1  ;;  %v6806_v29 = vpop.f32.mrb[88].mxu0 }
 0x798   :  { %v3348_v37 = vsel %vm3347_vm3, %v6804_v0, 0.0  ;;  %v3381_v13 = vmul.f32 %v6804_v0, %v6804_v0  ;;  %v3362_v36 = vsel %vm3347_vm3, %v6806_v29, 0.0  ;;  %v3383_v41 = vmul.f32 %v6806_v29, %v6806_v29  ;;  %v6816_v40 = vpop.f32.mrb[33].mxu1  ;;  %v6818_v39 = vpop.f32.mrb[89].mxu0 }
 0x799   :  { %v3349_v60 = vrot.slane %v3348_v37, 4  ;;  %v3363_v7 = vrot.slane %v3362_v36, 4  ;;  %v3355_v54 = vsel %vm3347_vm3, %v6816_v40, 0.0  ;;  %v3382_v6 = vmul.f32 %v6816_v40, %v6816_v40  ;;  %v3176_v44 = vpop.f32.mrb[34].mxu1  ;;  %v3340_v48 = vpop.f32.mrb[90].mxu0 }
 0x79a   :  { %v3385_v33 = vsel %vm3347_vm3, %v3381_v13, 0.0  ;;  %v3399_v30 = vsel %vm3347_vm3, %v3383_v41, 0.0  ;;  %v3356_v51 = vrot.slane %v3355_v54, 4  ;;  %v3369_v18 = vsel %vm3347_vm3, %v6818_v39, 0.0  ;;  %v3177_v15 = vpop.f32.mrb[35].mxu1  ;;  %v3341_v47 = vpop.f32.mrb[91].mxu0 }
 0x79b   :  { %v3350_v31 = vadd.f32 %v3349_v60, %v3348_v37  ;;  %v3386_v56 = vrot.slane %v3385_v33, 4  ;;  %v3364_v8 = vadd.f32 %v3363_v7, %v3362_v36  ;;  %v3400_v63 = vrot.slane %v3399_v30, 4 }
 0x79c   :  { %v3357_v61 = vadd.f32 %v3356_v51, %v3355_v54  ;;  %v3392_v12 = vsel %vm3347_vm3, %v3382_v6, 0.0  ;;  %v3370_v23 = vrot.slane %v3369_v18, 4  ;;  %v3384_v5 = vmul.f32 %v6818_v39, %v6818_v39 }
 0x79d   :  { %v3351_v57 = vrot.slane %v3350_v31, 2  ;;  %v3387_v1 = vadd.f32 %v3386_v56, %v3385_v33  ;;  %v3365_v25 = vrot.slane %v3364_v8, 2  ;;  %v3401_v2 = vadd.f32 %v3400_v63, %v3399_v30 }
 0x79e   :  { %v3358_v52 = vrot.slane %v3357_v61, 2  ;;  %v3393_v9 = vrot.slane %v3392_v12, 4  ;;  %v3371_v35 = vadd.f32 %v3370_v23, %v3369_v18  ;;  %v3406_v11 = vsel %vm3347_vm3, %v3384_v5, 0.0 }
 0x79f   :  { %v3352_v20 = vadd.f32 %v3351_v57, %v3350_v31  ;;  %v3388_v14 = vrot.slane %v3387_v1, 2  ;;  %v3366_v24 = vadd.f32 %v3365_v25, %v3364_v8  ;;  %v3402_v28 = vrot.slane %v3401_v2, 2  ;;  %v4112_v57 = vld [vmem:[%s6945_s4 + $0x6] ss:$8 sm:$0xf] }
 0x7a0   :  { %v3359_v4 = vadd.f32 %v3358_v52, %v3357_v61  ;;  %v3394_v21 = vadd.f32 %v3393_v9, %v3392_v12  ;;  %v3372_v55 = vrot.slane %v3371_v35, 2  ;;  %v3407_v45 = vrot.slane %v3406_v11, 4 }
 0x7a1   :  { %v3353_v27 = vrot.slane %v3352_v20, 1  ;;  %v3389_v3 = vadd.f32 %v3388_v14, %v3387_v1  ;;  %v3367_v62 = vrot.slane %v3366_v24, 1  ;;  %v3403_v58 = vadd.f32 %v3402_v28, %v3401_v2  ;;  %v7557_v1 = vld [vmem:[#allocation17_spill] sm:$0xff]  ;;  %v7558_v2 = vld [vmem:[#allocation18_spill] sm:$0xff]  ;;  %v7560_v28 = vld [vmem:[#allocation20_spill] sm:$0xff] }
 0x7a2   :  { %v3360_v38 = vrot.slane %v3359_v4, 1  ;;  %v3395_v17 = vrot.slane %v3394_v21, 2  ;;  %v3373_v53 = vadd.f32 %v3372_v55, %v3371_v35  ;;  %v3408_v46 = vadd.f32 %v3407_v45, %v3406_v11  ;;  %v7559_v35 = vld [vmem:[#allocation19_spill] sm:$0xff] }
 0x7a3   :  { %v3354_v32 = vadd.f32 %v3353_v27, %v3352_v20  ;;  %v3390_v19 = vrot.slane %v3389_v3, 1  ;;  %v3368_v16 = vadd.f32 %v3367_v62, %v3366_v24  ;;  %v3404_v42 = vrot.slane %v3403_v58, 1 }
 0x7a4   :  { %v3361_v26 = vadd.f32 %v3360_v38, %v3359_v4  ;;  %v3396_v10 = vadd.f32 %v3395_v17, %v3394_v21  ;;  %v3374_v59 = vrot.slane %v3373_v53, 1  ;;  %v3409_v22 = vrot.slane %v3408_v46, 2 }
 0x7a5   :  { %v3377_v43 = vmul.f32 0.5, %v3354_v32  ;;  %v3391_v34 = vadd.f32 %v3390_v19, %v3389_v3  ;;  %v3379_v50 = vmul.f32 0.5, %v3368_v16  ;;  %v3405_v49 = vadd.f32 %v3404_v42, %v3403_v58 }
 0x7a6   :  { %v3378_v37 = vmul.f32 0.5, %v3361_v26  ;;  %v3397_v13 = vrot.slane %v3396_v10, 1  ;;  %v3375_v36 = vadd.f32 %v3374_v59, %v3373_v53  ;;  %v3410_v41 = vadd.f32 %v3409_v22, %v3408_v46  ;;  %v7561_v53 = vld [vmem:[#allocation25_spill] sm:$0xff] }
 0x7a7   :  { %v3413_v60 = vmul.f32 0.5, %v3391_v34  ;;  %v3417_v7 = vmul.f32 %v3377_v43, %v3377_v43  ;;  %v3415_v54 = vmul.f32 0.5, %v3405_v49  ;;  %v3419_v6 = vmul.f32 %v3379_v50, %v3379_v50  ;;  %v4113_v59 = vld [vmem:[%s6945_s4 + $0x7] ss:$8 sm:$0xf] }
 0x7a8   :  { %v3398_v44 = vadd.f32 %v3397_v13, %v3396_v10  ;;  %v3418_v48 = vmul.f32 %v3378_v37, %v3378_v37  ;;  %v3380_v33 = vmul.f32 0.5, %v3375_v36  ;;  %v3411_v30 = vrot.slane %v3410_v41, 1 }
 0x7a9   :  { %v3421_v51 = vsub.f32 %v3413_v60, %v3417_v7  ;;  %v3423_v18 = vsub.f32 %v3415_v54, %v3419_v6  ;;  %v3437_v25 = vrot.slane %v4112_v57, %v7557_v1  ;;  %v3445_v52 = vrot.slane %v4112_v57, %v7558_v2 }
 0x7aa   :  { %v3414_v15 = vmul.f32 0.5, %v3398_v44  ;;  %v3412_v47 = vadd.f32 %v3411_v30, %v3410_v41  ;;  %v3420_v31 = vmul.f32 %v3380_v33, %v3380_v33  ;;  %v3441_v11 = vrot.slane %v4112_v57, %v7559_v35 }
 0x7ab   :  { %v3425_v56 = vadd.f32 1e-05, %v3421_v51  ;;  %v3427_v8 = vadd.f32 1e-05, %v3423_v18  ;;  %v3449_v4 = vrot.slane %v4112_v57, %v7560_v28 }
 0x7ac   :  { %v3422_v63 = vsub.f32 %v3414_v15, %v3418_v48  ;;  %v3416_v61 = vmul.f32 0.5, %v3412_v47 }
 0x7ad   :  { %4346 = vrsqrt.f32 %v3425_v56 }
 0x7ae   :  { %4348 = vrsqrt.f32 %v3427_v8  ;;  %v3426_v12 = vadd.f32 1e-05, %v3422_v63  ;;  %v3424_v23 = vsub.f32 %v3416_v61, %v3420_v31 }
 0x7b0   :  { %4350 = vrsqrt.f32 %v3426_v12  ;;  %v3428_v5 = vadd.f32 1e-05, %v3424_v23 }
 0x7b2   :  { %4352 = vrsqrt.f32 %v3428_v5 }
 0x7b7   :  { %v4347_v9 = vpop.eup %4346 }
 0x7b8   :  { %v4349_v20 = vpop.eup %4348  ;;  %v3454_v14 = vmul.f32 %v4347_v9, %v3437_v25 }
 0x7b9   :  { %v3456_v24 = vmul.f32 %v4349_v20, %v3445_v52 }
 0x7ba   :  { %v4351_v21 = vpop.eup %4350  ;;  %v3458_v55 = vmul.f32 %v3454_v14, %v3377_v43  ;;  %v3495_v42 = vrot.slane %v3454_v14, %v7557_v1 }
 0x7bb   :  { %v3455_v45 = vmul.f32 %v4351_v21, %v3441_v11  ;;  %v3460_v3 = vmul.f32 %v3456_v24, %v3379_v50  ;;  %v3503_v26 = vrot.slane %v3456_v24, %v7557_v1 }
 0x7bc   :  { %v4353_v27 = vpop.eup %4352  ;;  %v3508_v50 = vmul.f32 %v3495_v42, %v6804_v0 }
 0x7bd   :  { %v3459_v62 = vmul.f32 %v3455_v45, %v3378_v37  ;;  %v3457_v58 = vmul.f32 %v4353_v27, %v3449_v4  ;;  %v3499_v10 = vrot.slane %v3455_v45, %v7557_v1  ;;  %v3510_v49 = vmul.f32 %v3503_v26, %v6806_v29 }
 0x7bf   :  { %v3466_v38 = vcombine.low %v3458_v55, %v3459_v62  ;;  %v3461_v17 = vmul.f32 %v3457_v58, %v3380_v33  ;;  %v3507_v22 = vrot.slane %v3457_v58, %v7557_v1  ;;  %v3509_v37 = vmul.f32 %v3499_v10, %v6816_v40 }
 0x7c1   :  { %v3474_v46 = vrot.slane %v3466_v38, %v7561_v53  ;;  %v3467_v32 = vcombine.low %v3460_v3, %v3461_v17  ;;  %v3511_v13 = vmul.f32 %v3507_v22, %v6818_v39 }
 0x7c3   :  { %v3481_v19 = vrot.slane %v3467_v32, %v7561_v53 }
 0x7c5   :  { %v3482_v16 = vcombine.low %v3474_v46, %v3481_v19 }
 0x7c7   :  { %v3489_v43 = vrot.slane %v3482_v16, %v7561_v53 }
 0x7c9   :  { %v3491_v34 = vsub.f32 %v4113_v59, %v3489_v43 }
 0x7cb   :  { %v3516_v36 = vrot.slane %v3491_v34, %v7557_v1  ;;  %v3520_v41 = vrot.slane %v3491_v34, %v7559_v35  ;;  %v3524_v60 = vrot.slane %v3491_v34, %v7558_v2  ;;  %v3528_v7 = vrot.slane %v3491_v34, %v7560_v28 }
 0x7cd   :  { %v3533_v54 = vadd.f32 %v3516_v36, %v3508_v50  ;;  %v3534_v6 = vadd.f32 %v3520_v41, %v3509_v37  ;;  %v3535_v44 = vadd.f32 %v3524_v60, %v3510_v49  ;;  %v3536_v48 = vadd.f32 %v3528_v7, %v3511_v13 }
 0x7cf   :  { %v3537_v33 = vmul.f32 0.2, %v3533_v54  ;;  %v3538_v0 = vmul.f32 0.2, %v3534_v6  ;;  %v3539_v30 = vmul.f32 0.2, %v3535_v44 }
 0x7d0   :  { %v3540_v29 = vmul.f32 0.2, %v3536_v48 }
 0x7d1   :  { %v6857_v51 = vmax.f32 %v3533_v54, %v3537_v33  ;;  %v3542_v40 = vmax.f32 %v3534_v6, %v3538_v0  ;;  %v6859_v39 = vmax.f32 %v3535_v44, %v3539_v30 }
 0x7d2   :  { %v6861_v18 = vmax.f32 %v3536_v48, %v3540_v29 }
 0x7d3   :  { %4376 = dma.done.wait [#allocation4 + $0x1], 8192 }
 0x7d4   :  { %4377 = vsyncadd [#allocation4 + $0x1], 4294959104  ;;  %v3614_v15 = vpack.c.bf16 %v3542_v40, %v3542_v40  ;;  %v3550_v47 = vld [vmem:[#allocation3 + $0x8] sm:$0xff]  ;;  %v3549_v31 = vld [vmem:[#allocation3] sm:$0xff]  ;;  %v3613_v42 = vpack.c.bf16 %v6857_v51, %v6857_v51  ;;  %v3616_v26 = vpack.c.bf16 %v6861_v18, %v6861_v18 }
 0x7d5   :  { %v3552_v56 = vld [vmem:[#allocation3 + $0x18] sm:$0xff]  ;;  %3617 = vmatprep.subr.bf16.mxu1 %v3550_v47  ;;  %v3551_v8 = vld [vmem:[#allocation3 + $0x10] sm:$0xff]  ;;  %v3554_v63 = vld [vmem:[#allocation3 + $0x28] sm:$0xff] }
 0x7d6   :  { %3649 = vmatprep.mubr.bf16.mxu1 %v3614_v15  ;;  %3618 = vmatpush1.bf16.msra.mxu1 %v3549_v31  ;;  %v3553_v61 = vld [vmem:[#allocation3 + $0x20] sm:$0xff]  ;;  %v3556_v12 = vld [vmem:[#allocation3 + $0x38] sm:$0xff]  ;;  %v3555_v23 = vld [vmem:[#allocation3 + $0x30] sm:$0xff] }
 0x7d7   :  { %3619 = vmatprep.subr.bf16.mxu1 %v3552_v56  ;;  %v3558_v5 = vld [vmem:[#allocation3 + $0x48] sm:$0xff]  ;;  %v3557_v57 = vld [vmem:[#allocation3 + $0x40] sm:$0xff]  ;;  %v3560_v25 = vld [vmem:[#allocation3 + $0x58] sm:$0xff] }
 0x7d8   :  { %v3559_v2 = vld [vmem:[#allocation3 + $0x50] sm:$0xff]  ;;  %v3562_v52 = vld [vmem:[#allocation3 + $0x68] sm:$0xff]  ;;  %v3561_v9 = vld [vmem:[#allocation3 + $0x60] sm:$0xff] }
 0x7d9   :  { %v3564_v11 = vld [vmem:[#allocation3 + $0x78] sm:$0xff]  ;;  %v3563_v20 = vld [vmem:[#allocation3 + $0x70] sm:$0xff]  ;;  %v3566_v14 = vld [vmem:[#allocation3 + $0x88] sm:$0xff] }
 0x7da   :  { %3620 = vmatpush1.bf16.msra.mxu1 %v3551_v8  ;;  %v3565_v24 = vld [vmem:[#allocation3 + $0x80] sm:$0xff]  ;;  %v3568_v28 = vld [vmem:[#allocation3 + $0x98] sm:$0xff]  ;;  %v3567_v4 = vld [vmem:[#allocation3 + $0x90] sm:$0xff] }
 0x7db   :  { %3621 = vmatprep.subr.bf16.mxu1 %v3554_v63  ;;  %v3570_v21 = vld [vmem:[#allocation3 + $0xa8] sm:$0xff]  ;;  %v3569_v55 = vld [vmem:[#allocation3 + $0xa0] sm:$0xff]  ;;  %v3572_v45 = vld [vmem:[#allocation3 + $0xb8] sm:$0xff] }
 0x7dc   :  { %v3571_v27 = vld [vmem:[#allocation3 + $0xb0] sm:$0xff]  ;;  %v3574_v3 = vld [vmem:[#allocation3 + $0xc8] sm:$0xff]  ;;  %v3573_v62 = vld [vmem:[#allocation3 + $0xc0] sm:$0xff] }
 0x7dd   :  { %v3576_v58 = vld [vmem:[#allocation3 + $0xd8] sm:$0xff]  ;;  %v3575_v38 = vld [vmem:[#allocation3 + $0xd0] sm:$0xff]  ;;  %v3578_v17 = vld [vmem:[#allocation3 + $0xe8] sm:$0xff] }
 0x7de   :  { %3622 = vmatpush1.bf16.msra.mxu1 %v3553_v61  ;;  %v3577_v46 = vld [vmem:[#allocation3 + $0xe0] sm:$0xff]  ;;  %v3580_v32 = vld [vmem:[#allocation3 + $0xf8] sm:$0xff]  ;;  %v3579_v19 = vld [vmem:[#allocation3 + $0xf0] sm:$0xff] }
 0x7df   :  { %3623 = vmatprep.subr.bf16.mxu1 %v3556_v12  ;;  %v3582_v16 = vld [vmem:[#allocation3 + $0x108] sm:$0xff]  ;;  %v3581_v10 = vld [vmem:[#allocation3 + $0x100] sm:$0xff]  ;;  %v3584_v59 = vld [vmem:[#allocation3 + $0x118] sm:$0xff]  ;;  %v3615_v12 = vpack.c.bf16 %v6859_v39, %v6859_v39 }
 0x7e0   :  { %v3583_v22 = vld [vmem:[#allocation3 + $0x110] sm:$0xff]  ;;  %v3586_v43 = vld [vmem:[#allocation3 + $0x128] sm:$0xff]  ;;  %v3585_v34 = vld [vmem:[#allocation3 + $0x120] sm:$0xff] }
 0x7e1   :  { %v3588_v50 = vld [vmem:[#allocation3 + $0x138] sm:$0xff]  ;;  %v3587_v49 = vld [vmem:[#allocation3 + $0x130] sm:$0xff]  ;;  %v3590_v37 = vld [vmem:[#allocation3 + $0x148] sm:$0xff] }
 0x7e2   :  { %3624 = vmatpush1.bf16.msra.mxu1 %v3555_v23  ;;  %v3589_v13 = vld [vmem:[#allocation3 + $0x140] sm:$0xff]  ;;  %v3592_v36 = vld [vmem:[#allocation3 + $0x158] sm:$0xff]  ;;  %v3591_v41 = vld [vmem:[#allocation3 + $0x150] sm:$0xff] }
 0x7e3   :  { %3625 = vmatprep.subr.bf16.mxu1 %v3558_v5  ;;  %v3594_v60 = vld [vmem:[#allocation3 + $0x168] sm:$0xff]  ;;  %v3593_v7 = vld [vmem:[#allocation3 + $0x160] sm:$0xff]  ;;  %v3596_v54 = vld [vmem:[#allocation3 + $0x178] sm:$0xff] }
 0x7e4   :  { %v3595_v6 = vld [vmem:[#allocation3 + $0x170] sm:$0xff]  ;;  %v3598_v44 = vld [vmem:[#allocation3 + $0x188] sm:$0xff]  ;;  %v3597_v48 = vld [vmem:[#allocation3 + $0x180] sm:$0xff] }
 0x7e5   :  { %v3600_v33 = vld [vmem:[#allocation3 + $0x198] sm:$0xff]  ;;  %v3599_v0 = vld [vmem:[#allocation3 + $0x190] sm:$0xff]  ;;  %v3602_v30 = vld [vmem:[#allocation3 + $0x1a8] sm:$0xff] }
 0x7e6   :  { %3626 = vmatpush1.bf16.msra.mxu1 %v3557_v57  ;;  %v3601_v29 = vld [vmem:[#allocation3 + $0x1a0] sm:$0xff]  ;;  %v3604_v51 = vld [vmem:[#allocation3 + $0x1b8] sm:$0xff]  ;;  %v3603_v40 = vld [vmem:[#allocation3 + $0x1b0] sm:$0xff] }
 0x7e7   :  { %3627 = vmatprep.subr.bf16.mxu1 %v3560_v25  ;;  %v3606_v18 = vld [vmem:[#allocation3 + $0x1c8] sm:$0xff]  ;;  %v3605_v15 = vld [vmem:[#allocation3 + $0x1c0] sm:$0xff]  ;;  %v3608_v47 = vld [vmem:[#allocation3 + $0x1d8] sm:$0xff] }
 0x7e8   :  { %v3607_v31 = vld [vmem:[#allocation3 + $0x1d0] sm:$0xff]  ;;  %v3610_v56 = vld [vmem:[#allocation3 + $0x1e8] sm:$0xff]  ;;  %v3609_v8 = vld [vmem:[#allocation3 + $0x1e0] sm:$0xff] }
 0x7e9   :  { %v3612_v63 = vld [vmem:[#allocation3 + $0x1f8] sm:$0xff]  ;;  %v3611_v61 = vld [vmem:[#allocation3 + $0x1f0] sm:$0xff]  ;;  %v4354_v23 = vld [vmem:[%s6946_s5 + $0x40] sm:$0xff]  }
 0x7ea   :  { %3628 = vmatpush1.bf16.msra.mxu1 %v3559_v2  ;;  %v4355_v5 = vld [vmem:[%s6946_s5] sm:$0xff]   ;;  %4171 = vmatprep.subr.bf16.mxu0 %v4354_v23  ;;  %v4356_v57 = vld [vmem:[%s6946_s5 + $0x48] sm:$0xff]   ;;  %v4358_v25 = vld [vmem:[%s6946_s5 + $0x50] sm:$0xff]  }
 0x7eb   :  { %3629 = vmatprep.subr.bf16.mxu1 %v3562_v52  ;;  %4172 = vmatpush3.bf16.msra.mxu0 %v4355_v5  ;;  %v4357_v39 = vld [vmem:[%s6946_s5 + $0x8] sm:$0xff]   ;;  %v4359_v2 = vld [vmem:[%s6946_s5 + $0x10] sm:$0xff]   ;;  %v4360_v52 = vld [vmem:[%s6946_s5 + $0x58] sm:$0xff]  }
 0x7ec   :  { %4173 = vmatprep.subr.bf16.mxu0 %v4356_v57 }
 0x7ee   :  { %3630 = vmatpush1.bf16.msra.mxu1 %v3561_v9  ;;  %v4361_v9 = vld [vmem:[%s6946_s5 + $0x18] sm:$0xff]  }
 0x7ef   :  { %3631 = vmatprep.subr.bf16.mxu1 %v3564_v11  ;;  %4174 = vmatpush3.bf16.msra.mxu0 %v4357_v39  ;;  %v4362_v11 = vld [vmem:[%s6946_s5 + $0x60] sm:$0xff]  }
 0x7f0   :  { %4175 = vmatprep.subr.bf16.mxu0 %v4358_v25 }
 0x7f2   :  { %3632 = vmatpush1.bf16.msra.mxu1 %v3563_v20  ;;  %v4363_v20 = vld [vmem:[%s6946_s5 + $0x20] sm:$0xff]  }
 0x7f3   :  { %3633 = vmatprep.subr.bf16.mxu1 %v3566_v14  ;;  %4176 = vmatpush3.bf16.msra.mxu0 %v4359_v2  ;;  %v4364_v14 = vld [vmem:[%s6946_s5 + $0x68] sm:$0xff]  }
 0x7f4   :  { %4177 = vmatprep.subr.bf16.mxu0 %v4360_v52 }
 0x7f6   :  { %3634 = vmatpush1.bf16.msra.mxu1 %v3565_v24  ;;  %v4365_v24 = vld [vmem:[%s6946_s5 + $0x28] sm:$0xff]  }
 0x7f7   :  { %3635 = vmatprep.subr.bf16.mxu1 %v3568_v28  ;;  %4178 = vmatpush3.bf16.msra.mxu0 %v4361_v9  ;;  %v4366_v28 = vld [vmem:[%s6946_s5 + $0x70] sm:$0xff]  }
 0x7f8   :  { %4179 = vmatprep.subr.bf16.mxu0 %v4362_v11 }
 0x7fa   :  { %3636 = vmatpush1.bf16.msra.mxu1 %v3567_v4  ;;  %v4367_v4 = vld [vmem:[%s6946_s5 + $0x30] sm:$0xff]  }
 0x7fb   :  { %3637 = vmatprep.subr.bf16.mxu1 %v3570_v21  ;;  %4180 = vmatpush3.bf16.msra.mxu0 %v4363_v20  ;;  %v4368_v21 = vld [vmem:[%s6946_s5 + $0x78] sm:$0xff]  }
 0x7fc   :  { %4181 = vmatprep.subr.bf16.mxu0 %v4364_v14  ;;  %v4115_v14 = vld [vmem:[%s6945_s4 + $0x41] ss:$8 sm:$0x3] }
 0x7fe   :  { %3638 = vmatpush1.bf16.msra.mxu1 %v3569_v55  ;;  %v4369_v55 = vld [vmem:[%s6946_s5 + $0x38] sm:$0xff]  }
 0x7ff   :  { %3639 = vmatprep.subr.bf16.mxu1 %v3572_v45  ;;  %4182 = vmatpush3.bf16.msra.mxu0 %v4365_v24 }
 0x800   :  { %4183 = vmatprep.subr.bf16.mxu0 %v4366_v28 }
 0x802   :  { %3640 = vmatpush1.bf16.msra.mxu1 %v3571_v27 }
 0x803   :  { %3641 = vmatprep.subr.bf16.mxu1 %v3574_v3  ;;  %4184 = vmatpush3.bf16.msra.mxu0 %v4367_v4 }
 0x804   :  { %4185 = vmatprep.subr.bf16.mxu0 %v4368_v21 }
 0x806   :  { %3642 = vmatpush1.bf16.msra.mxu1 %v3573_v62 }
 0x807   :  { %3643 = vmatprep.subr.bf16.mxu1 %v3576_v58  ;;  %4186 = vmatpush3.bf16.msra.mxu0 %v4369_v55 }
 0x80a   :  { %3644 = vmatpush1.bf16.msra.mxu1 %v3575_v38 }
 0x80b   :  { %3645 = vmatprep.subr.bf16.mxu1 %v3578_v17 }
 0x80e   :  { %3646 = vmatpush1.bf16.msra.mxu1 %v3577_v46 }
 0x80f   :  { %3647 = vmatprep.subr.bf16.mxu1 %v3580_v32 }
 0x812   :  { %3648 = vmatpush1.bf16.msra.mxu1 %v3579_v19 }
 0x813   :  { %3658 = vmatprep.subr.bf16.mxu1 %v3582_v16 }
 0x815   :  { %3650 = vmatmul.mubr.bf16.vlgmr.msra.gmra.mrb[36].mxu1 %v3613_v42 }
 0x816   :  { %3659 = vmatpush1.bf16.msra.mxu1 %v3581_v10  ;;  %3690 = vmatprep.mubr.bf16.mxu1 %v3616_v26 }
 0x817   :  { %3660 = vmatprep.subr.bf16.mxu1 %v3584_v59 }
 0x81a   :  { %3661 = vmatpush1.bf16.msra.mxu1 %v3583_v22 }
 0x81b   :  { %3662 = vmatprep.subr.bf16.mxu1 %v3586_v43 }
 0x81e   :  { %3663 = vmatpush1.bf16.msra.mxu1 %v3585_v34 }
 0x81f   :  { %3664 = vmatprep.subr.bf16.mxu1 %v3588_v50 }
 0x822   :  { %3665 = vmatpush1.bf16.msra.mxu1 %v3587_v49 }
 0x823   :  { %3666 = vmatprep.subr.bf16.mxu1 %v3590_v37 }
 0x826   :  { %3667 = vmatpush1.bf16.msra.mxu1 %v3589_v13 }
 0x827   :  { %3668 = vmatprep.subr.bf16.mxu1 %v3592_v36 }
 0x82a   :  { %3669 = vmatpush1.bf16.msra.mxu1 %v3591_v41 }
 0x82b   :  { %3670 = vmatprep.subr.bf16.mxu1 %v3594_v60 }
 0x82e   :  { %3671 = vmatpush1.bf16.msra.mxu1 %v3593_v7 }
 0x82f   :  { %3672 = vmatprep.subr.bf16.mxu1 %v3596_v54 }
 0x832   :  { %3673 = vmatpush1.bf16.msra.mxu1 %v3595_v6 }
 0x833   :  { %3674 = vmatprep.subr.bf16.mxu1 %v3598_v44 }
 0x836   :  { %3675 = vmatpush1.bf16.msra.mxu1 %v3597_v48 }
 0x837   :  { %3676 = vmatprep.subr.bf16.mxu1 %v3600_v33 }
 0x83a   :  { %3677 = vmatpush1.bf16.msra.mxu1 %v3599_v0 }
 0x83b   :  { %3678 = vmatprep.subr.bf16.mxu1 %v3602_v30 }
 0x83e   :  { %3679 = vmatpush1.bf16.msra.mxu1 %v3601_v29 }
 0x83f   :  { %3680 = vmatprep.subr.bf16.mxu1 %v3604_v51 }
 0x842   :  { %3681 = vmatpush1.bf16.msra.mxu1 %v3603_v40 }
 0x843   :  { %3682 = vmatprep.subr.bf16.mxu1 %v3606_v18 }
 0x846   :  { %3683 = vmatpush1.bf16.msra.mxu1 %v3605_v15 }
 0x847   :  { %3684 = vmatprep.subr.bf16.mxu1 %v3608_v47 }
 0x84a   :  { %3685 = vmatpush1.bf16.msra.mxu1 %v3607_v31 }
 0x84b   :  { %3686 = vmatprep.subr.bf16.mxu1 %v3610_v56 }
 0x84e   :  { %3687 = vmatpush1.bf16.msra.mxu1 %v3609_v8 }
 0x84f   :  { %3688 = vmatprep.subr.bf16.mxu1 %v3612_v63 }
 0x852   :  { %3689 = vmatpush1.bf16.msra.mxu1 %v3611_v61 }
 0x855   :  { %3691 = vmatmul.mubr.bf16.vlgmr.msra.gmra.mrb[36].mxu1 %v3615_v12  ;;  %v4114_v12 = vld [vmem:[%s6945_s4 + $0x40] ss:$8 sm:$0x3] }
 0x856   :  { %v3749_v23 = vrot.slane %v4114_v12, %v7557_v1  ;;  %v3753_v5 = vrot.slane %v4114_v12, %v7559_v35 }
 0x928   :  { %v3692_v45 = vpop.f32.mrb[36].mxu1 }
 0x929   :  { %v3703_v27 = vsel %vm3347_vm3, %v3692_v45, 0.0  ;;  %v3719_v3 = vmul.f32 %v3692_v45, %v3692_v45  ;;  %v3694_v62 = vpop.f32.mrb[37].mxu1 }
 0x92a   :  { %v3704_v58 = vrot.slane %v3703_v27, 4  ;;  %v3710_v38 = vsel %vm3347_vm3, %v3694_v62, 0.0  ;;  %v3720_v17 = vmul.f32 %v3694_v62, %v3694_v62  ;;  %v3696_v46 = vpop.f32.mrb[38].mxu1 }
 0x92b   :  { %v3721_v32 = vsel %vm3347_vm3, %v3719_v3, 0.0  ;;  %v3711_v19 = vrot.slane %v3710_v38, 4  ;;  %v3697_v16 = vpop.f32.mrb[39].mxu1 }
 0x92c   :  { %v3705_v42 = vadd.f32 %v3704_v58, %v3703_v27  ;;  %v3722_v26 = vrot.slane %v3721_v32, 4  ;;  %v3728_v10 = vsel %vm3347_vm3, %v3720_v17, 0.0 }
 0x92d   :  { %v3712_v59 = vadd.f32 %v3711_v19, %v3710_v38  ;;  %v3729_v22 = vrot.slane %v3728_v10, 4 }
 0x92e   :  { %v3706_v43 = vrot.slane %v3705_v42, 2  ;;  %v3723_v34 = vadd.f32 %v3722_v26, %v3721_v32 }
 0x92f   :  { %v3713_v50 = vrot.slane %v3712_v59, 2  ;;  %v3730_v49 = vadd.f32 %v3729_v22, %v3728_v10 }
 0x930   :  { %v3707_v37 = vadd.f32 %v3706_v43, %v3705_v42  ;;  %v3724_v13 = vrot.slane %v3723_v34, 2 }
 0x931   :  { %v3714_v36 = vadd.f32 %v3713_v50, %v3712_v59  ;;  %v3731_v41 = vrot.slane %v3730_v49, 2 }
 0x932   :  { %v3708_v60 = vrot.slane %v3707_v37, 1  ;;  %v3725_v7 = vadd.f32 %v3724_v13, %v3723_v34 }
 0x933   :  { %v3715_v54 = vrot.slane %v3714_v36, 1  ;;  %v3732_v6 = vadd.f32 %v3731_v41, %v3730_v49 }
 0x934   :  { %v3709_v44 = vadd.f32 %v3708_v60, %v3707_v37  ;;  %v3726_v48 = vrot.slane %v3725_v7, 1 }
 0x935   :  { %v3716_v33 = vadd.f32 %v3715_v54, %v3714_v36  ;;  %v3733_v0 = vrot.slane %v3732_v6, 1 }
 0x936   :  { %v3717_v30 = vmul.f32 0.5, %v3709_v44  ;;  %v3727_v29 = vadd.f32 %v3726_v48, %v3725_v7 }
 0x937   :  { %v3718_v51 = vmul.f32 0.5, %v3716_v33  ;;  %v3734_v40 = vadd.f32 %v3733_v0, %v3732_v6 }
 0x938   :  { %v3735_v18 = vmul.f32 0.5, %v3727_v29  ;;  %v3737_v15 = vmul.f32 %v3717_v30, %v3717_v30 }
 0x939   :  { %v3736_v47 = vmul.f32 0.5, %v3734_v40  ;;  %v3738_v31 = vmul.f32 %v3718_v51, %v3718_v51 }
 0x93a   :  { %v3739_v56 = vsub.f32 %v3735_v18, %v3737_v15 }
 0x93b   :  { %v3740_v8 = vsub.f32 %v3736_v47, %v3738_v31 }
 0x93c   :  { %v3741_v63 = vadd.f32 1e-05, %v3739_v56 }
 0x93d   :  { %v3742_v61 = vadd.f32 1e-05, %v3740_v8 }
 0x93e   :  { %4370 = vrsqrt.f32 %v3741_v63 }
 0x93f   :  { %4372 = vrsqrt.f32 %v3742_v61 }
 0x948   :  { %v4371_v57 = vpop.eup %4370 }
 0x949   :  { %v4373_v39 = vpop.eup %4372  ;;  %v3756_v25 = vmul.f32 %v4371_v57, %v3749_v23 }
 0x94a   :  { %v3757_v2 = vmul.f32 %v4373_v39, %v3753_v5 }
 0x94b   :  { %v3758_v52 = vmul.f32 %v3756_v25, %v3717_v30  ;;  %v3782_v24 = vrot.slane %v3756_v25, %v7557_v1 }
 0x94c   :  { %v3759_v9 = vmul.f32 %v3757_v2, %v3718_v51  ;;  %v3786_v28 = vrot.slane %v3757_v2, %v7557_v1 }
 0x94d   :  { %v3787_v55 = vmul.f32 %v3782_v24, %v3692_v45 }
 0x94e   :  { %v3762_v11 = vcombine.low %v3758_v52, %v3759_v9  ;;  %v3788_v27 = vmul.f32 %v3786_v28, %v3694_v62 }
 0x950   :  { %v3769_v20 = vrot.slane %v3762_v11, %v7561_v53 }
 0x952   :  { %v3776_v4 = vrot.slane %v3769_v20, %v7561_v53  ;;  %v3840_v53 = vld [vmem:[%s6945_s4 + $0x42] ss:$0 sm:$0xff] }
 0x954   :  { %v3778_v21 = vsub.f32 %v4115_v14, %v3776_v4 }
 0x956   :  { %v3797_v3 = vrot.slane %v3778_v21, %v7559_v35  ;;  %v3793_v58 = vrot.slane %v3778_v21, %v7557_v1 }
 0x958   :  { %v3801_v38 = vadd.f32 %v3797_v3, %v3788_v27  ;;  %v3800_v17 = vadd.f32 %v3793_v58, %v3787_v55 }
 0x95a   :  { %v3803_v46 = vmul.f32 0.2, %v3801_v38  ;;  %v3802_v32 = vmul.f32 0.2, %v3800_v17 }
 0x95c   :  { %v3805_v19 = vmax.f32 %v3801_v38, %v3803_v46  ;;  %v3804_v16 = vmax.f32 %v3800_v17, %v3802_v32 }
 0x95e   :  { %v3839_v42 = vpack.c.bf16 %v3805_v19, %v3805_v19  ;;  %v3838_v26 = vpack.c.bf16 %v3804_v16, %v3804_v16 }
 0x960   :  { %3969 = vmatprep.mubr.bf16.mxu0 %v3839_v42 }
 0x961   :  { %3970 = vmatmul.mubr.bf16.vlgmr.msra.gmra.mrb[92].mxu0 %v3838_v26 }
 0xa34   :  { %v4187_v10 = vpop.f32.mrb[92].mxu0 }
 0xa35   :  { %v4188_v45 = vpop.f32.mrb[93].mxu0 }
 0xa36   :  { %v4189_v62 = vadd.f32 %v4188_v45, %v4187_v10  ;;  %v4190_v35 = vpop.f32.mrb[94].mxu0 }
 0xa37   :  { %v4191_v59 = vpop.f32.mrb[95].mxu0 }
 0xa38   :  { %v3972_v1 = vadd.f32 %v4189_v62, %v3840_v53 }
 0xa3a   :  { %3977 = vst [vmem:[%s6949_s8] sm:$0x3] %v3972_v1 }
 0xa3b   :  { %3982 = vsyncmov [#allocation4] }
 0xa3e   :  { %s3983_s23 = vpop.sfrf %3982 }
 0xa3f   :  { %p4132_p0 = scmp.ne.s32.totalorder %s3983_s23, 0 }
 0xa41   :  { %3987 = shalt.err (%p4132_p0)  }
 0xa42   :  { %3989 = vsyncmov [#allocation4 + $0x1] }
 0xa45   :  { %s3990_s24 = vpop.sfrf %3989 }
 0xa46   :  { %p4133_p1 = scmp.ne.s32.totalorder %s3990_s24, 0 }
 0xa48   :  { %3994 = shalt.err (%p4133_p1)  }

</bundles_post_ra>
